<compile_context>
chip_gen: v5e
topology: v5e:2x2
jax: 0.10.0
libtpu: 0.0.40
codegen_flags: <defaults>
</compile_context>

<pallas_src>
import jax
import jax.numpy as jnp
from jax.experimental import pallas as pl
from jax.experimental.pallas import tpu as pltpu

ACTIONS = 2


# --------------------------------------------------------------------------
# Pallas kernels
# --------------------------------------------------------------------------
def _conv1_pool_kernel(col_ref, w1_ref, b1_ref, o_ref, v_ref, c1_ref):
    """conv1 GEMM (400x256x32) + bias + relu + 2x2 maxpool, one image/step."""
    v = jnp.dot(col_ref[0], w1_ref[...], preferred_element_type=jnp.float32)
    v = jnp.maximum(v + b1_ref[...], 0.0)                  # (400, 32) f32
    v_ref[...] = v
    # scatter rows into a (20,20,32) spatial scratch (ref-window reads)
    for h in range(20):
        c1_ref[h] = v_ref[pl.ds(h * 20, 20), :]
    # 2x2/2 maxpool: strided reads along W, major-split reduce along H
    w_even = c1_ref[:, pl.ds(0, 10, 2), :]                 # (20,10,32)
    w_odd = c1_ref[:, pl.ds(1, 10, 2), :]
    m = jnp.maximum(w_even, w_odd)                         # (20,10,32)
    m = m.reshape(10, 2, 10, 32)                           # major-dim split
    o_ref[0] = jnp.max(m, axis=1).astype(o_ref.dtype)      # (10,10,32) bf16


def _conv2_conv3_kernel(col_ref, w2_ref, b2_ref, w3_ref, b3_ref, cm_ref,
                        o_ref, pad_ref):
    """conv2 (one 512-wide GEMM) + conv3 (in-kernel 3x3 via row shifts)."""
    # conv2 + relu on the lane-dense (25, 512) im2col block
    c2 = jnp.dot(col_ref[0], w2_ref[...], preferred_element_type=jnp.float32)
    c2 = jnp.maximum(c2 + b2_ref[...], 0.0)                # (25,64) f32
    # zero-padded flat copy of conv2's output for conv3's shift-gather:
    # scratch row 6+q holds flat spatial position q (q = h*5 + w).
    pad_ref[...] = jnp.zeros_like(pad_ref)
    pad_ref[6:31, :] = c2.astype(pad_ref.dtype)
    acc = jnp.zeros((25, 64), jnp.float32)
    for di in range(3):
        for dj in range(3):
            t = di * 3 + dj
            delta = (di - 1) * 5 + (dj - 1)                # flat shift
            tap = pad_ref[pl.ds(6 + delta, 25), :]         # (25,64) bf16
            prod = jnp.dot(tap, w3_ref[t * 64:(t + 1) * 64, :],
                           preferred_element_type=jnp.float32)
            # column validity masks (row wrap handled by zero padding);
            # row-scaling commutes with the matmul so mask after the dot.
            if dj == 0:
                prod = prod * cm_ref[:, 0:1]               # valid iff w >= 1
            elif dj == 2:
                prod = prod * cm_ref[:, 1:2]               # valid iff w <= 3
            acc = acc + prod
    o_ref[0] = jnp.maximum(acc + b3_ref[...], 0.0).astype(o_ref.dtype)


def _fc_fused_kernel(x_ref, w1_ref, b1_ref, w2_ref, b2_ref, o_ref):
    """out = relu(x @ w1 + b1) @ w2 + b2 ; hidden stays in VMEM/registers."""
    h = jnp.dot(x_ref[...], w1_ref[...], preferred_element_type=jnp.float32)
    h = jnp.maximum(h + b1_ref[...], 0.0)
    o = jnp.dot(h.astype(jnp.bfloat16), w2_ref[...],
                preferred_element_type=jnp.float32)
    o_ref[...] = o + b2_ref[...]


# --------------------------------------------------------------------------
# Pallas wrappers
# --------------------------------------------------------------------------
def conv1_pool_pallas(col1, w1, b1):
    N = col1.shape[0]
    return pl.pallas_call(
        _conv1_pool_kernel,
        out_shape=jax.ShapeDtypeStruct((N, 10, 10, 32), jnp.bfloat16),
        grid=(N,),
        in_specs=[
            pl.BlockSpec((1, 400, 256), lambda i: (i, 0, 0)),
            pl.BlockSpec((256, 32), lambda i: (0, 0)),
            pl.BlockSpec((1, 32), lambda i: (0, 0)),
        ],
        out_specs=pl.BlockSpec((1, 10, 10, 32), lambda i: (i, 0, 0, 0)),
        scratch_shapes=[pltpu.VMEM((400, 32), jnp.float32),
                        pltpu.VMEM((20, 20, 32), jnp.float32)],
        compiler_params=pltpu.CompilerParams(dimension_semantics=("parallel",)),
    )(col1, w1, b1)


def conv2_conv3_pallas(col2, w2, b2, w3, b3, cmask):
    N = col2.shape[0]
    return pl.pallas_call(
        _conv2_conv3_kernel,
        out_shape=jax.ShapeDtypeStruct((N, 25, 64), jnp.bfloat16),
        grid=(N,),
        in_specs=[
            pl.BlockSpec((1, 25, 512), lambda i: (i, 0, 0)),
            pl.BlockSpec((512, 64), lambda i: (0, 0)),
            pl.BlockSpec((1, 64), lambda i: (0, 0)),
            pl.BlockSpec((576, 64), lambda i: (0, 0)),
            pl.BlockSpec((1, 64), lambda i: (0, 0)),
            pl.BlockSpec((25, 2), lambda i: (0, 0)),
        ],
        out_specs=pl.BlockSpec((1, 25, 64), lambda i: (i, 0, 0)),
        scratch_shapes=[pltpu.VMEM((40, 64), jnp.bfloat16)],
        compiler_params=pltpu.CompilerParams(dimension_semantics=("parallel",)),
    )(col2, w2, b2, w3, b3, cmask)


def fc_fused_pallas(x, w1, b1, w2, b2):
    M, K = x.shape
    H = w1.shape[1]
    A = w2.shape[1]
    tm = min(M, 512)                       # 512-row cap per perf review
    return pl.pallas_call(
        _fc_fused_kernel,
        out_shape=jax.ShapeDtypeStruct((M, A), jnp.float32),
        grid=(pl.cdiv(M, tm),),
        in_specs=[
            pl.BlockSpec((tm, K), lambda i: (i, 0)),
            pl.BlockSpec((K, H), lambda i: (0, 0)),
            pl.BlockSpec((1, H), lambda i: (0, 0)),
            pl.BlockSpec((H, A), lambda i: (0, 0)),
            pl.BlockSpec((1, A), lambda i: (0, 0)),
        ],
        out_specs=pl.BlockSpec((tm, A), lambda i: (i, 0)),
        compiler_params=pltpu.CompilerParams(dimension_semantics=("parallel",)),
    )(x, w1, b1, w2, b2)


# --------------------------------------------------------------------------
# One-time parameter preprocessing (outside jit) and init
# --------------------------------------------------------------------------
def conv_w_flat(w_ochw):
    """PyTorch (O,C,kh,kw) conv weight -> (kh*kw*C, O) matching im2col order."""
    O, C, kh, kw = w_ochw.shape
    return jnp.transpose(w_ochw, (2, 3, 1, 0)).reshape(kh * kw * C, O)


def preprocess_params(p):
    pp = {}
    # conv1 weight re-ordered for the space-to-depth(4) + 2x2 im2col path:
    # Wflat[kbh*128 + kbw*64 + rh*16 + rw*4 + c, o] = w1[o, c, 4*kbh+rh, 4*kbw+rw]
    w1 = p["w1"].reshape(32, 4, 2, 4, 2, 4)               # [o, c, kbh, rh, kbw, rw]
    pp["w1"] = jnp.transpose(w1, (2, 4, 3, 5, 1, 0)).reshape(256, 32).astype(jnp.bfloat16)
    pp["b1"] = p["b1"].reshape(1, 32)
    pp["w2"] = conv_w_flat(p["w2"]).astype(jnp.bfloat16)  # (512, 64)
    pp["b2"] = p["b2"].reshape(1, 64)
    pp["w3"] = conv_w_flat(p["w3"]).astype(jnp.bfloat16)  # (576, 64)
    pp["b3"] = p["b3"].reshape(1, 64)
    # fc1 with the NCHW x.view(-1,1600) permutation folded into its rows so the
    # NHWC-flat (p*64 + c) activation feeds fc1 with a free reshape.
    pp["wf1"] = (jnp.transpose(p["wf1"].reshape(512, 64, 5, 5), (2, 3, 1, 0))
                 .reshape(1600, 512).astype(jnp.bfloat16))
    pp["bf1"] = p["bf1"].reshape(1, 512)
    pp["wf2"] = p["wf2"].T.astype(jnp.bfloat16)           # (512, ACTIONS)
    pp["bf2"] = p["bf2"].reshape(1, ACTIONS)
    return pp


def init_params(key):
    keys = jax.random.split(key, 5)

    def kaiming(k, shape, fan_in):
        return jax.random.normal(k, shape, jnp.float32) * jnp.sqrt(2.0 / fan_in)

    p = {}
    p["w1"] = kaiming(keys[0], (32, 4, 8, 8), 4 * 8 * 8)
    p["b1"] = jnp.zeros((32,), jnp.float32)
    p["w2"] = kaiming(keys[1], (64, 32, 4, 4), 32 * 4 * 4)
    p["b2"] = jnp.zeros((64,), jnp.float32)
    p["w3"] = kaiming(keys[2], (64, 64, 3, 3), 64 * 3 * 3)
    p["b3"] = jnp.zeros((64,), jnp.float32)
    p["wf1"] = kaiming(keys[3], (512, 1600), 1600)
    p["bf1"] = jnp.zeros((512,), jnp.float32)
    p["wf2"] = kaiming(keys[4], (ACTIONS, 512), 512)
    p["bf2"] = jnp.zeros((ACTIONS,), jnp.float32)
    return p


# --------------------------------------------------------------------------
# Forward pass (Pallas) and pure-JAX reference
# --------------------------------------------------------------------------
def dqn_forward(x_nchw, pp):
    x = x_nchw.astype(jnp.bfloat16)                       # cast once: all glue is bf16
    N = x.shape[0]

    # conv1 via space-to-depth(4): pad (3,1) spatially (only 84 padded rows/cols
    # are touched by the k=8,s=4,p=3 conv), fold NCHW->NHWC into the s2d
    # transpose, then a 2x2 (stride-1) im2col with K = 4*64 = 256.
    xp = jnp.pad(x, ((0, 0), (0, 0), (3, 1), (3, 1)))                 # (N,4,84,84)
    xs = (xp.reshape(N, 4, 21, 4, 21, 4)                              # n c bh rh bw rw
            .transpose(0, 2, 4, 3, 5, 1)                              # n bh bw rh rw c
            .reshape(N, 21, 21, 64))
    cols = [xs[:, i:i + 20, j:j + 20, :] for i in (0, 1) for j in (0, 1)]
    col1 = jnp.stack(cols, axis=3).reshape(N, 400, 256)               # bf16

    # Kernel A: conv1 GEMM + bias + relu + 2x2 maxpool (fused, per image)
    pooled = conv1_pool_pallas(col1, pp["w1"], pp["b1"])              # (N,10,10,32) bf16

    # conv2 im2col (k=4, s=2, p=1): tiny bf16 glue -> lane-dense 512-wide block
    # TODO(synk): could be emitted directly by kernel A (needs a two-axis
    # strided in-kernel gather); kept in XLA for robustness (~26 KB/image).
    ppad = jnp.pad(pooled, ((0, 0), (1, 1), (1, 1), (0, 0)))          # (N,12,12,32)
    cols2 = [ppad[:, i:i + 10:2, j:j + 10:2, :]
             for i in range(4) for j in range(4)]
    col2 = jnp.stack(cols2, axis=3).reshape(N, 25, 512)               # bf16

    # conv3 column-validity masks for the in-kernel shift gather (constant).
    wpos = jnp.arange(25, dtype=jnp.int32) % 5
    cmask = jnp.stack([(wpos >= 1).astype(jnp.float32),
                       (wpos <= 3).astype(jnp.float32)], axis=1)      # (25,2)

    # Kernel B: conv2 + conv3 fused (per image)
    c3 = conv2_conv3_pallas(col2, pp["w2"], pp["b2"], pp["w3"], pp["b3"],
                            cmask)                                    # (N,25,64) bf16

    # flatten (row = h*5+w, col = c; NCHW permutation folded into wf1) + fc1+fc2
    flat = c3.reshape(N, 1600)
    return fc_fused_pallas(flat, pp["wf1"], pp["bf1"], pp["wf2"], pp["bf2"])


def dqn_reference(x_nchw, p):
    dn = ("NCHW", "OIHW", "NCHW")
    prec = jax.lax.Precision.HIGHEST
    y = jax.lax.conv_general_dilated(x_nchw, p["w1"], (4, 4), ((3, 3), (3, 3)),
                                     dimension_numbers=dn, precision=prec)
    y = jnp.maximum(y + p["b1"][None, :, None, None], 0.0)
    N, C, H, W = y.shape
    y = y.reshape(N, C, H // 2, 2, W // 2, 2).max(axis=(3, 5))
    y = jax.lax.conv_general_dilated(y, p["w2"], (2, 2), ((1, 1), (1, 1)),
                                     dimension_numbers=dn, precision=prec)
    y = jnp.maximum(y + p["b2"][None, :, None, None], 0.0)
    y = jax.lax.conv_general_dilated(y, p["w3"], (1, 1), ((1, 1), (1, 1)),
                                     dimension_numbers=dn, precision=prec)
    y = jnp.maximum(y + p["b3"][None, :, None, None], 0.0)
    flat = y.reshape(y.shape[0], -1)
    h = jnp.maximum(jnp.dot(flat, p["wf1"].T, precision=prec) + p["bf1"], 0.0)
    return jnp.dot(h, p["wf2"].T, precision=prec) + p["bf2"]


# --------------------------------------------------------------------------
if __name__ == "__main__":
    key = jax.random.PRNGKey(0)
    pkey, xkey = jax.random.split(key)
    params = init_params(pkey)
    pp = preprocess_params(params)          # one-time weight preprocessing

    # batch=2, 4 stacked frames, 80x80 (forced by fc1's 1600 = 64*5*5 flatten)
    x = jax.random.normal(xkey, (2, 4, 80, 80), jnp.float32)

    fwd = jax.jit(dqn_forward)
    out = jax.block_until_ready(fwd(x, pp))
    assert out.shape == (2, ACTIONS), out.shape

    ref = dqn_reference(x, params)
    if not bool(jnp.allclose(out, ref, atol=5e-2, rtol=5e-2)):
        raise AssertionError(
            f"mismatch vs reference, max abs err = {jnp.max(jnp.abs(out - ref))}")

    print("KERNEL_OK")
</pallas_src>

<mosaic_0001>
module attributes {stable_mosaic.version = 11 : i64} {
  func.func @_conv1_pool_kernel(%arg0: i32, %arg1: memref<1x400x256xbf16, #tpu.memory_space<vmem>>, %arg2: memref<256x32xbf16, #tpu.memory_space<vmem>>, %arg3: memref<1x32xf32, #tpu.memory_space<vmem>>, %arg4: memref<1x10x10x32xbf16, #tpu.memory_space<vmem>>, %arg5: memref<400x32xf32, #tpu.memory_space<vmem>>, %arg6: memref<20x20x32xf32, #tpu.memory_space<vmem>>) attributes {dimension_semantics = [#tpu.dimension_semantics<parallel>], iteration_bounds = array<i64: 2>, scalar_prefetch = 0 : i64, scratch_operands = 2 : i64, tpu.core_type = #tpu.core_type<tc>, window_params = [{transform_indices = @transform_0, window_bounds = array<i64: 1, 400, 256>}, {pipeline_mode = #tpu.pipeline_mode<synchronous>, transform_indices = @transform_1, window_bounds = array<i64: 256, 32>}, {pipeline_mode = #tpu.pipeline_mode<synchronous>, transform_indices = @transform_2, window_bounds = array<i64: 1, 32>}, {transform_indices = @transform_3, window_bounds = array<i64: 1, 10, 10, 32>}]} {
    %c0 = arith.constant 0 : index
    %c0_0 = arith.constant 0 : index
    %c0_1 = arith.constant 0 : index
    %0 = vector.load %arg1[%c0, %c0_0, %c0_1] : memref<1x400x256xbf16, #tpu.memory_space<vmem>>, vector<1x400x256xbf16>
    %1 = vector.shape_cast %0 : vector<1x400x256xbf16> to vector<400x256xbf16>
    %c0_2 = arith.constant 0 : index
    %c0_3 = arith.constant 0 : index
    %2 = vector.load %arg2[%c0_2, %c0_3] : memref<256x32xbf16, #tpu.memory_space<vmem>>, vector<256x32xbf16>
    %cst = arith.constant dense<0.000000e+00> : vector<400x32xf32>
    %3 = tpu.matmul %1, %2, %cst {dimension_numbers = #tpu.dot_dimension_numbers<[1], [0], [0], [1], [0, 0, 1, 1], [], []>} : vector<400x256xbf16>, vector<256x32xbf16>, vector<400x32xf32> -> vector<400x32xf32>
    %c0_4 = arith.constant 0 : index
    %c0_5 = arith.constant 0 : index
    %4 = vector.load %arg3[%c0_4, %c0_5] : memref<1x32xf32, #tpu.memory_space<vmem>>, vector<1x32xf32>
    %5 = vector.broadcast %4 : vector<1x32xf32> to vector<400x32xf32>
    %6 = arith.addf %3, %5 : vector<400x32xf32>
    %cst_6 = arith.constant 0.000000e+00 : f32
    %7 = vector.broadcast %cst_6 : f32 to vector<400x32xf32>
    %8 = arith.maximumf %6, %7 : vector<400x32xf32>
    %c0_7 = arith.constant 0 : index
    %c0_8 = arith.constant 0 : index
    %9 = vector.load %arg5[%c0_7, %c0_8] : memref<400x32xf32, #tpu.memory_space<vmem>>, vector<400x32xf32>
    tpu.vector_store %arg5[%c0_7, %c0_8], %8 {strides = array<i32>} : memref<400x32xf32, #tpu.memory_space<vmem>>, vector<400x32xf32>,
    %c0_9 = arith.constant 0 : index
    %c0_10 = arith.constant 0 : index
    %10 = vector.load %arg5[%c0_9, %c0_10] : memref<400x32xf32, #tpu.memory_space<vmem>>, vector<20x32xf32>
    %c0_11 = arith.constant 0 : index
    %c0_12 = arith.constant 0 : index
    %c0_13 = arith.constant 0 : index
    %11 = vector.load %arg6[%c0_11, %c0_12, %c0_13] : memref<20x20x32xf32, #tpu.memory_space<vmem>>, vector<1x20x32xf32>
    %12 = vector.shape_cast %11 : vector<1x20x32xf32> to vector<20x32xf32>
    %13 = vector.shape_cast %10 : vector<20x32xf32> to vector<1x20x32xf32>
    tpu.vector_store %arg6[%c0_11, %c0_12, %c0_13], %13 {strides = array<i32>} : memref<20x20x32xf32, #tpu.memory_space<vmem>>, vector<1x20x32xf32>,
    %c20 = arith.constant 20 : index
    %c0_14 = arith.constant 0 : index
    %14 = vector.load %arg5[%c20, %c0_14] : memref<400x32xf32, #tpu.memory_space<vmem>>, vector<20x32xf32>
    %c1 = arith.constant 1 : index
    %c0_15 = arith.constant 0 : index
    %c0_16 = arith.constant 0 : index
    %15 = vector.load %arg6[%c1, %c0_15, %c0_16] : memref<20x20x32xf32, #tpu.memory_space<vmem>>, vector<1x20x32xf32>
    %16 = vector.shape_cast %15 : vector<1x20x32xf32> to vector<20x32xf32>
    %17 = vector.shape_cast %14 : vector<20x32xf32> to vector<1x20x32xf32>
    tpu.vector_store %arg6[%c1, %c0_15, %c0_16], %17 {strides = array<i32>} : memref<20x20x32xf32, #tpu.memory_space<vmem>>, vector<1x20x32xf32>,
    %c40 = arith.constant 40 : index
    %c0_17 = arith.constant 0 : index
    %18 = vector.load %arg5[%c40, %c0_17] : memref<400x32xf32, #tpu.memory_space<vmem>>, vector<20x32xf32>
    %c2 = arith.constant 2 : index
    %c0_18 = arith.constant 0 : index
    %c0_19 = arith.constant 0 : index
    %19 = vector.load %arg6[%c2, %c0_18, %c0_19] : memref<20x20x32xf32, #tpu.memory_space<vmem>>, vector<1x20x32xf32>
    %20 = vector.shape_cast %19 : vector<1x20x32xf32> to vector<20x32xf32>
    %21 = vector.shape_cast %18 : vector<20x32xf32> to vector<1x20x32xf32>
    tpu.vector_store %arg6[%c2, %c0_18, %c0_19], %21 {strides = array<i32>} : memref<20x20x32xf32, #tpu.memory_space<vmem>>, vector<1x20x32xf32>,
    %c60 = arith.constant 60 : index
    %c0_20 = arith.constant 0 : index
    %22 = vector.load %arg5[%c60, %c0_20] : memref<400x32xf32, #tpu.memory_space<vmem>>, vector<20x32xf32>
    %c3 = arith.constant 3 : index
    %c0_21 = arith.constant 0 : index
    %c0_22 = arith.constant 0 : index
    %23 = vector.load %arg6[%c3, %c0_21, %c0_22] : memref<20x20x32xf32, #tpu.memory_space<vmem>>, vector<1x20x32xf32>
    %24 = vector.shape_cast %23 : vector<1x20x32xf32> to vector<20x32xf32>
    %25 = vector.shape_cast %22 : vector<20x32xf32> to vector<1x20x32xf32>
    tpu.vector_store %arg6[%c3, %c0_21, %c0_22], %25 {strides = array<i32>} : memref<20x20x32xf32, #tpu.memory_space<vmem>>, vector<1x20x32xf32>,
    %c80 = arith.constant 80 : index
    %c0_23 = arith.constant 0 : index
    %26 = vector.load %arg5[%c80, %c0_23] : memref<400x32xf32, #tpu.memory_space<vmem>>, vector<20x32xf32>
    %c4 = arith.constant 4 : index
    %c0_24 = arith.constant 0 : index
    %c0_25 = arith.constant 0 : index
    %27 = vector.load %arg6[%c4, %c0_24, %c0_25] : memref<20x20x32xf32, #tpu.memory_space<vmem>>, vector<1x20x32xf32>
    %28 = vector.shape_cast %27 : vector<1x20x32xf32> to vector<20x32xf32>
    %29 = vector.shape_cast %26 : vector<20x32xf32> to vector<1x20x32xf32>
    tpu.vector_store %arg6[%c4, %c0_24, %c0_25], %29 {strides = array<i32>} : memref<20x20x32xf32, #tpu.memory_space<vmem>>, vector<1x20x32xf32>,
    %c100 = arith.constant 100 : index
    %c0_26 = arith.constant 0 : index
    %30 = vector.load %arg5[%c100, %c0_26] : memref<400x32xf32, #tpu.memory_space<vmem>>, vector<20x32xf32>
    %c5 = arith.constant 5 : index
    %c0_27 = arith.constant 0 : index
    %c0_28 = arith.constant 0 : index
    %31 = vector.load %arg6[%c5, %c0_27, %c0_28] : memref<20x20x32xf32, #tpu.memory_space<vmem>>, vector<1x20x32xf32>
    %32 = vector.shape_cast %31 : vector<1x20x32xf32> to vector<20x32xf32>
    %33 = vector.shape_cast %30 : vector<20x32xf32> to vector<1x20x32xf32>
    tpu.vector_store %arg6[%c5, %c0_27, %c0_28], %33 {strides = array<i32>} : memref<20x20x32xf32, #tpu.memory_space<vmem>>, vector<1x20x32xf32>,
    %c120 = arith.constant 120 : index
    %c0_29 = arith.constant 0 : index
    %34 = vector.load %arg5[%c120, %c0_29] : memref<400x32xf32, #tpu.memory_space<vmem>>, vector<20x32xf32>
    %c6 = arith.constant 6 : index
    %c0_30 = arith.constant 0 : index
    %c0_31 = arith.constant 0 : index
    %35 = vector.load %arg6[%c6, %c0_30, %c0_31] : memref<20x20x32xf32, #tpu.memory_space<vmem>>, vector<1x20x32xf32>
    %36 = vector.shape_cast %35 : vector<1x20x32xf32> to vector<20x32xf32>
    %37 = vector.shape_cast %34 : vector<20x32xf32> to vector<1x20x32xf32>
    tpu.vector_store %arg6[%c6, %c0_30, %c0_31], %37 {strides = array<i32>} : memref<20x20x32xf32, #tpu.memory_space<vmem>>, vector<1x20x32xf32>,
    %c140 = arith.constant 140 : index
    %c0_32 = arith.constant 0 : index
    %38 = vector.load %arg5[%c140, %c0_32] : memref<400x32xf32, #tpu.memory_space<vmem>>, vector<20x32xf32>
    %c7 = arith.constant 7 : index
    %c0_33 = arith.constant 0 : index
    %c0_34 = arith.constant 0 : index
    %39 = vector.load %arg6[%c7, %c0_33, %c0_34] : memref<20x20x32xf32, #tpu.memory_space<vmem>>, vector<1x20x32xf32>
    %40 = vector.shape_cast %39 : vector<1x20x32xf32> to vector<20x32xf32>
    %41 = vector.shape_cast %38 : vector<20x32xf32> to vector<1x20x32xf32>
    tpu.vector_store %arg6[%c7, %c0_33, %c0_34], %41 {strides = array<i32>} : memref<20x20x32xf32, #tpu.memory_space<vmem>>, vector<1x20x32xf32>,
    %c160 = arith.constant 160 : index
    %c0_35 = arith.constant 0 : index
    %42 = vector.load %arg5[%c160, %c0_35] : memref<400x32xf32, #tpu.memory_space<vmem>>, vector<20x32xf32>
    %c8 = arith.constant 8 : index
    %c0_36 = arith.constant 0 : index
    %c0_37 = arith.constant 0 : index
    %43 = vector.load %arg6[%c8, %c0_36, %c0_37] : memref<20x20x32xf32, #tpu.memory_space<vmem>>, vector<1x20x32xf32>
    %44 = vector.shape_cast %43 : vector<1x20x32xf32> to vector<20x32xf32>
    %45 = vector.shape_cast %42 : vector<20x32xf32> to vector<1x20x32xf32>
    tpu.vector_store %arg6[%c8, %c0_36, %c0_37], %45 {strides = array<i32>} : memref<20x20x32xf32, #tpu.memory_space<vmem>>, vector<1x20x32xf32>,
    %c180 = arith.constant 180 : index
    %c0_38 = arith.constant 0 : index
    %46 = vector.load %arg5[%c180, %c0_38] : memref<400x32xf32, #tpu.memory_space<vmem>>, vector<20x32xf32>
    %c9 = arith.constant 9 : index
    %c0_39 = arith.constant 0 : index
    %c0_40 = arith.constant 0 : index
    %47 = vector.load %arg6[%c9, %c0_39, %c0_40] : memref<20x20x32xf32, #tpu.memory_space<vmem>>, vector<1x20x32xf32>
    %48 = vector.shape_cast %47 : vector<1x20x32xf32> to vector<20x32xf32>
    %49 = vector.shape_cast %46 : vector<20x32xf32> to vector<1x20x32xf32>
    tpu.vector_store %arg6[%c9, %c0_39, %c0_40], %49 {strides = array<i32>} : memref<20x20x32xf32, #tpu.memory_space<vmem>>, vector<1x20x32xf32>,
    %c200 = arith.constant 200 : index
    %c0_41 = arith.constant 0 : index
    %50 = vector.load %arg5[%c200, %c0_41] : memref<400x32xf32, #tpu.memory_space<vmem>>, vector<20x32xf32>
    %c10 = arith.constant 10 : index
    %c0_42 = arith.constant 0 : index
    %c0_43 = arith.constant 0 : index
    %51 = vector.load %arg6[%c10, %c0_42, %c0_43] : memref<20x20x32xf32, #tpu.memory_space<vmem>>, vector<1x20x32xf32>
    %52 = vector.shape_cast %51 : vector<1x20x32xf32> to vector<20x32xf32>
    %53 = vector.shape_cast %50 : vector<20x32xf32> to vector<1x20x32xf32>
    tpu.vector_store %arg6[%c10, %c0_42, %c0_43], %53 {strides = array<i32>} : memref<20x20x32xf32, #tpu.memory_space<vmem>>, vector<1x20x32xf32>,
    %c220 = arith.constant 220 : index
    %c0_44 = arith.constant 0 : index
    %54 = vector.load %arg5[%c220, %c0_44] : memref<400x32xf32, #tpu.memory_space<vmem>>, vector<20x32xf32>
    %c11 = arith.constant 11 : index
    %c0_45 = arith.constant 0 : index
    %c0_46 = arith.constant 0 : index
    %55 = vector.load %arg6[%c11, %c0_45, %c0_46] : memref<20x20x32xf32, #tpu.memory_space<vmem>>, vector<1x20x32xf32>
    %56 = vector.shape_cast %55 : vector<1x20x32xf32> to vector<20x32xf32>
    %57 = vector.shape_cast %54 : vector<20x32xf32> to vector<1x20x32xf32>
    tpu.vector_store %arg6[%c11, %c0_45, %c0_46], %57 {strides = array<i32>} : memref<20x20x32xf32, #tpu.memory_space<vmem>>, vector<1x20x32xf32>,
    %c240 = arith.constant 240 : index
    %c0_47 = arith.constant 0 : index
    %58 = vector.load %arg5[%c240, %c0_47] : memref<400x32xf32, #tpu.memory_space<vmem>>, vector<20x32xf32>
    %c12 = arith.constant 12 : index
    %c0_48 = arith.constant 0 : index
    %c0_49 = arith.constant 0 : index
    %59 = vector.load %arg6[%c12, %c0_48, %c0_49] : memref<20x20x32xf32, #tpu.memory_space<vmem>>, vector<1x20x32xf32>
    %60 = vector.shape_cast %59 : vector<1x20x32xf32> to vector<20x32xf32>
    %61 = vector.shape_cast %58 : vector<20x32xf32> to vector<1x20x32xf32>
    tpu.vector_store %arg6[%c12, %c0_48, %c0_49], %61 {strides = array<i32>} : memref<20x20x32xf32, #tpu.memory_space<vmem>>, vector<1x20x32xf32>,
    %c260 = arith.constant 260 : index
    %c0_50 = arith.constant 0 : index
    %62 = vector.load %arg5[%c260, %c0_50] : memref<400x32xf32, #tpu.memory_space<vmem>>, vector<20x32xf32>
    %c13 = arith.constant 13 : index
    %c0_51 = arith.constant 0 : index
    %c0_52 = arith.constant 0 : index
    %63 = vector.load %arg6[%c13, %c0_51, %c0_52] : memref<20x20x32xf32, #tpu.memory_space<vmem>>, vector<1x20x32xf32>
    %64 = vector.shape_cast %63 : vector<1x20x32xf32> to vector<20x32xf32>
    %65 = vector.shape_cast %62 : vector<20x32xf32> to vector<1x20x32xf32>
    tpu.vector_store %arg6[%c13, %c0_51, %c0_52], %65 {strides = array<i32>} : memref<20x20x32xf32, #tpu.memory_space<vmem>>, vector<1x20x32xf32>,
    %c280 = arith.constant 280 : index
    %c0_53 = arith.constant 0 : index
    %66 = vector.load %arg5[%c280, %c0_53] : memref<400x32xf32, #tpu.memory_space<vmem>>, vector<20x32xf32>
    %c14 = arith.constant 14 : index
    %c0_54 = arith.constant 0 : index
    %c0_55 = arith.constant 0 : index
    %67 = vector.load %arg6[%c14, %c0_54, %c0_55] : memref<20x20x32xf32, #tpu.memory_space<vmem>>, vector<1x20x32xf32>
    %68 = vector.shape_cast %67 : vector<1x20x32xf32> to vector<20x32xf32>
    %69 = vector.shape_cast %66 : vector<20x32xf32> to vector<1x20x32xf32>
    tpu.vector_store %arg6[%c14, %c0_54, %c0_55], %69 {strides = array<i32>} : memref<20x20x32xf32, #tpu.memory_space<vmem>>, vector<1x20x32xf32>,
    %c300 = arith.constant 300 : index
    %c0_56 = arith.constant 0 : index
    %70 = vector.load %arg5[%c300, %c0_56] : memref<400x32xf32, #tpu.memory_space<vmem>>, vector<20x32xf32>
    %c15 = arith.constant 15 : index
    %c0_57 = arith.constant 0 : index
    %c0_58 = arith.constant 0 : index
    %71 = vector.load %arg6[%c15, %c0_57, %c0_58] : memref<20x20x32xf32, #tpu.memory_space<vmem>>, vector<1x20x32xf32>
    %72 = vector.shape_cast %71 : vector<1x20x32xf32> to vector<20x32xf32>
    %73 = vector.shape_cast %70 : vector<20x32xf32> to vector<1x20x32xf32>
    tpu.vector_store %arg6[%c15, %c0_57, %c0_58], %73 {strides = array<i32>} : memref<20x20x32xf32, #tpu.memory_space<vmem>>, vector<1x20x32xf32>,
    %c320 = arith.constant 320 : index
    %c0_59 = arith.constant 0 : index
    %74 = vector.load %arg5[%c320, %c0_59] : memref<400x32xf32, #tpu.memory_space<vmem>>, vector<20x32xf32>
    %c16 = arith.constant 16 : index
    %c0_60 = arith.constant 0 : index
    %c0_61 = arith.constant 0 : index
    %75 = vector.load %arg6[%c16, %c0_60, %c0_61] : memref<20x20x32xf32, #tpu.memory_space<vmem>>, vector<1x20x32xf32>
    %76 = vector.shape_cast %75 : vector<1x20x32xf32> to vector<20x32xf32>
    %77 = vector.shape_cast %74 : vector<20x32xf32> to vector<1x20x32xf32>
    tpu.vector_store %arg6[%c16, %c0_60, %c0_61], %77 {strides = array<i32>} : memref<20x20x32xf32, #tpu.memory_space<vmem>>, vector<1x20x32xf32>,
    %c340 = arith.constant 340 : index
    %c0_62 = arith.constant 0 : index
    %78 = vector.load %arg5[%c340, %c0_62] : memref<400x32xf32, #tpu.memory_space<vmem>>, vector<20x32xf32>
    %c17 = arith.constant 17 : index
    %c0_63 = arith.constant 0 : index
    %c0_64 = arith.constant 0 : index
    %79 = vector.load %arg6[%c17, %c0_63, %c0_64] : memref<20x20x32xf32, #tpu.memory_space<vmem>>, vector<1x20x32xf32>
    %80 = vector.shape_cast %79 : vector<1x20x32xf32> to vector<20x32xf32>
    %81 = vector.shape_cast %78 : vector<20x32xf32> to vector<1x20x32xf32>
    tpu.vector_store %arg6[%c17, %c0_63, %c0_64], %81 {strides = array<i32>} : memref<20x20x32xf32, #tpu.memory_space<vmem>>, vector<1x20x32xf32>,
    %c360 = arith.constant 360 : index
    %c0_65 = arith.constant 0 : index
    %82 = vector.load %arg5[%c360, %c0_65] : memref<400x32xf32, #tpu.memory_space<vmem>>, vector<20x32xf32>
    %c18 = arith.constant 18 : index
    %c0_66 = arith.constant 0 : index
    %c0_67 = arith.constant 0 : index
    %83 = vector.load %arg6[%c18, %c0_66, %c0_67] : memref<20x20x32xf32, #tpu.memory_space<vmem>>, vector<1x20x32xf32>
    %84 = vector.shape_cast %83 : vector<1x20x32xf32> to vector<20x32xf32>
    %85 = vector.shape_cast %82 : vector<20x32xf32> to vector<1x20x32xf32>
    tpu.vector_store %arg6[%c18, %c0_66, %c0_67], %85 {strides = array<i32>} : memref<20x20x32xf32, #tpu.memory_space<vmem>>, vector<1x20x32xf32>,
    %c380 = arith.constant 380 : index
    %c0_68 = arith.constant 0 : index
    %86 = vector.load %arg5[%c380, %c0_68] : memref<400x32xf32, #tpu.memory_space<vmem>>, vector<20x32xf32>
    %c19 = arith.constant 19 : index
    %c0_69 = arith.constant 0 : index
    %c0_70 = arith.constant 0 : index
    %87 = vector.load %arg6[%c19, %c0_69, %c0_70] : memref<20x20x32xf32, #tpu.memory_space<vmem>>, vector<1x20x32xf32>
    %88 = vector.shape_cast %87 : vector<1x20x32xf32> to vector<20x32xf32>
    %89 = vector.shape_cast %86 : vector<20x32xf32> to vector<1x20x32xf32>
    tpu.vector_store %arg6[%c19, %c0_69, %c0_70], %89 {strides = array<i32>} : memref<20x20x32xf32, #tpu.memory_space<vmem>>, vector<1x20x32xf32>,
    %c0_71 = arith.constant 0 : index
    %c0_72 = arith.constant 0 : index
    %c0_73 = arith.constant 0 : index
    %90 = tpu.strided_load %arg6[%c0_71, %c0_72, %c0_73] {strides = array<i32: 1, 2, 1>} : memref<20x20x32xf32, #tpu.memory_space<vmem>>, vector<20x10x32xf32>
    %c0_74 = arith.constant 0 : index
    %c1_75 = arith.constant 1 : index
    %c0_76 = arith.constant 0 : index
    %91 = tpu.strided_load %arg6[%c0_74, %c1_75, %c0_76] {strides = array<i32: 1, 2, 1>} : memref<20x20x32xf32, #tpu.memory_space<vmem>>, vector<20x10x32xf32>
    %92 = arith.maximumf %90, %91 : vector<20x10x32xf32>
    %93 = vector.shape_cast %92 : vector<20x10x32xf32> to vector<10x2x10x32xf32>
    %cst_77 = arith.constant dense<0xFF800000> : vector<10x10x32xf32>
    %94 = vector.multi_reduction <maximumf>, %93, %cst_77 [1] : vector<10x2x10x32xf32> to vector<10x10x32xf32>
    %95 = arith.truncf %94 : vector<10x10x32xf32> to vector<10x10x32xbf16>
    %c0_78 = arith.constant 0 : index
    %c0_79 = arith.constant 0 : index
    %c0_80 = arith.constant 0 : index
    %c0_81 = arith.constant 0 : index
    %96 = vector.load %arg4[%c0_78, %c0_79, %c0_80, %c0_81] : memref<1x10x10x32xbf16, #tpu.memory_space<vmem>>, vector<1x10x10x32xbf16>
    %97 = vector.shape_cast %96 : vector<1x10x10x32xbf16> to vector<10x10x32xbf16>
    %98 = vector.shape_cast %95 : vector<10x10x32xbf16> to vector<1x10x10x32xbf16>
    tpu.vector_store %arg4[%c0_78, %c0_79, %c0_80, %c0_81], %98 {strides = array<i32>} : memref<1x10x10x32xbf16, #tpu.memory_space<vmem>>, vector<1x10x10x32xbf16>,
    return
  }
  func.func @transform_0(%arg0: i32) -> (i32, i32, i32) {
    %c0_i32 = arith.constant 0 : i32
    %c0_i32_0 = arith.constant 0 : i32
    %c0_i32_1 = arith.constant 0 : i32
    return %arg0, %c0_i32, %c0_i32_0 : i32, i32, i32
  }
  func.func @transform_1(%arg0: i32) -> (i32, i32) {
    %c0_i32 = arith.constant 0 : i32
    %c0_i32_0 = arith.constant 0 : i32
    %c0_i32_1 = arith.constant 0 : i32
    return %c0_i32, %c0_i32_0 : i32, i32
  }
  func.func @transform_2(%arg0: i32) -> (i32, i32) {
    %c0_i32 = arith.constant 0 : i32
    %c0_i32_0 = arith.constant 0 : i32
    %c0_i32_1 = arith.constant 0 : i32
    return %c0_i32, %c0_i32_0 : i32, i32
  }
  func.func @transform_3(%arg0: i32) -> (i32, i32, i32, i32) {
    %c0_i32 = arith.constant 0 : i32
    %c0_i32_0 = arith.constant 0 : i32
    %c0_i32_1 = arith.constant 0 : i32
    %c0_i32_2 = arith.constant 0 : i32
    return %arg0, %c0_i32, %c0_i32_0, %c0_i32_1 : i32, i32, i32, i32
  }
}

module attributes {stable_mosaic.version = 11 : i64} {
  func.func @_conv2_conv3_kernel(%arg0: i32, %arg1: memref<1x25x512xbf16, #tpu.memory_space<vmem>>, %arg2: memref<512x64xbf16, #tpu.memory_space<vmem>>, %arg3: memref<1x64xf32, #tpu.memory_space<vmem>>, %arg4: memref<576x64xbf16, #tpu.memory_space<vmem>>, %arg5: memref<1x64xf32, #tpu.memory_space<vmem>>, %arg6: memref<25x2xf32, #tpu.memory_space<vmem>>, %arg7: memref<1x25x64xbf16, #tpu.memory_space<vmem>>, %arg8: memref<40x64xbf16, #tpu.memory_space<vmem>>) attributes {dimension_semantics = [#tpu.dimension_semantics<parallel>], iteration_bounds = array<i64: 2>, scalar_prefetch = 0 : i64, scratch_operands = 1 : i64, tpu.core_type = #tpu.core_type<tc>, window_params = [{transform_indices = @transform_0, window_bounds = array<i64: 1, 25, 512>}, {pipeline_mode = #tpu.pipeline_mode<synchronous>, transform_indices = @transform_1, window_bounds = array<i64: 512, 64>}, {pipeline_mode = #tpu.pipeline_mode<synchronous>, transform_indices = @transform_2, window_bounds = array<i64: 1, 64>}, {pipeline_mode = #tpu.pipeline_mode<synchronous>, transform_indices = @transform_3, window_bounds = array<i64: 576, 64>}, {pipeline_mode = #tpu.pipeline_mode<synchronous>, transform_indices = @transform_4, window_bounds = array<i64: 1, 64>}, {pipeline_mode = #tpu.pipeline_mode<synchronous>, transform_indices = @transform_5, window_bounds = array<i64: 25, 2>}, {transform_indices = @transform_6, window_bounds = array<i64: 1, 25, 64>}]} {
    %c0 = arith.constant 0 : index
    %c0_0 = arith.constant 0 : index
    %c0_1 = arith.constant 0 : index
    %0 = vector.load %arg1[%c0, %c0_0, %c0_1] : memref<1x25x512xbf16, #tpu.memory_space<vmem>>, vector<1x25x512xbf16>
    %1 = vector.shape_cast %0 : vector<1x25x512xbf16> to vector<25x512xbf16>
    %c0_2 = arith.constant 0 : index
    %c0_3 = arith.constant 0 : index
    %2 = vector.load %arg2[%c0_2, %c0_3] : memref<512x64xbf16, #tpu.memory_space<vmem>>, vector<512x64xbf16>
    %cst = arith.constant dense<0.000000e+00> : vector<25x64xf32>
    %3 = tpu.matmul %1, %2, %cst {dimension_numbers = #tpu.dot_dimension_numbers<[1], [0], [0], [1], [0, 0, 1, 1], [], []>} : vector<25x512xbf16>, vector<512x64xbf16>, vector<25x64xf32> -> vector<25x64xf32>
    %c0_4 = arith.constant 0 : index
    %c0_5 = arith.constant 0 : index
    %4 = vector.load %arg3[%c0_4, %c0_5] : memref<1x64xf32, #tpu.memory_space<vmem>>, vector<1x64xf32>
    %5 = vector.broadcast %4 : vector<1x64xf32> to vector<25x64xf32>
    %6 = arith.addf %3, %5 : vector<25x64xf32>
    %cst_6 = arith.constant 0.000000e+00 : f32
    %7 = vector.broadcast %cst_6 : f32 to vector<25x64xf32>
    %8 = arith.maximumf %6, %7 : vector<25x64xf32>
    %cst_7 = arith.constant 0.000000e+00 : bf16
    %9 = vector.broadcast %cst_7 : bf16 to vector<40x64xbf16>
    %c0_8 = arith.constant 0 : index
    %c0_9 = arith.constant 0 : index
    %10 = vector.load %arg8[%c0_8, %c0_9] : memref<40x64xbf16, #tpu.memory_space<vmem>>, vector<40x64xbf16>
    tpu.vector_store %arg8[%c0_8, %c0_9], %9 {strides = array<i32>} : memref<40x64xbf16, #tpu.memory_space<vmem>>, vector<40x64xbf16>,
    %11 = arith.truncf %8 : vector<25x64xf32> to vector<25x64xbf16>
    %c6 = arith.constant 6 : index
    %c0_10 = arith.constant 0 : index
    %12 = vector.load %arg8[%c6, %c0_10] : memref<40x64xbf16, #tpu.memory_space<vmem>>, vector<25x64xbf16>
    tpu.vector_store %arg8[%c6, %c0_10], %11 {strides = array<i32>} : memref<40x64xbf16, #tpu.memory_space<vmem>>, vector<25x64xbf16>,
    %cst_11 = arith.constant 0.000000e+00 : f32
    %13 = vector.broadcast %cst_11 : f32 to vector<25x64xf32>
    %c0_12 = arith.constant 0 : index
    %c0_13 = arith.constant 0 : index
    %14 = vector.load %arg8[%c0_12, %c0_13] : memref<40x64xbf16, #tpu.memory_space<vmem>>, vector<25x64xbf16>
    %c0_14 = arith.constant 0 : index
    %c0_15 = arith.constant 0 : index
    %15 = vector.load %arg4[%c0_14, %c0_15] : memref<576x64xbf16, #tpu.memory_space<vmem>>, vector<64x64xbf16>
    %cst_16 = arith.constant dense<0.000000e+00> : vector<25x64xf32>
    %16 = tpu.matmul %14, %15, %cst_16 {dimension_numbers = #tpu.dot_dimension_numbers<[1], [0], [0], [1], [0, 0, 1, 1], [], []>} : vector<25x64xbf16>, vector<64x64xbf16>, vector<25x64xf32> -> vector<25x64xf32>
    %c0_17 = arith.constant 0 : index
    %c0_18 = arith.constant 0 : index
    %17 = vector.load %arg6[%c0_17, %c0_18] : memref<25x2xf32, #tpu.memory_space<vmem>>, vector<25x1xf32>
    %18 = vector.broadcast %17 : vector<25x1xf32> to vector<25x64xf32>
    %19 = arith.mulf %16, %18 : vector<25x64xf32>
    %20 = arith.addf %13, %19 : vector<25x64xf32>
    %c1 = arith.constant 1 : index
    %c0_19 = arith.constant 0 : index
    %21 = vector.load %arg8[%c1, %c0_19] : memref<40x64xbf16, #tpu.memory_space<vmem>>, vector<25x64xbf16>
    %c64 = arith.constant 64 : index
    %c0_20 = arith.constant 0 : index
    %22 = vector.load %arg4[%c64, %c0_20] : memref<576x64xbf16, #tpu.memory_space<vmem>>, vector<64x64xbf16>
    %cst_21 = arith.constant dense<0.000000e+00> : vector<25x64xf32>
    %23 = tpu.matmul %21, %22, %cst_21 {dimension_numbers = #tpu.dot_dimension_numbers<[1], [0], [0], [1], [0, 0, 1, 1], [], []>} : vector<25x64xbf16>, vector<64x64xbf16>, vector<25x64xf32> -> vector<25x64xf32>
    %24 = arith.addf %20, %23 : vector<25x64xf32>
    %c2 = arith.constant 2 : index
    %c0_22 = arith.constant 0 : index
    %25 = vector.load %arg8[%c2, %c0_22] : memref<40x64xbf16, #tpu.memory_space<vmem>>, vector<25x64xbf16>
    %c128 = arith.constant 128 : index
    %c0_23 = arith.constant 0 : index
    %26 = vector.load %arg4[%c128, %c0_23] : memref<576x64xbf16, #tpu.memory_space<vmem>>, vector<64x64xbf16>
    %cst_24 = arith.constant dense<0.000000e+00> : vector<25x64xf32>
    %27 = tpu.matmul %25, %26, %cst_24 {dimension_numbers = #tpu.dot_dimension_numbers<[1], [0], [0], [1], [0, 0, 1, 1], [], []>} : vector<25x64xbf16>, vector<64x64xbf16>, vector<25x64xf32> -> vector<25x64xf32>
    %c0_25 = arith.constant 0 : index
    %c1_26 = arith.constant 1 : index
    %28 = vector.load %arg6[%c0_25, %c1_26] : memref<25x2xf32, #tpu.memory_space<vmem>>, vector<25x1xf32>
    %29 = vector.broadcast %28 : vector<25x1xf32> to vector<25x64xf32>
    %30 = arith.mulf %27, %29 : vector<25x64xf32>
    %31 = arith.addf %24, %30 : vector<25x64xf32>
    %c5 = arith.constant 5 : index
    %c0_27 = arith.constant 0 : index
    %32 = vector.load %arg8[%c5, %c0_27] : memref<40x64xbf16, #tpu.memory_space<vmem>>, vector<25x64xbf16>
    %c192 = arith.constant 192 : index
    %c0_28 = arith.constant 0 : index
    %33 = vector.load %arg4[%c192, %c0_28] : memref<576x64xbf16, #tpu.memory_space<vmem>>, vector<64x64xbf16>
    %cst_29 = arith.constant dense<0.000000e+00> : vector<25x64xf32>
    %34 = tpu.matmul %32, %33, %cst_29 {dimension_numbers = #tpu.dot_dimension_numbers<[1], [0], [0], [1], [0, 0, 1, 1], [], []>} : vector<25x64xbf16>, vector<64x64xbf16>, vector<25x64xf32> -> vector<25x64xf32>
    %c0_30 = arith.constant 0 : index
    %c0_31 = arith.constant 0 : index
    %35 = vector.load %arg6[%c0_30, %c0_31] : memref<25x2xf32, #tpu.memory_space<vmem>>, vector<25x1xf32>
    %36 = vector.broadcast %35 : vector<25x1xf32> to vector<25x64xf32>
    %37 = arith.mulf %34, %36 : vector<25x64xf32>
    %38 = arith.addf %31, %37 : vector<25x64xf32>
    %c6_32 = arith.constant 6 : index
    %c0_33 = arith.constant 0 : index
    %39 = vector.load %arg8[%c6_32, %c0_33] : memref<40x64xbf16, #tpu.memory_space<vmem>>, vector<25x64xbf16>
    %c256 = arith.constant 256 : index
    %c0_34 = arith.constant 0 : index
    %40 = vector.load %arg4[%c256, %c0_34] : memref<576x64xbf16, #tpu.memory_space<vmem>>, vector<64x64xbf16>
    %cst_35 = arith.constant dense<0.000000e+00> : vector<25x64xf32>
    %41 = tpu.matmul %39, %40, %cst_35 {dimension_numbers = #tpu.dot_dimension_numbers<[1], [0], [0], [1], [0, 0, 1, 1], [], []>} : vector<25x64xbf16>, vector<64x64xbf16>, vector<25x64xf32> -> vector<25x64xf32>
    %42 = arith.addf %38, %41 : vector<25x64xf32>
    %c7 = arith.constant 7 : index
    %c0_36 = arith.constant 0 : index
    %43 = vector.load %arg8[%c7, %c0_36] : memref<40x64xbf16, #tpu.memory_space<vmem>>, vector<25x64xbf16>
    %c320 = arith.constant 320 : index
    %c0_37 = arith.constant 0 : index
    %44 = vector.load %arg4[%c320, %c0_37] : memref<576x64xbf16, #tpu.memory_space<vmem>>, vector<64x64xbf16>
    %cst_38 = arith.constant dense<0.000000e+00> : vector<25x64xf32>
    %45 = tpu.matmul %43, %44, %cst_38 {dimension_numbers = #tpu.dot_dimension_numbers<[1], [0], [0], [1], [0, 0, 1, 1], [], []>} : vector<25x64xbf16>, vector<64x64xbf16>, vector<25x64xf32> -> vector<25x64xf32>
    %c0_39 = arith.constant 0 : index
    %c1_40 = arith.constant 1 : index
    %46 = vector.load %arg6[%c0_39, %c1_40] : memref<25x2xf32, #tpu.memory_space<vmem>>, vector<25x1xf32>
    %47 = vector.broadcast %46 : vector<25x1xf32> to vector<25x64xf32>
    %48 = arith.mulf %45, %47 : vector<25x64xf32>
    %49 = arith.addf %42, %48 : vector<25x64xf32>
    %c10 = arith.constant 10 : index
    %c0_41 = arith.constant 0 : index
    %50 = vector.load %arg8[%c10, %c0_41] : memref<40x64xbf16, #tpu.memory_space<vmem>>, vector<25x64xbf16>
    %c384 = arith.constant 384 : index
    %c0_42 = arith.constant 0 : index
    %51 = vector.load %arg4[%c384, %c0_42] : memref<576x64xbf16, #tpu.memory_space<vmem>>, vector<64x64xbf16>
    %cst_43 = arith.constant dense<0.000000e+00> : vector<25x64xf32>
    %52 = tpu.matmul %50, %51, %cst_43 {dimension_numbers = #tpu.dot_dimension_numbers<[1], [0], [0], [1], [0, 0, 1, 1], [], []>} : vector<25x64xbf16>, vector<64x64xbf16>, vector<25x64xf32> -> vector<25x64xf32>
    %c0_44 = arith.constant 0 : index
    %c0_45 = arith.constant 0 : index
    %53 = vector.load %arg6[%c0_44, %c0_45] : memref<25x2xf32, #tpu.memory_space<vmem>>, vector<25x1xf32>
    %54 = vector.broadcast %53 : vector<25x1xf32> to vector<25x64xf32>
    %55 = arith.mulf %52, %54 : vector<25x64xf32>
    %56 = arith.addf %49, %55 : vector<25x64xf32>
    %c11 = arith.constant 11 : index
    %c0_46 = arith.constant 0 : index
    %57 = vector.load %arg8[%c11, %c0_46] : memref<40x64xbf16, #tpu.memory_space<vmem>>, vector<25x64xbf16>
    %c448 = arith.constant 448 : index
    %c0_47 = arith.constant 0 : index
    %58 = vector.load %arg4[%c448, %c0_47] : memref<576x64xbf16, #tpu.memory_space<vmem>>, vector<64x64xbf16>
    %cst_48 = arith.constant dense<0.000000e+00> : vector<25x64xf32>
    %59 = tpu.matmul %57, %58, %cst_48 {dimension_numbers = #tpu.dot_dimension_numbers<[1], [0], [0], [1], [0, 0, 1, 1], [], []>} : vector<25x64xbf16>, vector<64x64xbf16>, vector<25x64xf32> -> vector<25x64xf32>
    %60 = arith.addf %56, %59 : vector<25x64xf32>
    %c12 = arith.constant 12 : index
    %c0_49 = arith.constant 0 : index
    %61 = vector.load %arg8[%c12, %c0_49] : memref<40x64xbf16, #tpu.memory_space<vmem>>, vector<25x64xbf16>
    %c512 = arith.constant 512 : index
    %c0_50 = arith.constant 0 : index
    %62 = vector.load %arg4[%c512, %c0_50] : memref<576x64xbf16, #tpu.memory_space<vmem>>, vector<64x64xbf16>
    %cst_51 = arith.constant dense<0.000000e+00> : vector<25x64xf32>
    %63 = tpu.matmul %61, %62, %cst_51 {dimension_numbers = #tpu.dot_dimension_numbers<[1], [0], [0], [1], [0, 0, 1, 1], [], []>} : vector<25x64xbf16>, vector<64x64xbf16>, vector<25x64xf32> -> vector<25x64xf32>
    %c0_52 = arith.constant 0 : index
    %c1_53 = arith.constant 1 : index
    %64 = vector.load %arg6[%c0_52, %c1_53] : memref<25x2xf32, #tpu.memory_space<vmem>>, vector<25x1xf32>
    %65 = vector.broadcast %64 : vector<25x1xf32> to vector<25x64xf32>
    %66 = arith.mulf %63, %65 : vector<25x64xf32>
    %67 = arith.addf %60, %66 : vector<25x64xf32>
    %c0_54 = arith.constant 0 : index
    %c0_55 = arith.constant 0 : index
    %68 = vector.load %arg5[%c0_54, %c0_55] : memref<1x64xf32, #tpu.memory_space<vmem>>, vector<1x64xf32>
    %69 = vector.broadcast %68 : vector<1x64xf32> to vector<25x64xf32>
    %70 = arith.addf %67, %69 : vector<25x64xf32>
    %cst_56 = arith.constant 0.000000e+00 : f32
    %71 = vector.broadcast %cst_56 : f32 to vector<25x64xf32>
    %72 = arith.maximumf %70, %71 : vector<25x64xf32>
    %73 = arith.truncf %72 : vector<25x64xf32> to vector<25x64xbf16>
    %c0_57 = arith.constant 0 : index
    %c0_58 = arith.constant 0 : index
    %c0_59 = arith.constant 0 : index
    %74 = vector.load %arg7[%c0_57, %c0_58, %c0_59] : memref<1x25x64xbf16, #tpu.memory_space<vmem>>, vector<1x25x64xbf16>
    %75 = vector.shape_cast %74 : vector<1x25x64xbf16> to vector<25x64xbf16>
    %76 = vector.shape_cast %73 : vector<25x64xbf16> to vector<1x25x64xbf16>
    tpu.vector_store %arg7[%c0_57, %c0_58, %c0_59], %76 {strides = array<i32>} : memref<1x25x64xbf16, #tpu.memory_space<vmem>>, vector<1x25x64xbf16>,
    return
  }
  func.func @transform_0(%arg0: i32) -> (i32, i32, i32) {
    %c0_i32 = arith.constant 0 : i32
    %c0_i32_0 = arith.constant 0 : i32
    %c0_i32_1 = arith.constant 0 : i32
    return %arg0, %c0_i32, %c0_i32_0 : i32, i32, i32
  }
  func.func @transform_1(%arg0: i32) -> (i32, i32) {
    %c0_i32 = arith.constant 0 : i32
    %c0_i32_0 = arith.constant 0 : i32
    %c0_i32_1 = arith.constant 0 : i32
    return %c0_i32, %c0_i32_0 : i32, i32
  }
  func.func @transform_2(%arg0: i32) -> (i32, i32) {
    %c0_i32 = arith.constant 0 : i32
    %c0_i32_0 = arith.constant 0 : i32
    %c0_i32_1 = arith.constant 0 : i32
    return %c0_i32, %c0_i32_0 : i32, i32
  }
  func.func @transform_3(%arg0: i32) -> (i32, i32) {
    %c0_i32 = arith.constant 0 : i32
    %c0_i32_0 = arith.constant 0 : i32
    %c0_i32_1 = arith.constant 0 : i32
    return %c0_i32, %c0_i32_0 : i32, i32
  }
  func.func @transform_4(%arg0: i32) -> (i32, i32) {
    %c0_i32 = arith.constant 0 : i32
    %c0_i32_0 = arith.constant 0 : i32
    %c0_i32_1 = arith.constant 0 : i32
    return %c0_i32, %c0_i32_0 : i32, i32
  }
  func.func @transform_5(%arg0: i32) -> (i32, i32) {
    %c0_i32 = arith.constant 0 : i32
    %c0_i32_0 = arith.constant 0 : i32
    %c0_i32_1 = arith.constant 0 : i32
    return %c0_i32, %c0_i32_0 : i32, i32
  }
  func.func @transform_6(%arg0: i32) -> (i32, i32, i32) {
    %c0_i32 = arith.constant 0 : i32
    %c0_i32_0 = arith.constant 0 : i32
    %c0_i32_1 = arith.constant 0 : i32
    return %arg0, %c0_i32, %c0_i32_0 : i32, i32, i32
  }
}

module attributes {stable_mosaic.version = 11 : i64} {
  func.func @_fc_fused_kernel(%arg0: i32, %arg1: memref<2x1600xbf16, #tpu.memory_space<vmem>>, %arg2: memref<1600x512xbf16, #tpu.memory_space<vmem>>, %arg3: memref<1x512xf32, #tpu.memory_space<vmem>>, %arg4: memref<512x2xbf16, #tpu.memory_space<vmem>>, %arg5: memref<1x2xf32, #tpu.memory_space<vmem>>, %arg6: memref<2x2xf32, #tpu.memory_space<vmem>>) attributes {dimension_semantics = [#tpu.dimension_semantics<parallel>], iteration_bounds = array<i64: 1>, scalar_prefetch = 0 : i64, scratch_operands = 0 : i64, tpu.core_type = #tpu.core_type<tc>, window_params = [{transform_indices = @transform_0, window_bounds = array<i64: 2, 1600>}, {pipeline_mode = #tpu.pipeline_mode<synchronous>, transform_indices = @transform_1, window_bounds = array<i64: 1600, 512>}, {pipeline_mode = #tpu.pipeline_mode<synchronous>, transform_indices = @transform_2, window_bounds = array<i64: 1, 512>}, {pipeline_mode = #tpu.pipeline_mode<synchronous>, transform_indices = @transform_3, window_bounds = array<i64: 512, 2>}, {pipeline_mode = #tpu.pipeline_mode<synchronous>, transform_indices = @transform_4, window_bounds = array<i64: 1, 2>}, {transform_indices = @transform_5, window_bounds = array<i64: 2, 2>}]} {
    %c0 = arith.constant 0 : index
    %c0_0 = arith.constant 0 : index
    %0 = vector.load %arg1[%c0, %c0_0] : memref<2x1600xbf16, #tpu.memory_space<vmem>>, vector<2x1600xbf16>
    %c0_1 = arith.constant 0 : index
    %c0_2 = arith.constant 0 : index
    %1 = vector.load %arg2[%c0_1, %c0_2] : memref<1600x512xbf16, #tpu.memory_space<vmem>>, vector<1600x512xbf16>
    %cst = arith.constant dense<0.000000e+00> : vector<2x512xf32>
    %2 = tpu.matmul %0, %1, %cst {dimension_numbers = #tpu.dot_dimension_numbers<[1], [0], [0], [1], [0, 0, 1, 1], [], []>} : vector<2x1600xbf16>, vector<1600x512xbf16>, vector<2x512xf32> -> vector<2x512xf32>
    %c0_3 = arith.constant 0 : index
    %c0_4 = arith.constant 0 : index
    %3 = vector.load %arg3[%c0_3, %c0_4] : memref<1x512xf32, #tpu.memory_space<vmem>>, vector<1x512xf32>
    %4 = vector.broadcast %3 : vector<1x512xf32> to vector<2x512xf32>
    %5 = arith.addf %2, %4 : vector<2x512xf32>
    %cst_5 = arith.constant 0.000000e+00 : f32
    %6 = vector.broadcast %cst_5 : f32 to vector<2x512xf32>
    %7 = arith.maximumf %5, %6 : vector<2x512xf32>
    %8 = arith.truncf %7 : vector<2x512xf32> to vector<2x512xbf16>
    %c0_6 = arith.constant 0 : index
    %c0_7 = arith.constant 0 : index
    %9 = vector.load %arg4[%c0_6, %c0_7] : memref<512x2xbf16, #tpu.memory_space<vmem>>, vector<512x2xbf16>
    %cst_8 = arith.constant dense<0.000000e+00> : vector<2x2xf32>
    %10 = tpu.matmul %8, %9, %cst_8 {dimension_numbers = #tpu.dot_dimension_numbers<[1], [0], [0], [1], [0, 0, 1, 1], [], []>} : vector<2x512xbf16>, vector<512x2xbf16>, vector<2x2xf32> -> vector<2x2xf32>
    %c0_9 = arith.constant 0 : index
    %c0_10 = arith.constant 0 : index
    %11 = vector.load %arg5[%c0_9, %c0_10] : memref<1x2xf32, #tpu.memory_space<vmem>>, vector<1x2xf32>
    %12 = vector.broadcast %11 : vector<1x2xf32> to vector<2x2xf32>
    %13 = arith.addf %10, %12 : vector<2x2xf32>
    %c0_11 = arith.constant 0 : index
    %c0_12 = arith.constant 0 : index
    %14 = vector.load %arg6[%c0_11, %c0_12] : memref<2x2xf32, #tpu.memory_space<vmem>>, vector<2x2xf32>
    tpu.vector_store %arg6[%c0_11, %c0_12], %13 {strides = array<i32>} : memref<2x2xf32, #tpu.memory_space<vmem>>, vector<2x2xf32>,
    return
  }
  func.func @transform_0(%arg0: i32) -> (i32, i32) {
    %c0_i32 = arith.constant 0 : i32
    %c0_i32_0 = arith.constant 0 : i32
    return %arg0, %c0_i32 : i32, i32
  }
  func.func @transform_1(%arg0: i32) -> (i32, i32) {
    %c0_i32 = arith.constant 0 : i32
    %c0_i32_0 = arith.constant 0 : i32
    %c0_i32_1 = arith.constant 0 : i32
    return %c0_i32, %c0_i32_0 : i32, i32
  }
  func.func @transform_2(%arg0: i32) -> (i32, i32) {
    %c0_i32 = arith.constant 0 : i32
    %c0_i32_0 = arith.constant 0 : i32
    %c0_i32_1 = arith.constant 0 : i32
    return %c0_i32, %c0_i32_0 : i32, i32
  }
  func.func @transform_3(%arg0: i32) -> (i32, i32) {
    %c0_i32 = arith.constant 0 : i32
    %c0_i32_0 = arith.constant 0 : i32
    %c0_i32_1 = arith.constant 0 : i32
    return %c0_i32, %c0_i32_0 : i32, i32
  }
  func.func @transform_4(%arg0: i32) -> (i32, i32) {
    %c0_i32 = arith.constant 0 : i32
    %c0_i32_0 = arith.constant 0 : i32
    %c0_i32_1 = arith.constant 0 : i32
    return %c0_i32, %c0_i32_0 : i32, i32
  }
  func.func @transform_5(%arg0: i32) -> (i32, i32) {
    %c0_i32 = arith.constant 0 : i32
    %c0_i32_0 = arith.constant 0 : i32
    return %arg0, %c0_i32 : i32, i32
  }
}

</mosaic_0001>

<bundles_post_ra>
// kernel: dqn_forward.3
= control target key start
LH: loop header
LB: loop body
LE: loop exit
PB: predicated region body
PF: predicated region fallthrough
CT: control target
= control target key end

     0   :  { %s1863_s12 = smov 0   ;;  %s2307_s0 = inlined_call_operand.vmem [shape: bf16[2,400,256], index: 0, kind: input, shape index: {}]   ;;  %s2308_s1 = inlined_call_operand.vmem [shape: bf16[256,32], index: 1, kind: input, shape index: {}]   ;;  %s2309_s2 = inlined_call_operand.vmem [shape: f32[1,32], index: 2, kind: input, shape index: {}]   ;;  %s2310_s3 = inlined_call_operand.vmem [shape: bf16[2,10,10,32], index: 3, kind: output, shape index: {}]  }
   0x1 LB: > { %s1468_s13 = sadd.s32 4294967295, %s1841_s12   ;;  %p1472_p0 = scmp.ge.s32.totalorder %s1841_s12, 1  ;;  %s1841_s12 = sphi %s1863_s12, %s13_s12  }
   0x2   : > { %p137_p1 = scmp.lt.s32.totalorder %s1841_s12, 3 }
   0x4   : > { %p138_p2 = pnand %p1472_p0, %p137_p1 }
   0x5   : > { %p161_p3 = scmp.lt.s32.totalorder (!%p138_p2), %s1468_s13, 1 }
   0x6   : > { %141 = sbr.rel (%p138_p2) target bundleno = 410 (0x19a), region = 32 }
   0xb   : > { %v1798_v0 = vld [vmem:[%s2308_s1 + $0x38] sm:$0xff]  ;;  %v1797_v2 = vld [vmem:[%s2308_s1 + $0x30] sm:$0xff]  ;;  %v1796_v4 = vld [vmem:[%s2308_s1 + $0x28] sm:$0xff]  ;;  %s2312_s13 = smov (!%p161_p3, %s1468_s13), 1  ;;  %vm921_vm0 = vcmask 261120   ;;  %vm977_vm1 = vcmask 257024  }
   0xc   : > { %v1806_v1 = vld [vmem:[%s2308_s1 + $0x78] sm:$0xff]  ;;  %603 = vmatpush.bf16.msra.mxu0 %v1798_v0  ;;  %1807 = vmatpush.bf16.msra.mxu2 %v1798_v0  ;;  %v1805_v3 = vld [vmem:[%s2308_s1 + $0x70] sm:$0xff]  ;;  %v1804_v5 = vld [vmem:[%s2308_s1 + $0x68] sm:$0xff]  ;;  %s1823_s9 = smul.u32 400, %s2312_s13  ;;  %vm1314_vm2 = vcmask 254976   ;;  %vm1393_vm3 = vcmask 253952  }
   0xd   : > { %737 = vmatpush.bf16.msra.mxu1 %v1806_v1  ;;  %1815 = vmatpush.bf16.msra.mxu3 %v1806_v1  ;;  %v1795_v6 = vld [vmem:[%s2308_s1 + $0x20] sm:$0xff]  ;;  %v1794_v8 = vld [vmem:[%s2308_s1 + $0x18] sm:$0xff]  ;;  %v1793_v10 = vld [vmem:[%s2308_s1 + $0x10] sm:$0xff]  ;;  %s1824_s27 = smul.u32 80, %s2312_s13 }
   0xe   : > { %v1803_v7 = vld [vmem:[%s2308_s1 + $0x60] sm:$0xff]  ;;  %v1802_v9 = vld [vmem:[%s2308_s1 + $0x58] sm:$0xff]  ;;  %v1801_v11 = vld [vmem:[%s2308_s1 + $0x50] sm:$0xff]  ;;  %s1916_s18 = scalar_lea.vmem %s2307_s0, %s1823_s9 }
   0xf   : > { %v1792_v12 = vld [vmem:[%s2308_s1 + $0x8] sm:$0xff]  ;;  %v1791_v14 = vld [vmem:[%s2308_s1] sm:$0xff]  ;;  %v1767_v22 = vld [vmem:[%s1916_s18 + $0xd4] sm:$0xf]  ;;  %s2083_s29 = scalar_lea.vmem %s2310_s3, %s1824_s27 }
  0x10   : > { %604 = vmatpush.bf16.msra.mxu0 %v1797_v2  ;;  %1808 = vmatpush.bf16.msra.mxu2 %v1797_v2  ;;  %v1800_v13 = vld [vmem:[%s2308_s1 + $0x48] sm:$0xff]  ;;  %v1799_v15 = vld [vmem:[%s2308_s1 + $0x40] sm:$0xff]  ;;  %v1583_v23 = vld [vmem:[%s1916_s18 + $0xd8] sm:$0xf0] }
  0x11   : > { %738 = vmatpush.bf16.msra.mxu1 %v1805_v3  ;;  %1816 = vmatpush.bf16.msra.mxu3 %v1805_v3  ;;  %v1477_v16 = vld [vmem:[%s1916_s18] sm:$0xf]  ;;  %v1742_v17 = vld [vmem:[%s1916_s18 + $0x4] sm:$0xf0]  ;;  %v1741_v20 = vld [vmem:[%s1916_s18 + $0x4] sm:$0xf]  ;;  %v1586_v27 = vor.u32 %v1767_v22, %v1583_v23 }
  0x12   : > { %v1573_v18 = vld [vmem:[%s1916_s18 + $0xc0] sm:$0xf]  ;;  %v1766_v19 = vld [vmem:[%s1916_s18 + $0xc4] sm:$0xf0]  ;;  %v1479_v21 = vld [vmem:[%s1916_s18 + $0x8] sm:$0xf0]  ;;  %v1478_v24 = vor.u32 %v1742_v17, %v1477_v16 }
  0x13   : > { %v1574_v25 = vor.u32 %v1766_v19, %v1573_v18  ;;  %v1482_v26 = vor.u32 %v1741_v20, %v1479_v21  ;;  %v1485_v28 = vld [vmem:[%s1916_s18 + $0x10] sm:$0xf]  ;;  %v1744_v29 = vld [vmem:[%s1916_s18 + $0x14] sm:$0xf0]  ;;  %v1743_v32 = vld [vmem:[%s1916_s18 + $0x14] sm:$0xf] }
  0x14   : > { %605 = vmatpush.bf16.msra.mxu0 %v1796_v4  ;;  %1809 = vmatpush.bf16.msra.mxu2 %v1796_v4  ;;  %v1581_v30 = vld [vmem:[%s1916_s18 + $0xd0] sm:$0xf]  ;;  %v1768_v31 = vld [vmem:[%s1916_s18 + $0xd4] sm:$0xf0]  ;;  %v1487_v33 = vld [vmem:[%s1916_s18 + $0x18] sm:$0xf0]  ;;  %v1486_v36 = vor.u32 %v1744_v29, %v1485_v28 }
  0x15   : > { %739 = vmatpush.bf16.msra.mxu1 %v1804_v5  ;;  %1817 = vmatpush.bf16.msra.mxu3 %v1804_v5  ;;  %v1769_v34 = vld [vmem:[%s1916_s18 + $0xe4] sm:$0xf]  ;;  %v1591_v35 = vld [vmem:[%s1916_s18 + $0xe8] sm:$0xf0]  ;;  %v1582_v37 = vor.u32 %v1768_v31, %v1581_v30  ;;  %v1490_v38 = vor.u32 %v1743_v32, %v1487_v33  ;;  %v1493_v40 = vld [vmem:[%s1916_s18 + $0x20] sm:$0xf] }
  0x16   : > { %v1594_v39 = vor.u32 %v1769_v34, %v1591_v35  ;;  %v1746_v41 = vld [vmem:[%s1916_s18 + $0x24] sm:$0xf0]  ;;  %v1589_v42 = vld [vmem:[%s1916_s18 + $0xe0] sm:$0xf]  ;;  %v1745_v44 = vld [vmem:[%s1916_s18 + $0x24] sm:$0xf] }
  0x17   : > { %v1770_v43 = vld [vmem:[%s1916_s18 + $0xe4] sm:$0xf0]  ;;  %v1495_v45 = vld [vmem:[%s1916_s18 + $0x28] sm:$0xf0]  ;;  %v1771_v46 = vld [vmem:[%s1916_s18 + $0xf4] sm:$0xf]  ;;  %v1494_v48 = vor.u32 %v1746_v41, %v1493_v40 }
  0x18   : > { %606 = vmatpush.bf16.msra.mxu0 %v1795_v6  ;;  %1810 = vmatpush.bf16.msra.mxu2 %v1795_v6  ;;  %v1599_v47 = vld [vmem:[%s1916_s18 + $0xf8] sm:$0xf0]  ;;  %v1590_v49 = vor.u32 %v1770_v43, %v1589_v42  ;;  %v1498_v50 = vor.u32 %v1745_v44, %v1495_v45  ;;  %v1501_v52 = vld [vmem:[%s1916_s18 + $0x30] sm:$0xf]  ;;  %v1748_v53 = vld [vmem:[%s1916_s18 + $0x34] sm:$0xf0] }
  0x19   : > { %740 = vmatpush.bf16.msra.mxu1 %v1803_v7  ;;  %1818 = vmatpush.bf16.msra.mxu3 %v1803_v7  ;;  %v1602_v51 = vor.u32 %v1771_v46, %v1599_v47  ;;  %v1597_v54 = vld [vmem:[%s1916_s18 + $0xf0] sm:$0xf]  ;;  %v1772_v55 = vld [vmem:[%s1916_s18 + $0xf4] sm:$0xf0]  ;;  %v1747_v56 = vld [vmem:[%s1916_s18 + $0x34] sm:$0xf]  ;;  %v1502_v60 = vor.u32 %v1748_v53, %v1501_v52 }
  0x1a   : > { %v1503_v57 = vld [vmem:[%s1916_s18 + $0x38] sm:$0xf0]  ;;  %v1773_v58 = vld [vmem:[%s1916_s18 + $0x104] sm:$0xf]  ;;  %v1607_v59 = vld [vmem:[%s1916_s18 + $0x108] sm:$0xf0]  ;;  %v1598_v61 = vor.u32 %v1772_v55, %v1597_v54 }
  0x1b   : > { %v1506_v62 = vor.u32 %v1747_v56, %v1503_v57  ;;  %v1610_v63 = vor.u32 %v1773_v58, %v1607_v59  ;;  %v1509_v0 = vld [vmem:[%s1916_s18 + $0x40] sm:$0xf]  ;;  %v1750_v1 = vld [vmem:[%s1916_s18 + $0x44] sm:$0xf0]  ;;  %v1749_v4 = vld [vmem:[%s1916_s18 + $0x44] sm:$0xf] }
  0x1c   : > { %607 = vmatpush.bf16.msra.mxu0 %v1794_v8  ;;  %1811 = vmatpush.bf16.msra.mxu2 %v1794_v8  ;;  %v1605_v2 = vld [vmem:[%s1916_s18 + $0x100] sm:$0xf]  ;;  %v1774_v3 = vld [vmem:[%s1916_s18 + $0x104] sm:$0xf0]  ;;  %v1511_v5 = vld [vmem:[%s1916_s18 + $0x48] sm:$0xf0]  ;;  %v1510_v8 = vor.u32 %v1750_v1, %v1509_v0 }
  0x1d   : > { %741 = vmatpush.bf16.msra.mxu1 %v1802_v9  ;;  %1819 = vmatpush.bf16.msra.mxu3 %v1802_v9  ;;  %v1775_v6 = vld [vmem:[%s1916_s18 + $0x114] sm:$0xf]  ;;  %v1615_v7 = vld [vmem:[%s1916_s18 + $0x118] sm:$0xf0]  ;;  %v1606_v9 = vor.u32 %v1774_v3, %v1605_v2  ;;  %v1777_v18 = vld [vmem:[%s1916_s18 + $0x124] sm:$0xf] }
  0x1e   : > { %v1751_v16 = vld [vmem:[%s1916_s18 + $0x54] sm:$0xf]  ;;  %v1519_v17 = vld [vmem:[%s1916_s18 + $0x58] sm:$0xf0]  ;;  %v1623_v19 = vld [vmem:[%s1916_s18 + $0x128] sm:$0xf0] }
  0x1f   : > { %v1522_v22 = vor.u32 %v1751_v16, %v1519_v17  ;;  %v1626_v23 = vor.u32 %v1777_v18, %v1623_v19  ;;  %v1753_v28 = vld [vmem:[%s1916_s18 + $0x64] sm:$0xf]  ;;  %v1527_v29 = vld [vmem:[%s1916_s18 + $0x68] sm:$0xf0]  ;;  %v1779_v30 = vld [vmem:[%s1916_s18 + $0x134] sm:$0xf] }
  0x20   : > { %608 = vmatpush.bf16.msra.mxu0 %v1793_v10  ;;  %1812 = vmatpush.bf16.msra.mxu2 %v1793_v10  ;;  %v1514_v10 = vor.u32 %v1749_v4, %v1511_v5  ;;  %v1631_v31 = vld [vmem:[%s1916_s18 + $0x138] sm:$0xf0]  ;;  %v1530_v34 = vor.u32 %v1753_v28, %v1527_v29  ;;  %v1755_v40 = vld [vmem:[%s1916_s18 + $0x74] sm:$0xf]  ;;  %v1781_v42 = vld [vmem:[%s1916_s18 + $0x144] sm:$0xf] }
  0x21   : > { %742 = vmatpush.bf16.msra.mxu1 %v1801_v11  ;;  %1820 = vmatpush.bf16.msra.mxu3 %v1801_v11  ;;  %v1618_v11 = vor.u32 %v1775_v6, %v1615_v7  ;;  %v1634_v35 = vor.u32 %v1779_v30, %v1631_v31  ;;  %v1535_v41 = vld [vmem:[%s1916_s18 + $0x78] sm:$0xf0]  ;;  %v1639_v43 = vld [vmem:[%s1916_s18 + $0x148] sm:$0xf0]  ;;  %v1782_v52 = vld [vmem:[%s1916_s18 + $0x144] sm:$0xf0] }
  0x22   : > { %v1538_v46 = vor.u32 %v1755_v40, %v1535_v41  ;;  %v1642_v47 = vor.u32 %v1781_v42, %v1639_v43  ;;  %v1757_v53 = vld [vmem:[%s1916_s18 + $0x84] sm:$0xf]  ;;  %v1543_v54 = vld [vmem:[%s1916_s18 + $0x88] sm:$0xf0]  ;;  %v1783_v55 = vld [vmem:[%s1916_s18 + $0x154] sm:$0xf] }
  0x23   : > { %v1647_v56 = vld [vmem:[%s1916_s18 + $0x158] sm:$0xf0]  ;;  %v1655_v16 = vld [vmem:[%s1916_s18 + $0x168] sm:$0xf0]  ;;  %v1762_v40 = vld [vmem:[%s1916_s18 + $0xa4] sm:$0xf0] }
  0x24   : > { %609 = vmatpush.bf16.msra.mxu0 %v1792_v12  ;;  %1813 = vmatpush.bf16.msra.mxu2 %v1792_v12  ;;  %v1517_v12 = vld [vmem:[%s1916_s18 + $0x50] sm:$0xf]  ;;  %v1653_v41 = vld [vmem:[%s1916_s18 + $0x160] sm:$0xf]  ;;  %v1786_v42 = vld [vmem:[%s1916_s18 + $0x164] sm:$0xf0] }
  0x25   : > { %743 = vmatpush.bf16.msra.mxu1 %v1800_v13  ;;  %1821 = vmatpush.bf16.msra.mxu3 %v1800_v13  ;;  %v1752_v13 = vld [vmem:[%s1916_s18 + $0x54] sm:$0xf0]  ;;  %v1761_v43 = vld [vmem:[%s1916_s18 + $0xa4] sm:$0xf] }
  0x26   : > { %v1518_v20 = vor.u32 %v1752_v13, %v1517_v12  ;;  %v1759_v12 = vld [vmem:[%s1916_s18 + $0x94] sm:$0xf]  ;;  %v1551_v13 = vld [vmem:[%s1916_s18 + $0x98] sm:$0xf0] }
  0x28   : > { %610 = vmatpush.bf16.msra.mxu0 %v1791_v14  ;;  %1814 = vmatpush.bf16.msra.mxu2 %v1791_v14  ;;  %v1613_v14 = vld [vmem:[%s1916_s18 + $0x110] sm:$0xf] }
  0x29   : > { %744 = vmatpush.bf16.msra.mxu1 %v1799_v15  ;;  %1822 = vmatpush.bf16.msra.mxu3 %v1799_v15  ;;  %v1776_v15 = vld [vmem:[%s1916_s18 + $0x114] sm:$0xf0] }
  0x2a   : > { %v1614_v21 = vor.u32 %v1776_v15, %v1613_v14  ;;  %v1785_v15 = vld [vmem:[%s1916_s18 + $0x164] sm:$0xf] }
  0x2b   : > { %611 = vmatmul.bf16.vlgmr.msra.gmra.mxu0 %v1478_v24  ;;  %671 = vmatmul.bf16.vlgmr.msra.gmra.mxu2 %v1574_v25  ;;  %v1525_v24 = vld [vmem:[%s1916_s18 + $0x60] sm:$0xf]  ;;  %v1754_v25 = vld [vmem:[%s1916_s18 + $0x64] sm:$0xf0] }
  0x2c   : > { %745 = vmatmul.bf16.vlgmr.msra.gmra.mxu1 %v1482_v26  ;;  %810 = vmatmul.bf16.vlgmr.msra.gmra.mxu3 %v1586_v27  ;;  %v1621_v26 = vld [vmem:[%s1916_s18 + $0x120] sm:$0xf]  ;;  %v1778_v27 = vld [vmem:[%s1916_s18 + $0x124] sm:$0xf0]  ;;  %v1526_v32 = vor.u32 %v1754_v25, %v1525_v24  ;;  %v1658_v24 = vor.u32 %v1785_v15, %v1655_v16  ;;  %v1788_v15 = vld [vmem:[%s1916_s18 + $0x174] sm:$0xf0] }
  0x2d   : > { %v1622_v33 = vor.u32 %v1778_v27, %v1621_v26  ;;  %v1763_v16 = vld [vmem:[%s1916_s18 + $0xb4] sm:$0xf] }
  0x3b   : > { %616 = vmatmul.bf16.gmra.mxu0 %v1486_v36  ;;  %676 = vmatmul.bf16.gmra.mxu2 %v1582_v37  ;;  %v1533_v36 = vld [vmem:[%s1916_s18 + $0x70] sm:$0xf]  ;;  %v1756_v37 = vld [vmem:[%s1916_s18 + $0x74] sm:$0xf0] }
  0x3c   : > { %750 = vmatmul.bf16.gmra.mxu1 %v1490_v38  ;;  %815 = vmatmul.bf16.gmra.mxu3 %v1594_v39  ;;  %v1629_v38 = vld [vmem:[%s1916_s18 + $0x130] sm:$0xf]  ;;  %v1780_v39 = vld [vmem:[%s1916_s18 + $0x134] sm:$0xf0]  ;;  %v1534_v44 = vor.u32 %v1756_v37, %v1533_v36  ;;  %v1557_v37 = vld [vmem:[%s1916_s18 + $0xa0] sm:$0xf] }
  0x3d   : > { %v1630_v45 = vor.u32 %v1780_v39, %v1629_v38 }
  0x4b   : > { %621 = vmatmul.bf16.gmra.mxu0 %v1494_v48  ;;  %681 = vmatmul.bf16.gmra.mxu2 %v1590_v49  ;;  %v1994_v48 = vld [vmem:[%s2309_s2] ss:$0 sm:$0xff] }
  0x4c   : > { %755 = vmatmul.bf16.gmra.mxu1 %v1498_v50  ;;  %820 = vmatmul.bf16.gmra.mxu3 %v1602_v51  ;;  %v1541_v49 = vld [vmem:[%s1916_s18 + $0x80] sm:$0xf]  ;;  %v1758_v50 = vld [vmem:[%s1916_s18 + $0x84] sm:$0xf0] }
  0x4d   : > { %v1637_v51 = vld [vmem:[%s1916_s18 + $0x140] sm:$0xf]  ;;  %v1542_v57 = vor.u32 %v1758_v50, %v1541_v49 }
  0x4e   : > { %v1638_v58 = vor.u32 %v1782_v52, %v1637_v51  ;;  %v1558_v52 = vor.u32 %v1762_v40, %v1557_v37 }
  0x5b   : > { %626 = vmatmul.bf16.gmra.mxu0 %v1502_v60  ;;  %686 = vmatmul.bf16.gmra.mxu2 %v1598_v61  ;;  %v1546_v60 = vor.u32 %v1757_v53, %v1543_v54  ;;  %v1650_v61 = vor.u32 %v1783_v55, %v1647_v56  ;;  %v1654_v53 = vor.u32 %v1786_v42, %v1653_v41 }
  0x5c   : > { %760 = vmatmul.bf16.gmra.mxu1 %v1506_v62  ;;  %825 = vmatmul.bf16.gmra.mxu3 %v1610_v63 }
  0x6b   : > { %631 = vmatmul.bf16.gmra.mxu0 %v1510_v8  ;;  %691 = vmatmul.bf16.gmra.mxu2 %v1606_v9  ;;  %v1549_v8 = vld [vmem:[%s1916_s18 + $0x90] sm:$0xf]  ;;  %v1760_v9 = vld [vmem:[%s1916_s18 + $0x94] sm:$0xf0] }
  0x6c   : > { %765 = vmatmul.bf16.gmra.mxu1 %v1514_v10  ;;  %830 = vmatmul.bf16.gmra.mxu3 %v1618_v11  ;;  %v1645_v10 = vld [vmem:[%s1916_s18 + $0x150] sm:$0xf]  ;;  %v1784_v11 = vld [vmem:[%s1916_s18 + $0x154] sm:$0xf0]  ;;  %v1550_v19 = vor.u32 %v1760_v9, %v1549_v8 }
  0x7b   : > { %636 = vmatmul.bf16.gmra.mxu0 %v1518_v20  ;;  %696 = vmatmul.bf16.gmra.mxu2 %v1614_v21  ;;  %v1646_v20 = vor.u32 %v1784_v11, %v1645_v10  ;;  %v1565_v10 = vld [vmem:[%s1916_s18 + $0xb0] sm:$0xf] }
  0x7c   : > { %770 = vmatmul.bf16.gmra.mxu1 %v1522_v22  ;;  %835 = vmatmul.bf16.gmra.mxu3 %v1626_v23  ;;  %v1554_v23 = vor.u32 %v1759_v12, %v1551_v13  ;;  %v1764_v13 = vld [vmem:[%s1916_s18 + $0xb4] sm:$0xf0] }
  0x8b   : > { %641 = vmatmul.bf16.gmra.mxu0 %v1526_v32  ;;  %701 = vmatmul.bf16.gmra.mxu2 %v1622_v33 }
  0x8c   : > { %775 = vmatmul.bf16.gmra.mxu1 %v1530_v34  ;;  %840 = vmatmul.bf16.gmra.mxu3 %v1634_v35 }
  0x9b   : > { %646 = vmatmul.bf16.gmra.mxu0 %v1534_v44  ;;  %706 = vmatmul.bf16.gmra.mxu2 %v1630_v45  ;;  %v1559_v44 = vld [vmem:[%s1916_s18 + $0xa8] sm:$0xf0] }
  0x9c   : > { %780 = vmatmul.bf16.gmra.mxu1 %v1538_v46  ;;  %845 = vmatmul.bf16.gmra.mxu3 %v1642_v47  ;;  %v1787_v46 = vld [vmem:[%s1916_s18 + $0x174] sm:$0xf]  ;;  %v1663_v47 = vld [vmem:[%s1916_s18 + $0x178] sm:$0xf0]  ;;  %v1562_v56 = vor.u32 %v1761_v43, %v1559_v44 }
  0xa8   : > { %v612_v59 = vpop.f32.mrf.mxu0 }
  0xa9   : > { %v613_v62 = vadd.f32 %v1994_v48, %v612_v59  ;;  %v746_v63 = vpop.f32.mrf.mxu1 }
  0xab   : > { %v747_v0 = vadd.f32 %v746_v63, %v613_v62  ;;  %651 = vmatmul.bf16.gmra.mxu0 %v1542_v57  ;;  %711 = vmatmul.bf16.gmra.mxu2 %v1638_v58  ;;  %v1666_v57 = vor.u32 %v1787_v46, %v1663_v47 }
  0xac   : > { %785 = vmatmul.bf16.gmra.mxu1 %v1546_v60  ;;  %850 = vmatmul.bf16.gmra.mxu3 %v1650_v61 }
  0xad   : > { %v871_v1 = vmax.f32 %v747_v0, 0.0 }
  0xae   : > { %v2005_v2 = vpop.f32.mrf.mxu2 }
  0xaf   : > { %922 = vst.msk [vmem:[#allocation2] sm:$0xff] %vm921_vm0, %v871_v1  ;;  %v811_v3 = vpop.f32.mrf.mxu3 }
  0xb0   : > { %v614_v4 = vpop.f32.mrf.mxu0 }
  0xb1   : > { %v615_v5 = vadd.f32 %v1994_v48, %v614_v4  ;;  %v748_v6 = vpop.f32.mrf.mxu1 }
  0xb3   : > { %v749_v7 = vadd.f32 %v748_v6, %v615_v5 }
  0xb5   : > { %v872_v14 = vmax.f32 %v749_v7, 0.0 }
  0xb6   : > { %v972_v17 = vld [vmem:[#allocation2] sm:$0xff]  ;;  %v2017_v18 = vpop.f32.mrf.mxu2 }
  0xb7   : > { %975 = vst.msk [vmem:[#allocation3] sm:$0xff] %vm921_vm0, %v972_v17  ;;  %v813_v21 = vpop.f32.mrf.mxu3  ;;  %v1567_v17 = vld [vmem:[%s1916_s18 + $0xb8] sm:$0xf0] }
  0xb8   : > { %923 = vst.msk [vmem:[#allocation2 + $0x8] sm:$0xff] %vm921_vm0, %v872_v14  ;;  %v617_v22 = vpop.f32.mrf.mxu0  ;;  %v1661_v14 = vld [vmem:[%s1916_s18 + $0x170] sm:$0xf] }
  0xb9   : > { %v618_v25 = vadd.f32 %v1994_v48, %v617_v22  ;;  %v751_v26 = vpop.f32.mrf.mxu1 }
  0xbb   : > { %v752_v27 = vadd.f32 %v751_v26, %v618_v25  ;;  %656 = vmatmul.bf16.gmra.mxu0 %v1550_v19  ;;  %716 = vmatmul.bf16.gmra.mxu2 %v1646_v20  ;;  %v1789_v20 = vld [vmem:[%s1916_s18 + $0x184] sm:$0xf]  ;;  %v1566_v25 = vor.u32 %v1764_v13, %v1565_v10  ;;  %v1662_v26 = vor.u32 %v1788_v15, %v1661_v14 }
  0xbc   : > { %790 = vmatmul.bf16.gmra.mxu1 %v1554_v23  ;;  %855 = vmatmul.bf16.gmra.mxu3 %v1658_v24 }
  0xbd   : > { %v873_v28 = vmax.f32 %v752_v27, 0.0 }
  0xbe   : > { %v677_v29 = vpop.f32.mrf.mxu2 }
  0xbf   : > { %v973_v30 = vld [vmem:[#allocation2 + $0x8] sm:$0xff]  ;;  %924 = vst.msk [vmem:[#allocation2 + $0x10] sm:$0xff] %vm921_vm0, %v873_v28  ;;  %v678_v31 = vadd.f32 %v1994_v48, %v677_v29  ;;  %v816_v32 = vpop.f32.mrf.mxu3 }
  0xc0   : > { %976 = vst.msk [vmem:[#allocation3 + $0x8] sm:$0xff] %vm921_vm0, %v973_v30  ;;  %v619_v33 = vpop.f32.mrf.mxu0 }
  0xc1   : > { %v812_v34 = vadd.f32 %v811_v3, %v678_v31  ;;  %v620_v35 = vadd.f32 %v1994_v48, %v619_v33  ;;  %v753_v36 = vpop.f32.mrf.mxu1  ;;  %v1570_v31 = vor.u32 %v1763_v16, %v1567_v17 }
  0xc3   : > { %v897_v38 = vmax.f32 %v812_v34, 0.0  ;;  %v754_v39 = vadd.f32 %v753_v36, %v620_v35 }
  0xc5   : > { %948 = vst.msk [vmem:[#allocation2 + $0xd0] sm:$0xff] %vm921_vm0, %v897_v38  ;;  %v874_v45 = vmax.f32 %v754_v39, 0.0 }
  0xc6   : > { %v974_v49 = vld [vmem:[#allocation2 + $0x10] sm:$0xf]  ;;  %v679_v50 = vpop.f32.mrf.mxu2 }
  0xc7   : > { %978 = vst.msk [vmem:[#allocation3 + $0x10] sm:$0xf] %vm977_vm1, %v974_v49  ;;  %v680_v51 = vadd.f32 %v1994_v48, %v679_v50  ;;  %v818_v54 = vpop.f32.mrf.mxu3  ;;  %v1112_v38 = vld [vmem:[#allocation3] ss:$2 sm:$0xff]  ;;  %v1192_v39 = vld [vmem:[#allocation3 + $0x1] ss:$2 sm:$0xff] }
  0xc8   : > { %925 = vst.msk [vmem:[#allocation2 + $0x18] sm:$0xff] %vm921_vm0, %v874_v45  ;;  %v622_v55 = vpop.f32.mrf.mxu0  ;;  %v1271_v45 = vmax.f32 %v1112_v38, %v1192_v39 }
  0xc9   : > { %v814_v58 = vadd.f32 %v813_v21, %v680_v51  ;;  %v623_v59 = vadd.f32 %v1994_v48, %v622_v55  ;;  %v756_v60 = vpop.f32.mrf.mxu1  ;;  %v1671_v21 = vld [vmem:[%s1916_s18 + $0x188] sm:$0xf0] }
  0xcb   : > { %v898_v61 = vmax.f32 %v814_v58, 0.0  ;;  %v757_v62 = vadd.f32 %v756_v60, %v623_v59  ;;  %661 = vmatmul.bf16.gmra.mxu0 %v1558_v52  ;;  %721 = vmatmul.bf16.gmra.mxu2 %v1654_v53  ;;  %v1311_v60 = vsel %vm921_vm0, %v1271_v45, -inf }
  0xcc   : > { %v1043_v63 = vld [vmem:[#allocation2 + $0xd0] sm:$0xff]  ;;  %795 = vmatmul.bf16.gmra.mxu1 %v1562_v56  ;;  %860 = vmatmul.bf16.gmra.mxu3 %v1666_v57 }
  0xcd   : > { %1047 = vst.msk [vmem:[#allocation3 + $0xf8] sm:$0xff] %vm921_vm0, %v1043_v63  ;;  %v875_v0 = vmax.f32 %v757_v62, 0.0 }
  0xce   : > { %v682_v1 = vpop.f32.mrf.mxu2  ;;  %949 = vst.msk [vmem:[#allocation2 + $0xd8] sm:$0xff] %vm921_vm0, %v898_v61  ;;  %v1114_v42 = vld [vmem:[#allocation3 + $0x10] ss:$2 sm:$0x3] }
  0xcf   : > { %v979_v3 = vld [vmem:[#allocation2 + $0x14] sm:$0xff]  ;;  %v683_v4 = vadd.f32 %v1994_v48, %v682_v1  ;;  %v2042_v5 = vpop.f32.mrf.mxu3  ;;  %926 = vst.msk [vmem:[#allocation2 + $0x20] sm:$0xff] %vm921_vm0, %v875_v0  ;;  %v1194_v43 = vld [vmem:[#allocation3 + $0x11] ss:$2 sm:$0x3] }
  0xd0   : > { %983 = vst.msk [vmem:[#allocation3 + $0x18] sm:$0xff] %vm921_vm0, %v979_v3  ;;  %v624_v6 = vpop.f32.mrf.mxu0  ;;  %v1272_v53 = vmax.f32 %v1114_v42, %v1194_v43  ;;  %v1669_v3 = vld [vmem:[%s1916_s18 + $0x180] sm:$0xf] }
  0xd1   : > { %v817_v7 = vadd.f32 %v816_v32, %v683_v4  ;;  %v625_v8 = vadd.f32 %v1994_v48, %v624_v6  ;;  %v758_v9 = vpop.f32.mrf.mxu1  ;;  %v1674_v32 = vor.u32 %v1789_v20, %v1671_v21  ;;  %v1790_v4 = vld [vmem:[%s1916_s18 + $0x184] sm:$0xf0]  ;;  %v1765_v6 = vld [vmem:[%s1916_s18 + $0xc4] sm:$0xf] }
  0xd2   : > { %v1670_v15 = vor.u32 %v1790_v4, %v1669_v3 }
  0xd3   : > { %v899_v11 = vmax.f32 %v817_v7, 0.0  ;;  %v759_v12 = vadd.f32 %v758_v9, %v625_v8  ;;  %v1315_v7 = vsel %vm1314_vm2, %v1272_v53, -inf  ;;  %v1575_v8 = vld [vmem:[%s1916_s18 + $0xc8] sm:$0xf0] }
  0xd5   : > { %950 = vst.msk [vmem:[#allocation2 + $0xe0] sm:$0xff] %vm921_vm0, %v899_v11  ;;  %v876_v19 = vmax.f32 %v759_v12, 0.0  ;;  %v1044_v22 = vld [vmem:[#allocation2 + $0xd8] sm:$0xf] }
  0xd6   : > { %v684_v23 = vpop.f32.mrf.mxu2  ;;  %1048 = vst.msk [vmem:[#allocation3 + $0x100] sm:$0xf] %vm977_vm1, %v1044_v22  ;;  %v980_v28 = vld [vmem:[#allocation2 + $0x1c] sm:$0xff]  ;;  %v981_v29 = vld [vmem:[#allocation2 + $0x24] sm:$0xf]  ;;  %v1578_v22 = vor.u32 %v1765_v6, %v1575_v8 }
  0xd7   : > { %v685_v24 = vadd.f32 %v1994_v48, %v684_v23  ;;  %v2058_v27 = vpop.f32.mrf.mxu3  ;;  %927 = vst.msk [vmem:[#allocation2 + $0x28] sm:$0xff] %vm921_vm0, %v876_v19 }
  0xd8   : > { %v627_v30 = vpop.f32.mrf.mxu0  ;;  %984 = vst.msk [vmem:[#allocation3 + $0x20] sm:$0xff] %vm921_vm0, %v980_v28 }
  0xd9   : > { %v819_v33 = vadd.f32 %v818_v54, %v685_v24  ;;  %v628_v34 = vadd.f32 %v1994_v48, %v627_v30  ;;  %v761_v35 = vpop.f32.mrf.mxu1  ;;  %985 = vst.msk [vmem:[#allocation3 + $0x28] sm:$0xf] %vm977_vm1, %v981_v29 }
  0xdb   : > { %v900_v36 = vmax.f32 %v819_v33, 0.0  ;;  %v762_v37 = vadd.f32 %v761_v35, %v628_v34  ;;  %666 = vmatmul.bf16.gmra.mxu0 %v1566_v25  ;;  %726 = vmatmul.bf16.gmra.mxu2 %v1662_v26 }
  0xdc   : > { %v1049_v40 = vld [vmem:[#allocation2 + $0xdc] sm:$0xff]  ;;  %800 = vmatmul.bf16.gmra.mxu1 %v1570_v31  ;;  %865 = vmatmul.bf16.gmra.mxu3 %v1674_v32 }
  0xdd   : > { %1053 = vst.msk [vmem:[#allocation3 + $0x108] sm:$0xff] %vm921_vm0, %v1049_v40  ;;  %v877_v41 = vmax.f32 %v762_v37, 0.0  ;;  %v1154_v26 = vld [vmem:[#allocation3 + $0x100] ss:$2 sm:$0x3] }
  0xde   : > { %v687_v44 = vpop.f32.mrf.mxu2  ;;  %v986_v46 = vld [vmem:[#allocation2 + $0x28] sm:$0xff]  ;;  %951 = vst.msk [vmem:[#allocation2 + $0xe8] sm:$0xff] %vm921_vm0, %v900_v36  ;;  %v1234_v30 = vld [vmem:[#allocation3 + $0x101] ss:$2 sm:$0x3] }
  0xdf   : > { %v688_v47 = vadd.f32 %v1994_v48, %v687_v44  ;;  %v2067_v49 = vpop.f32.mrf.mxu3  ;;  %v1116_v50 = vld [vmem:[#allocation3 + $0x18] ss:$2 sm:$0xff]  ;;  %v1196_v51 = vld [vmem:[#allocation3 + $0x19] ss:$2 sm:$0xff]  ;;  %990 = vst.msk [vmem:[#allocation3 + $0x30] sm:$0xff] %vm921_vm0, %v986_v46  ;;  %v1292_v33 = vmax.f32 %v1154_v26, %v1234_v30 }
  0xe0   : > { %v629_v52 = vpop.f32.mrf.mxu0  ;;  %v1118_v54 = vld [vmem:[#allocation3 + $0x28] ss:$2 sm:$0x3]  ;;  %v1273_v55 = vmax.f32 %v1116_v50, %v1196_v51  ;;  %928 = vst.msk [vmem:[#allocation2 + $0x30] sm:$0xff] %vm921_vm0, %v877_v41 }
  0xe1   : > { %v822_v56 = vadd.f32 %v2042_v5, %v688_v47  ;;  %v630_v57 = vadd.f32 %v1994_v48, %v629_v52  ;;  %v763_v58 = vpop.f32.mrf.mxu1  ;;  %v1198_v59 = vld [vmem:[#allocation3 + $0x29] ss:$2 sm:$0x3]  ;;  %v1345_v43 = vsel %vm1314_vm2, %v1292_v33, -inf }
  0xe2   : > { %v1274_v61 = vmax.f32 %v1118_v54, %v1198_v59  ;;  %v1312_v62 = vsel %vm921_vm0, %v1273_v55, -inf }
  0xe3   : > { %v901_v63 = vmax.f32 %v822_v56, 0.0  ;;  %v1313_v0 = vmax.f32 %v1311_v60, %v1312_v62  ;;  %v764_v1 = vadd.f32 %v763_v58, %v630_v57 }
  0xe4   : > { %v1316_v5 = vsel %vm1314_vm2, %v1274_v61, -inf }
  0xe5   : > { %952 = vst.msk [vmem:[#allocation2 + $0xf0] sm:$0xff] %vm921_vm0, %v901_v63  ;;  %v1317_v9 = vmax.f32 %v1315_v7, %v1316_v5  ;;  %v1372_v10 = vpack.c.bf16 %v1313_v0, %v1313_v0  ;;  %v1050_v11 = vld [vmem:[#allocation2 + $0xe4] sm:$0xff]  ;;  %v1051_v12 = vld [vmem:[#allocation2 + $0xec] sm:$0xf]  ;;  %v878_v20 = vmax.f32 %v764_v1, 0.0 }
  0xe6   : > { %v689_v13 = vpop.f32.mrf.mxu2  ;;  %1054 = vst.msk [vmem:[#allocation3 + $0x110] sm:$0xff] %vm921_vm0, %v1050_v11 }
  0xe7   : > { %v690_v14 = vadd.f32 %v1994_v48, %v689_v13  ;;  %v828_v16 = vpop.f32.mrf.mxu3  ;;  %v1373_v17 = vpack.c.bf16 %v1317_v9, %v1317_v9  ;;  %1392 = vst.msk [vmem:[%s2083_s29] sm:$0xf] %vm977_vm1, %v1372_v10  ;;  %v987_v19 = vld [vmem:[#allocation2 + $0x30] sm:$0xff] }
  0xe8   : > { %v632_v21 = vpop.f32.mrf.mxu0  ;;  %1055 = vst.msk [vmem:[#allocation3 + $0x118] sm:$0xf] %vm977_vm1, %v1051_v12 }
  0xe9   : > { %v824_v23 = vadd.f32 %v2058_v27, %v690_v14  ;;  %v633_v24 = vadd.f32 %v1994_v48, %v632_v21  ;;  %v766_v25 = vpop.f32.mrf.mxu1  ;;  %1394 = vst.msk [vmem:[%s2083_s29 + $0x4] sm:$0x1] %vm1393_vm3, %v1373_v17 }
  0xea   : > { %991 = vst.msk [vmem:[#allocation3 + $0x38] sm:$0xff] %vm921_vm0, %v987_v19 }
  0xeb   : > { %v902_v28 = vmax.f32 %v824_v23, 0.0  ;;  %v767_v29 = vadd.f32 %v766_v25, %v633_v24  ;;  %731 = vmatmul.bf16.gmra.mxu2 %v1670_v15  ;;  %929 = vst.msk [vmem:[#allocation2 + $0x38] sm:$0xff] %vm921_vm0, %v878_v20 }
  0xec   : > { %v1056_v31 = vld [vmem:[#allocation2 + $0xf0] sm:$0xff]  ;;  %805 = vmatmul.bf16.gmra.mxu1 %v1578_v22 }
  0xed   : > { %1060 = vst.msk [vmem:[#allocation3 + $0x120] sm:$0xff] %vm921_vm0, %v1056_v31  ;;  %v879_v32 = vmax.f32 %v767_v29, 0.0 }
  0xee   : > { %953 = vst.msk [vmem:[#allocation2 + $0xf8] sm:$0xff] %vm921_vm0, %v902_v28  ;;  %v692_v27 = vpop.f32.mrf.mxu2 }
  0xef   : > { %930 = vst.msk [vmem:[#allocation2 + $0x40] sm:$0xff] %vm921_vm0, %v879_v32  ;;  %v693_v34 = vadd.f32 %v1994_v48, %v692_v27  ;;  %v831_v35 = vpop.f32.mrf.mxu3  ;;  %v1158_v36 = vld [vmem:[#allocation3 + $0x118] ss:$2 sm:$0x3] }
  0xf0   : > { %v1238_v37 = vld [vmem:[#allocation3 + $0x119] ss:$2 sm:$0x3]  ;;  %v634_v38 = vpop.f32.mrf.mxu0 }
  0xf1   : > { %v1294_v39 = vmax.f32 %v1158_v36, %v1238_v37  ;;  %v827_v40 = vadd.f32 %v2067_v49, %v693_v34  ;;  %v635_v41 = vadd.f32 %v1994_v48, %v634_v38  ;;  %v768_v42 = vpop.f32.mrf.mxu1  ;;  %v1120_v11 = vld [vmem:[#allocation3 + $0x30] ss:$2 sm:$0xff]  ;;  %v1200_v14 = vld [vmem:[#allocation3 + $0x31] ss:$2 sm:$0xff] }
  0xf2   : > { %v988_v45 = vld [vmem:[#allocation2 + $0x38] sm:$0xf]  ;;  %v1275_v21 = vmax.f32 %v1120_v11, %v1200_v14 }
  0xf3   : > { %v1346_v44 = vsel %vm1314_vm2, %v1294_v39, -inf  ;;  %v903_v46 = vmax.f32 %v827_v40, 0.0  ;;  %v769_v47 = vadd.f32 %v768_v42, %v635_v41  ;;  %992 = vst.msk [vmem:[#allocation3 + $0x40] sm:$0xf] %vm977_vm1, %v988_v45 }
  0xf4   : > { %v1347_v50 = vmax.f32 %v1345_v43, %v1346_v44  ;;  %v1318_v36 = vsel %vm921_vm0, %v1275_v21, -inf }
  0xf5   : > { %v1057_v51 = vld [vmem:[#allocation2 + $0xf8] sm:$0xff]  ;;  %954 = vst.msk [vmem:[#allocation2 + $0x100] sm:$0xff] %vm921_vm0, %v903_v46  ;;  %v880_v52 = vmax.f32 %v769_v47, 0.0 }
  0xf6   : > { %v1383_v53 = vpack.c.bf16 %v1347_v50, %v1347_v50  ;;  %1061 = vst.msk [vmem:[#allocation3 + $0x128] sm:$0xff] %vm921_vm0, %v1057_v51  ;;  %v993_v49 = vld [vmem:[#allocation2 + $0x3c] sm:$0xff]  ;;  %v694_v54 = vpop.f32.mrf.mxu2 }
  0xf7   : > { %997 = vst.msk [vmem:[#allocation3 + $0x48] sm:$0xff] %vm921_vm0, %v993_v49  ;;  %v695_v55 = vadd.f32 %v1994_v48, %v694_v54  ;;  %v833_v56 = vpop.f32.mrf.mxu3 }
  0xf8   : > { %1404 = vst.msk [vmem:[%s2083_s29 + $0x2c] sm:$0x1] %vm1393_vm3, %v1383_v53  ;;  %v637_v57 = vpop.f32.mrf.mxu0 }
  0xf9   : > { %931 = vst.msk [vmem:[#allocation2 + $0x48] sm:$0xff] %vm921_vm0, %v880_v52  ;;  %v829_v58 = vadd.f32 %v828_v16, %v695_v55  ;;  %v638_v59 = vadd.f32 %v1994_v48, %v637_v57  ;;  %v771_v60 = vpop.f32.mrf.mxu1 }
  0xfa   : > { %v1122_v15 = vld [vmem:[#allocation3 + $0x40] ss:$2 sm:$0x3]  ;;  %v1202_v16 = vld [vmem:[#allocation3 + $0x41] ss:$2 sm:$0x3] }
  0xfb   : > { %v772_v61 = vadd.f32 %v771_v60, %v638_v59  ;;  %v904_v63 = vmax.f32 %v829_v58, 0.0  ;;  %v1276_v25 = vmax.f32 %v1122_v15, %v1202_v16 }
  0xfc   : > { %v1058_v62 = vld [vmem:[#allocation2 + $0x100] sm:$0xf] }
  0xfd   : > { %1062 = vst.msk [vmem:[#allocation3 + $0x130] sm:$0xf] %vm977_vm1, %v1058_v62  ;;  %v881_v0 = vmax.f32 %v772_v61, 0.0  ;;  %v1321_v39 = vsel %vm1314_vm2, %v1276_v25, -inf  ;;  %v1160_v51 = vld [vmem:[#allocation3 + $0x120] ss:$2 sm:$0xff] }
  0xfe   : > { %955 = vst.msk [vmem:[#allocation2 + $0x108] sm:$0xff] %vm921_vm0, %v904_v63  ;;  %v697_v1 = vpop.f32.mrf.mxu2  ;;  %v1240_v52 = vld [vmem:[#allocation3 + $0x121] ss:$2 sm:$0xff] }
  0xff   : > { %v698_v3 = vadd.f32 %v1994_v48, %v697_v1  ;;  %v2119_v4 = vpop.f32.mrf.mxu3  ;;  %932 = vst.msk [vmem:[#allocation2 + $0x50] sm:$0xff] %vm921_vm0, %v881_v0  ;;  %v1295_v62 = vmax.f32 %v1160_v51, %v1240_v52 }
 0x100   : > { %v994_v6 = vld [vmem:[#allocation2 + $0x44] sm:$0xff]  ;;  %v995_v7 = vld [vmem:[#allocation2 + $0x4c] sm:$0xf]  ;;  %v639_v5 = vpop.f32.mrf.mxu0 }
 0x101   : > { %998 = vst.msk [vmem:[#allocation3 + $0x50] sm:$0xff] %vm921_vm0, %v994_v6  ;;  %v832_v8 = vadd.f32 %v831_v35, %v698_v3  ;;  %v640_v9 = vadd.f32 %v1994_v48, %v639_v5  ;;  %v773_v10 = vpop.f32.mrf.mxu1  ;;  %v1348_v11 = vsel %vm921_vm0, %v1295_v62, -inf }
 0x102   : > { %999 = vst.msk [vmem:[#allocation3 + $0x58] sm:$0xf] %vm977_vm1, %v995_v7 }
 0x103   : > { %v905_v12 = vmax.f32 %v832_v8, 0.0  ;;  %v774_v13 = vadd.f32 %v773_v10, %v640_v9 }
 0x104   : > { %v1242_v58 = vld [vmem:[#allocation3 + $0x131] ss:$2 sm:$0x3] }
 0x105   : > { %v1063_v17 = vld [vmem:[#allocation2 + $0x104] sm:$0xff]  ;;  %956 = vst.msk [vmem:[#allocation2 + $0x110] sm:$0xff] %vm921_vm0, %v905_v12  ;;  %v882_v19 = vmax.f32 %v774_v13, 0.0 }
 0x106   : > { %1067 = vst.msk [vmem:[#allocation3 + $0x138] sm:$0xff] %vm921_vm0, %v1063_v17  ;;  %v699_v20 = vpop.f32.mrf.mxu2  ;;  %v1000_v22 = vld [vmem:[#allocation2 + $0x50] sm:$0xff] }
 0x107   : > { %933 = vst.msk [vmem:[#allocation2 + $0x58] sm:$0xff] %vm921_vm0, %v882_v19  ;;  %v700_v23 = vadd.f32 %v1994_v48, %v699_v20  ;;  %v2129_v24 = vpop.f32.mrf.mxu3 }
 0x108   : > { %v1124_v26 = vld [vmem:[#allocation3 + $0x48] ss:$2 sm:$0xff]  ;;  %v1204_v28 = vld [vmem:[#allocation3 + $0x49] ss:$2 sm:$0xff]  ;;  %1004 = vst.msk [vmem:[#allocation3 + $0x60] sm:$0xff] %vm921_vm0, %v1000_v22  ;;  %v642_v29 = vpop.f32.mrf.mxu0 }
 0x109   : > { %v1126_v30 = vld [vmem:[#allocation3 + $0x58] ss:$2 sm:$0x3]  ;;  %v1206_v31 = vld [vmem:[#allocation3 + $0x59] ss:$2 sm:$0x3]  ;;  %v1277_v32 = vmax.f32 %v1124_v26, %v1204_v28  ;;  %v643_v27 = vadd.f32 %v1994_v48, %v642_v29  ;;  %v776_v33 = vpop.f32.mrf.mxu1  ;;  %v834_v35 = vadd.f32 %v833_v56, %v700_v23 }
 0x10a   : > { %v1278_v34 = vmax.f32 %v1126_v30, %v1206_v31  ;;  %v1162_v56 = vld [vmem:[#allocation3 + $0x130] ss:$2 sm:$0x3] }
 0x10b   : > { %v1319_v37 = vsel %vm921_vm0, %v1277_v32, -inf  ;;  %v777_v38 = vadd.f32 %v776_v33, %v643_v27  ;;  %v906_v47 = vmax.f32 %v834_v35, 0.0  ;;  %v1296_v1 = vmax.f32 %v1162_v56, %v1242_v58 }
 0x10c   : > { %v1320_v40 = vmax.f32 %v1318_v36, %v1319_v37  ;;  %v1322_v41 = vsel %vm1314_vm2, %v1278_v34, -inf  ;;  %v1064_v42 = vld [vmem:[#allocation2 + $0x10c] sm:$0xff]  ;;  %v1065_v43 = vld [vmem:[#allocation2 + $0x114] sm:$0xf] }
 0x10d   : > { %v1323_v44 = vmax.f32 %v1321_v39, %v1322_v41  ;;  %1068 = vst.msk [vmem:[#allocation3 + $0x140] sm:$0xff] %vm921_vm0, %v1064_v42  ;;  %v883_v49 = vmax.f32 %v777_v38, 0.0  ;;  %v1351_v15 = vsel %vm1314_vm2, %v1296_v1, -inf }
 0x10e   : > { %v1374_v45 = vpack.c.bf16 %v1320_v40, %v1320_v40  ;;  %1069 = vst.msk [vmem:[#allocation3 + $0x148] sm:$0xf] %vm977_vm1, %v1065_v43  ;;  %v1001_v46 = vld [vmem:[#allocation2 + $0x58] sm:$0xff]  ;;  %v702_v50 = vpop.f32.mrf.mxu2 }
 0x10f   : > { %v1375_v53 = vpack.c.bf16 %v1323_v44, %v1323_v44  ;;  %1005 = vst.msk [vmem:[#allocation3 + $0x68] sm:$0xff] %vm921_vm0, %v1001_v46  ;;  %v703_v54 = vadd.f32 %v1994_v48, %v702_v50  ;;  %v841_v55 = vpop.f32.mrf.mxu3 }
 0x110   : > { %1395 = vst.msk [vmem:[%s2083_s29 + $0x8] sm:$0xf] %vm977_vm1, %v1374_v45  ;;  %v644_v57 = vpop.f32.mrf.mxu0 }
 0x111   : > { %1396 = vst.msk [vmem:[%s2083_s29 + $0xc] sm:$0x1] %vm1393_vm3, %v1375_v53  ;;  %v837_v59 = vadd.f32 %v2119_v4, %v703_v54  ;;  %v645_v60 = vadd.f32 %v1994_v48, %v644_v57  ;;  %v778_v61 = vpop.f32.mrf.mxu1 }
 0x112   : > { %957 = vst.msk [vmem:[#allocation2 + $0x118] sm:$0xff] %vm921_vm0, %v906_v47 }
 0x113   : > { %934 = vst.msk [vmem:[#allocation2 + $0x60] sm:$0xff] %vm921_vm0, %v883_v49  ;;  %v907_v63 = vmax.f32 %v837_v59, 0.0  ;;  %v779_v0 = vadd.f32 %v778_v61, %v645_v60 }
 0x114   : > { %v1164_v3 = vld [vmem:[#allocation3 + $0x138] ss:$2 sm:$0xff]  ;;  %v1244_v6 = vld [vmem:[#allocation3 + $0x139] ss:$2 sm:$0xff] }
 0x115   : > { %v1166_v7 = vld [vmem:[#allocation3 + $0x148] ss:$2 sm:$0x3]  ;;  %v1246_v5 = vld [vmem:[#allocation3 + $0x149] ss:$2 sm:$0x3]  ;;  %v1297_v8 = vmax.f32 %v1164_v3, %v1244_v6 }
 0x116   : > { %v1298_v9 = vmax.f32 %v1166_v7, %v1246_v5  ;;  %958 = vst.msk [vmem:[#allocation2 + $0x120] sm:$0xff] %vm921_vm0, %v907_v63  ;;  %v884_v4 = vmax.f32 %v779_v0, 0.0  ;;  %v704_v10 = vpop.f32.mrf.mxu2  ;;  %v1128_v56 = vld [vmem:[#allocation3 + $0x60] ss:$2 sm:$0xff]  ;;  %v1208_v57 = vld [vmem:[#allocation3 + $0x61] ss:$2 sm:$0xff] }
 0x117   : > { %v1349_v12 = vsel %vm921_vm0, %v1297_v8, -inf  ;;  %v705_v13 = vadd.f32 %v1994_v48, %v704_v10  ;;  %v843_v14 = vpop.f32.mrf.mxu3  ;;  %v1279_v63 = vmax.f32 %v1128_v56, %v1208_v57 }
 0x118   : > { %v1350_v16 = vmax.f32 %v1348_v11, %v1349_v12  ;;  %v1352_v17 = vsel %vm1314_vm2, %v1298_v9, -inf  ;;  %935 = vst.msk [vmem:[#allocation2 + $0x68] sm:$0xff] %vm921_vm0, %v884_v4  ;;  %v647_v19 = vpop.f32.mrf.mxu0 }
 0x119   : > { %v1353_v20 = vmax.f32 %v1351_v15, %v1352_v17  ;;  %v1070_v21 = vld [vmem:[#allocation2 + $0x118] sm:$0xff]  ;;  %v839_v22 = vadd.f32 %v2129_v24, %v705_v13  ;;  %v648_v23 = vadd.f32 %v1994_v48, %v647_v19  ;;  %v781_v25 = vpop.f32.mrf.mxu1 }
 0x11a   : > { %v1384_v26 = vpack.c.bf16 %v1350_v16, %v1350_v16  ;;  %1074 = vst.msk [vmem:[#allocation3 + $0x150] sm:$0xff] %vm921_vm0, %v1070_v21  ;;  %v1002_v28 = vld [vmem:[#allocation2 + $0x60] sm:$0xf] }
 0x11b   : > { %v1385_v29 = vpack.c.bf16 %v1353_v20, %v1353_v20  ;;  %1006 = vst.msk [vmem:[#allocation3 + $0x70] sm:$0xf] %vm977_vm1, %v1002_v28  ;;  %v908_v30 = vmax.f32 %v839_v22, 0.0  ;;  %v782_v31 = vadd.f32 %v781_v25, %v648_v23 }
 0x11c   : > { %1405 = vst.msk [vmem:[%s2083_s29 + $0x30] sm:$0xf] %vm977_vm1, %v1384_v26 }
 0x11d   : > { %1406 = vst.msk [vmem:[%s2083_s29 + $0x34] sm:$0x1] %vm1393_vm3, %v1385_v29  ;;  %v1071_v32 = vld [vmem:[#allocation2 + $0x120] sm:$0xff]  ;;  %v885_v27 = vmax.f32 %v782_v31, 0.0 }
 0x11e   : > { %1075 = vst.msk [vmem:[#allocation3 + $0x158] sm:$0xff] %vm921_vm0, %v1071_v32  ;;  %v707_v24 = vpop.f32.mrf.mxu2 }
 0x11f   : > { %v1007_v33 = vld [vmem:[#allocation2 + $0x64] sm:$0xff]  ;;  %959 = vst.msk [vmem:[#allocation2 + $0x128] sm:$0xff] %vm921_vm0, %v908_v30  ;;  %v708_v34 = vadd.f32 %v1994_v48, %v707_v24  ;;  %v846_v35 = vpop.f32.mrf.mxu3 }
 0x120   : > { %1011 = vst.msk [vmem:[#allocation3 + $0x78] sm:$0xff] %vm921_vm0, %v1007_v33  ;;  %v649_v36 = vpop.f32.mrf.mxu0 }
 0x121   : > { %936 = vst.msk [vmem:[#allocation2 + $0x70] sm:$0xff] %vm921_vm0, %v885_v27  ;;  %v842_v37 = vadd.f32 %v841_v55, %v708_v34  ;;  %v650_v38 = vadd.f32 %v1994_v48, %v649_v36  ;;  %v783_v39 = vpop.f32.mrf.mxu1 }
 0x122   : > { %v1130_v60 = vld [vmem:[#allocation3 + $0x70] ss:$2 sm:$0x3]  ;;  %v1210_v61 = vld [vmem:[#allocation3 + $0x71] ss:$2 sm:$0x3] }
 0x123   : > { %v909_v40 = vmax.f32 %v842_v37, 0.0  ;;  %v784_v41 = vadd.f32 %v783_v39, %v650_v38  ;;  %v1280_v5 = vmax.f32 %v1130_v60, %v1210_v61 }
 0x125   : > { %960 = vst.msk [vmem:[#allocation2 + $0x130] sm:$0xff] %vm921_vm0, %v909_v40  ;;  %v886_v43 = vmax.f32 %v784_v41, 0.0  ;;  %v1327_v21 = vsel %vm1314_vm2, %v1280_v5, -inf  ;;  %v1168_v30 = vld [vmem:[#allocation3 + $0x150] ss:$2 sm:$0xff] }
 0x126   : > { %v1072_v42 = vld [vmem:[#allocation2 + $0x128] sm:$0xf]  ;;  %v709_v44 = vpop.f32.mrf.mxu2 }
 0x127   : > { %1076 = vst.msk [vmem:[#allocation3 + $0x160] sm:$0xf] %vm977_vm1, %v1072_v42  ;;  %v710_v45 = vadd.f32 %v1994_v48, %v709_v44  ;;  %v848_v51 = vpop.f32.mrf.mxu3  ;;  %v1248_v32 = vld [vmem:[#allocation3 + $0x151] ss:$2 sm:$0xff] }
 0x128   : > { %v1008_v46 = vld [vmem:[#allocation2 + $0x6c] sm:$0xff]  ;;  %v1009_v47 = vld [vmem:[#allocation2 + $0x74] sm:$0xf]  ;;  %937 = vst.msk [vmem:[#allocation2 + $0x78] sm:$0xff] %vm921_vm0, %v886_v43  ;;  %v652_v50 = vpop.f32.mrf.mxu0  ;;  %v1299_v38 = vmax.f32 %v1168_v30, %v1248_v32 }
 0x129   : > { %1012 = vst.msk [vmem:[#allocation3 + $0x80] sm:$0xff] %vm921_vm0, %v1008_v46  ;;  %v844_v52 = vadd.f32 %v843_v14, %v710_v45  ;;  %v653_v53 = vadd.f32 %v1994_v48, %v652_v50  ;;  %v786_v49 = vpop.f32.mrf.mxu1  ;;  %v1324_v14 = vsel %vm921_vm0, %v1279_v63, -inf }
 0x12a   : > { %1013 = vst.msk [vmem:[#allocation3 + $0x88] sm:$0xf] %vm977_vm1, %v1009_v47 }
 0x12b   : > { %v910_v54 = vmax.f32 %v844_v52, 0.0  ;;  %v787_v55 = vadd.f32 %v786_v49, %v653_v53 }
 0x12c   : > { %v1077_v58 = vld [vmem:[#allocation2 + $0x12c] sm:$0xff] }
 0x12d   : > { %1081 = vst.msk [vmem:[#allocation3 + $0x168] sm:$0xff] %vm921_vm0, %v1077_v58  ;;  %v887_v59 = vmax.f32 %v787_v55, 0.0 }
 0x12e   : > { %v712_v62 = vpop.f32.mrf.mxu2  ;;  %961 = vst.msk [vmem:[#allocation2 + $0x138] sm:$0xff] %vm921_vm0, %v910_v54  ;;  %v1170_v39 = vld [vmem:[#allocation3 + $0x160] ss:$2 sm:$0x3] }
 0x12f   : > { %v1014_v0 = vld [vmem:[#allocation2 + $0x78] sm:$0xff]  ;;  %v713_v1 = vadd.f32 %v1994_v48, %v712_v62  ;;  %938 = vst.msk [vmem:[#allocation2 + $0x80] sm:$0xff] %vm921_vm0, %v887_v59  ;;  %v851_v13 = vpop.f32.mrf.mxu3  ;;  %v1250_v42 = vld [vmem:[#allocation3 + $0x161] ss:$2 sm:$0x3] }
 0x130   : > { %v1132_v3 = vld [vmem:[#allocation3 + $0x78] ss:$2 sm:$0xff]  ;;  %v1212_v6 = vld [vmem:[#allocation3 + $0x79] ss:$2 sm:$0xff]  ;;  %1018 = vst.msk [vmem:[#allocation3 + $0x90] sm:$0xff] %vm921_vm0, %v1014_v0  ;;  %v654_v7 = vpop.f32.mrf.mxu0  ;;  %v1300_v52 = vmax.f32 %v1170_v39, %v1250_v42 }
 0x131   : > { %v1134_v8 = vld [vmem:[#allocation3 + $0x88] ss:$2 sm:$0x3]  ;;  %v1281_v9 = vmax.f32 %v1132_v3, %v1212_v6  ;;  %v847_v4 = vadd.f32 %v846_v35, %v713_v1  ;;  %v655_v10 = vadd.f32 %v1994_v48, %v654_v7  ;;  %v788_v11 = vpop.f32.mrf.mxu1  ;;  %v1214_v12 = vld [vmem:[#allocation3 + $0x89] ss:$2 sm:$0x3] }
 0x132   : > { %v1282_v15 = vmax.f32 %v1134_v8, %v1214_v12  ;;  %v1357_v63 = vsel %vm1314_vm2, %v1300_v52, -inf }
 0x133   : > { %v1325_v16 = vsel %vm921_vm0, %v1281_v9, -inf  ;;  %v911_v17 = vmax.f32 %v847_v4, 0.0  ;;  %v789_v20 = vadd.f32 %v788_v11, %v655_v10 }
 0x134   : > { %v1326_v19 = vmax.f32 %v1324_v14, %v1325_v16  ;;  %v1328_v22 = vsel %vm1314_vm2, %v1282_v15, -inf }
 0x135   : > { %962 = vst.msk [vmem:[#allocation2 + $0x140] sm:$0xff] %vm921_vm0, %v911_v17  ;;  %v1329_v23 = vmax.f32 %v1327_v21, %v1328_v22  ;;  %v1078_v26 = vld [vmem:[#allocation2 + $0x134] sm:$0xff]  ;;  %v1079_v28 = vld [vmem:[#allocation2 + $0x13c] sm:$0xf]  ;;  %v888_v33 = vmax.f32 %v789_v20, 0.0 }
 0x136   : > { %v1376_v25 = vpack.c.bf16 %v1326_v19, %v1326_v19  ;;  %v714_v29 = vpop.f32.mrf.mxu2  ;;  %1082 = vst.msk [vmem:[#allocation3 + $0x170] sm:$0xff] %vm921_vm0, %v1078_v26  ;;  %v1015_v24 = vld [vmem:[#allocation2 + $0x80] sm:$0xff] }
 0x137   : > { %v715_v31 = vadd.f32 %v1994_v48, %v714_v29  ;;  %v1377_v27 = vpack.c.bf16 %v1329_v23, %v1329_v23  ;;  %1083 = vst.msk [vmem:[#allocation3 + $0x178] sm:$0xf] %vm977_vm1, %v1079_v28  ;;  %v853_v44 = vpop.f32.mrf.mxu3 }
 0x138   : > { %1397 = vst.msk [vmem:[%s2083_s29 + $0x10] sm:$0xf] %vm977_vm1, %v1376_v25  ;;  %v657_v34 = vpop.f32.mrf.mxu0  ;;  %v2224_v25 = vld [vmem:[%s2309_s2] ss:$0 sm:$0xff] }
 0x139   : > { %v849_v35 = vadd.f32 %v848_v51, %v715_v31  ;;  %v658_v36 = vadd.f32 %v1994_v48, %v657_v34  ;;  %v791_v37 = vpop.f32.mrf.mxu1  ;;  %1398 = vst.msk [vmem:[%s2083_s29 + $0x14] sm:$0x1] %vm1393_vm3, %v1377_v27  ;;  %v1354_v51 = vsel %vm921_vm0, %v1299_v38, -inf }
 0x13a   : > { %1019 = vst.msk [vmem:[#allocation3 + $0x98] sm:$0xff] %vm921_vm0, %v1015_v24 }
 0x13b   : > { %v912_v40 = vmax.f32 %v849_v35, 0.0  ;;  %v792_v41 = vadd.f32 %v791_v37, %v658_v36  ;;  %939 = vst.msk [vmem:[#allocation2 + $0x88] sm:$0xff] %vm921_vm0, %v888_v33 }
 0x13c   : > { %v1084_v43 = vld [vmem:[#allocation2 + $0x140] sm:$0xff] }
 0x13d   : > { %1088 = vst.msk [vmem:[#allocation3 + $0x180] sm:$0xff] %vm921_vm0, %v1084_v43  ;;  %v889_v45 = vmax.f32 %v792_v41, 0.0  ;;  %v1172_v46 = vld [vmem:[#allocation3 + $0x168] ss:$2 sm:$0xff]  ;;  %v1252_v47 = vld [vmem:[#allocation3 + $0x169] ss:$2 sm:$0xff] }
 0x13e   : > { %963 = vst.msk [vmem:[#allocation2 + $0x148] sm:$0xff] %vm921_vm0, %v912_v40  ;;  %v717_v50 = vpop.f32.mrf.mxu2  ;;  %v1301_v53 = vmax.f32 %v1172_v46, %v1252_v47  ;;  %v1174_v54 = vld [vmem:[#allocation3 + $0x178] ss:$2 sm:$0x3] }
 0x13f   : > { %940 = vst.msk [vmem:[#allocation2 + $0x90] sm:$0xff] %vm921_vm0, %v889_v45  ;;  %v718_v49 = vadd.f32 %v1994_v48, %v717_v50  ;;  %v1254_v55 = vld [vmem:[#allocation3 + $0x179] ss:$2 sm:$0x3]  ;;  %v856_v12 = vpop.f32.mrf.mxu3 }
 0x140   : > { %v659_v56 = vpop.f32.mrf.mxu0  ;;  %v1302_v57 = vmax.f32 %v1174_v54, %v1254_v55  ;;  %v1355_v58 = vsel %vm921_vm0, %v1301_v53, -inf }
 0x141   : > { %v852_v59 = vadd.f32 %v851_v13, %v718_v49  ;;  %v660_v60 = vadd.f32 %v1994_v48, %v659_v56  ;;  %v793_v61 = vpop.f32.mrf.mxu1  ;;  %v1356_v62 = vmax.f32 %v1354_v51, %v1355_v58  ;;  %v1136_v34 = vld [vmem:[#allocation3 + $0x90] ss:$2 sm:$0xff]  ;;  %v1216_v35 = vld [vmem:[#allocation3 + $0x91] ss:$2 sm:$0xff] }
 0x142   : > { %v1358_v0 = vsel %vm1314_vm2, %v1302_v57, -inf  ;;  %v1016_v1 = vld [vmem:[#allocation2 + $0x88] sm:$0xf]  ;;  %v1283_v43 = vmax.f32 %v1136_v34, %v1216_v35 }
 0x143   : > { %v913_v3 = vmax.f32 %v852_v59, 0.0  ;;  %v794_v6 = vadd.f32 %v793_v61, %v660_v60  ;;  %v1359_v7 = vmax.f32 %v1357_v63, %v1358_v0  ;;  %v1386_v5 = vpack.c.bf16 %v1356_v62, %v1356_v62  ;;  %1020 = vst.msk [vmem:[#allocation3 + $0xa0] sm:$0xf] %vm977_vm1, %v1016_v1 }
 0x144   : > { %v1330_v59 = vsel %vm921_vm0, %v1283_v43, -inf }
 0x145   : > { %v1085_v8 = vld [vmem:[#allocation2 + $0x148] sm:$0xff]  ;;  %964 = vst.msk [vmem:[#allocation2 + $0x150] sm:$0xff] %vm921_vm0, %v913_v3  ;;  %v1387_v9 = vpack.c.bf16 %v1359_v7, %v1359_v7  ;;  %v890_v10 = vmax.f32 %v794_v6, 0.0 }
 0x146   : > { %1407 = vst.msk [vmem:[%s2083_s29 + $0x38] sm:$0xf] %vm977_vm1, %v1386_v5  ;;  %v1021_v4 = vld [vmem:[#allocation2 + $0x8c] sm:$0xff]  ;;  %v719_v11 = vpop.f32.mrf.mxu2 }
 0x147   : > { %1089 = vst.msk [vmem:[#allocation3 + $0x188] sm:$0xff] %vm921_vm0, %v1085_v8  ;;  %v720_v13 = vadd.f32 %v1994_v48, %v719_v11  ;;  %v858_v28 = vpop.f32.mrf.mxu3 }
 0x148   : > { %1408 = vst.msk [vmem:[%s2083_s29 + $0x3c] sm:$0x1] %vm1393_vm3, %v1387_v9  ;;  %v662_v14 = vpop.f32.mrf.mxu0 }
 0x149   : > { %1025 = vst.msk [vmem:[#allocation3 + $0xa8] sm:$0xff] %vm921_vm0, %v1021_v4  ;;  %v854_v15 = vadd.f32 %v853_v44, %v720_v13  ;;  %v663_v16 = vadd.f32 %v1994_v48, %v662_v14  ;;  %v796_v17 = vpop.f32.mrf.mxu1 }
 0x14a   : > { %941 = vst.msk [vmem:[#allocation2 + $0x98] sm:$0xff] %vm921_vm0, %v890_v10  ;;  %v1138_v36 = vld [vmem:[#allocation3 + $0xa0] ss:$2 sm:$0x3] }
 0x14b   : > { %v797_v19 = vadd.f32 %v796_v17, %v663_v16  ;;  %v914_v21 = vmax.f32 %v854_v15, 0.0  ;;  %v1218_v39 = vld [vmem:[#allocation3 + $0xa1] ss:$2 sm:$0x3] }
 0x14c   : > { %v1086_v20 = vld [vmem:[#allocation2 + $0x150] sm:$0xf]  ;;  %v1284_v45 = vmax.f32 %v1138_v36, %v1218_v39  ;;  %v673_v36 = vadd.f32 %v2224_v25, %v2005_v2 }
 0x14d   : > { %1090 = vst.msk [vmem:[#allocation3 + $0x190] sm:$0xf] %vm977_vm1, %v1086_v20  ;;  %v891_v22 = vmax.f32 %v797_v19, 0.0 }
 0x14e   : > { %965 = vst.msk [vmem:[#allocation2 + $0x158] sm:$0xff] %vm921_vm0, %v914_v21  ;;  %v722_v23 = vpop.f32.mrf.mxu2  ;;  %v1333_v63 = vsel %vm1314_vm2, %v1284_v45, -inf  ;;  %v1176_v7 = vld [vmem:[#allocation3 + $0x180] ss:$2 sm:$0xff]  ;;  %v1256_v10 = vld [vmem:[#allocation3 + $0x181] ss:$2 sm:$0xff] }
 0x14f   : > { %942 = vst.msk [vmem:[#allocation2 + $0xa0] sm:$0xff] %vm921_vm0, %v891_v22  ;;  %v723_v48 = vadd.f32 %v2224_v25, %v722_v23  ;;  %v861_v55 = vpop.f32.mrf.mxu3  ;;  %v1303_v19 = vmax.f32 %v1176_v7, %v1256_v10 }
 0x150   : > { %v664_v26 = vpop.f32.mrf.mxu0 }
 0x151   : > { %v1022_v29 = vld [vmem:[#allocation2 + $0x94] sm:$0xff]  ;;  %v1023_v30 = vld [vmem:[#allocation2 + $0x9c] sm:$0xf]  ;;  %v857_v31 = vadd.f32 %v856_v12, %v723_v48  ;;  %v665_v32 = vadd.f32 %v2224_v25, %v664_v26  ;;  %v798_v27 = vpop.f32.mrf.mxu1 }
 0x152   : > { %1026 = vst.msk [vmem:[#allocation3 + $0xb0] sm:$0xff] %vm921_vm0, %v1022_v29 }
 0x153   : > { %1027 = vst.msk [vmem:[#allocation3 + $0xb8] sm:$0xf] %vm977_vm1, %v1023_v30  ;;  %v915_v24 = vmax.f32 %v857_v31, 0.0  ;;  %v799_v33 = vadd.f32 %v798_v27, %v665_v32 }
 0x154   : > { %v1178_v11 = vld [vmem:[#allocation3 + $0x190] ss:$2 sm:$0x3]  ;;  %v1258_v14 = vld [vmem:[#allocation3 + $0x191] ss:$2 sm:$0x3] }
 0x155   : > { %v1091_v37 = vld [vmem:[#allocation2 + $0x154] sm:$0xff]  ;;  %966 = vst.msk [vmem:[#allocation2 + $0x160] sm:$0xff] %vm921_vm0, %v915_v24  ;;  %v892_v38 = vmax.f32 %v799_v33, 0.0  ;;  %v1304_v22 = vmax.f32 %v1178_v11, %v1258_v14  ;;  %v1360_v33 = vsel %vm921_vm0, %v1303_v19, -inf }
 0x156   : > { %1095 = vst.msk [vmem:[#allocation3 + $0x198] sm:$0xff] %vm921_vm0, %v1091_v37  ;;  %v1028_v40 = vld [vmem:[#allocation2 + $0xa0] sm:$0xff]  ;;  %v724_v41 = vpop.f32.mrf.mxu2 }
 0x157   : > { %1032 = vst.msk [vmem:[#allocation3 + $0xc0] sm:$0xff] %vm921_vm0, %v1028_v40  ;;  %v725_v42 = vadd.f32 %v2224_v25, %v724_v41  ;;  %v863_v26 = vpop.f32.mrf.mxu3  ;;  %v1363_v37 = vsel %vm1314_vm2, %v1304_v22, -inf }
 0x158   : > { %943 = vst.msk [vmem:[#allocation2 + $0xa8] sm:$0xff] %vm921_vm0, %v892_v38  ;;  %v667_v44 = vpop.f32.mrf.mxu0 }
 0x159   : > { %v1140_v46 = vld [vmem:[#allocation3 + $0xa8] ss:$2 sm:$0xff]  ;;  %v1220_v47 = vld [vmem:[#allocation3 + $0xa9] ss:$2 sm:$0xff]  ;;  %v859_v50 = vadd.f32 %v858_v28, %v725_v42  ;;  %v668_v51 = vadd.f32 %v2224_v25, %v667_v44  ;;  %v801_v52 = vpop.f32.mrf.mxu1 }
 0x15a   : > { %v1142_v53 = vld [vmem:[#allocation3 + $0xb8] ss:$2 sm:$0x3]  ;;  %v1222_v49 = vld [vmem:[#allocation3 + $0xb9] ss:$2 sm:$0x3]  ;;  %v1285_v54 = vmax.f32 %v1140_v46, %v1220_v47 }
 0x15b   : > { %v1286_v56 = vmax.f32 %v1142_v53, %v1222_v49  ;;  %v916_v57 = vmax.f32 %v859_v50, 0.0  ;;  %v802_v58 = vadd.f32 %v801_v52, %v668_v51 }
 0x15c   : > { %v1331_v60 = vsel %vm921_vm0, %v1285_v54, -inf  ;;  %v1092_v61 = vld [vmem:[#allocation2 + $0x15c] sm:$0xff]  ;;  %v1093_v62 = vld [vmem:[#allocation2 + $0x164] sm:$0xf]  ;;  %v675_v54 = vadd.f32 %v2224_v25, %v2017_v18 }
 0x15d   : > { %v1332_v0 = vmax.f32 %v1330_v59, %v1331_v60  ;;  %v1334_v1 = vsel %vm1314_vm2, %v1286_v56, -inf  ;;  %1096 = vst.msk [vmem:[#allocation3 + $0x1a0] sm:$0xff] %vm921_vm0, %v1092_v61  ;;  %v893_v9 = vmax.f32 %v802_v58, 0.0 }
 0x15e   : > { %v1335_v3 = vmax.f32 %v1333_v63, %v1334_v1  ;;  %1097 = vst.msk [vmem:[#allocation3 + $0x1a8] sm:$0xf] %vm977_vm1, %v1093_v62  ;;  %v727_v6 = vpop.f32.mrf.mxu2 }
 0x15f   : > { %v1378_v5 = vpack.c.bf16 %v1332_v0, %v1332_v0  ;;  %v1029_v8 = vld [vmem:[#allocation2 + $0xa8] sm:$0xff]  ;;  %967 = vst.msk [vmem:[#allocation2 + $0x168] sm:$0xff] %vm921_vm0, %v916_v57  ;;  %v728_v4 = vadd.f32 %v2224_v25, %v727_v6  ;;  %v866_v51 = vpop.f32.mrf.mxu3 }
 0x160   : > { %v1379_v12 = vpack.c.bf16 %v1335_v3, %v1335_v3  ;;  %1033 = vst.msk [vmem:[#allocation3 + $0xc8] sm:$0xff] %vm921_vm0, %v1029_v8  ;;  %v669_v13 = vpop.f32.mrf.mxu0 }
 0x161   : > { %1399 = vst.msk [vmem:[%s2083_s29 + $0x18] sm:$0xf] %vm977_vm1, %v1378_v5  ;;  %v862_v15 = vadd.f32 %v861_v55, %v728_v4  ;;  %v670_v16 = vadd.f32 %v2224_v25, %v669_v13  ;;  %v803_v17 = vpop.f32.mrf.mxu1 }
 0x162   : > { %1400 = vst.msk [vmem:[%s2083_s29 + $0x1c] sm:$0x1] %vm1393_vm3, %v1379_v12  ;;  %v1156_v12 = vld [vmem:[#allocation3 + $0x108] ss:$2 sm:$0xff] }
 0x163   : > { %944 = vst.msk [vmem:[#allocation2 + $0xb0] sm:$0xff] %vm921_vm0, %v893_v9  ;;  %v917_v20 = vmax.f32 %v862_v15, 0.0  ;;  %v804_v21 = vadd.f32 %v803_v17, %v670_v16  ;;  %v1236_v16 = vld [vmem:[#allocation3 + $0x109] ss:$2 sm:$0xff] }
 0x164   : > { %v1180_v23 = vld [vmem:[#allocation3 + $0x198] ss:$2 sm:$0xff]  ;;  %v1260_v48 = vld [vmem:[#allocation3 + $0x199] ss:$2 sm:$0xff] }
 0x165   : > { %v1182_v28 = vld [vmem:[#allocation3 + $0x1a8] ss:$2 sm:$0x3]  ;;  %v1262_v29 = vld [vmem:[#allocation3 + $0x1a9] ss:$2 sm:$0x3]  ;;  %v1305_v30 = vmax.f32 %v1180_v23, %v1260_v48  ;;  %v1293_v23 = vmax.f32 %v1156_v12, %v1236_v16 }
 0x166   : > { %v1306_v31 = vmax.f32 %v1182_v28, %v1262_v29  ;;  %v1098_v32 = vld [vmem:[#allocation2 + $0x168] sm:$0xff]  ;;  %968 = vst.msk [vmem:[#allocation2 + $0x170] sm:$0xff] %vm921_vm0, %v917_v20  ;;  %v894_v27 = vmax.f32 %v804_v21, 0.0  ;;  %v729_v24 = vpop.f32.mrf.mxu2 }
 0x167   : > { %v1361_v34 = vsel %vm921_vm0, %v1305_v30, -inf  ;;  %1102 = vst.msk [vmem:[#allocation3 + $0x1b0] sm:$0xff] %vm921_vm0, %v1098_v32  ;;  %v730_v35 = vadd.f32 %v2224_v25, %v729_v24  ;;  %v868_v0 = vpop.f32.mrf.mxu3  ;;  %v1144_v3 = vld [vmem:[#allocation3 + $0xc0] ss:$2 sm:$0xff]  ;;  %v1224_v6 = vld [vmem:[#allocation3 + $0xc1] ss:$2 sm:$0xff] }
 0x168   : > { %v1362_v38 = vmax.f32 %v1360_v33, %v1361_v34  ;;  %v1364_v39 = vsel %vm1314_vm2, %v1306_v31, -inf  ;;  %945 = vst.msk [vmem:[#allocation2 + $0xb8] sm:$0xff] %vm921_vm0, %v894_v27  ;;  %v1287_v10 = vmax.f32 %v1144_v3, %v1224_v6 }
 0x169   : > { %v1365_v40 = vmax.f32 %v1363_v37, %v1364_v39  ;;  %v864_v41 = vadd.f32 %v863_v26, %v730_v35  ;;  %v806_v42 = vpop.f32.mrf.mxu1  ;;  %v1343_v35 = vsel %vm921_vm0, %v1293_v23, -inf }
 0x16a   : > { %v1388_v43 = vpack.c.bf16 %v1362_v38, %v1362_v38  ;;  %v1030_v44 = vld [vmem:[#allocation2 + $0xb0] sm:$0xf]  ;;  %v807_v45 = vadd.f32 %v806_v42, %v673_v36  ;;  %v1336_v19 = vsel %vm921_vm0, %v1287_v10, -inf }
 0x16b   : > { %v1389_v46 = vpack.c.bf16 %v1365_v40, %v1365_v40  ;;  %1034 = vst.msk [vmem:[#allocation3 + $0xd0] sm:$0xf] %vm977_vm1, %v1030_v44  ;;  %v918_v47 = vmax.f32 %v864_v41, 0.0 }
 0x16c   : > { %1409 = vst.msk [vmem:[%s2083_s29 + $0x40] sm:$0xf] %vm977_vm1, %v1388_v43  ;;  %v895_v50 = vmax.f32 %v807_v45, 0.0 }
 0x16d   : > { %1410 = vst.msk [vmem:[%s2083_s29 + $0x44] sm:$0x1] %vm1393_vm3, %v1389_v46  ;;  %v1099_v2 = vld [vmem:[#allocation2 + $0x170] sm:$0xff] }
 0x16e   : > { %1103 = vst.msk [vmem:[#allocation3 + $0x1b8] sm:$0xff] %vm921_vm0, %v1099_v2  ;;  %v732_v52 = vpop.f32.mrf.mxu2 }
 0x16f   : > { %v1035_v53 = vld [vmem:[#allocation2 + $0xb4] sm:$0xff]  ;;  %969 = vst.msk [vmem:[#allocation2 + $0x178] sm:$0xff] %vm921_vm0, %v918_v47  ;;  %v733_v49 = vadd.f32 %v2224_v25, %v732_v52 }
 0x170   : > { %1039 = vst.msk [vmem:[#allocation3 + $0xd8] sm:$0xff] %vm921_vm0, %v1035_v53 }
 0x171   : > { %946 = vst.msk [vmem:[#allocation2 + $0xc0] sm:$0xff] %vm921_vm0, %v895_v50  ;;  %v867_v55 = vadd.f32 %v866_v51, %v733_v49  ;;  %v808_v56 = vpop.f32.mrf.mxu1 }
 0x172   : > { %v809_v57 = vadd.f32 %v808_v56, %v675_v54  ;;  %v1146_v9 = vld [vmem:[#allocation3 + $0xd0] ss:$2 sm:$0x3]  ;;  %v1226_v4 = vld [vmem:[#allocation3 + $0xd1] ss:$2 sm:$0x3] }
 0x173   : > { %v919_v58 = vmax.f32 %v867_v55, 0.0  ;;  %v1288_v13 = vmax.f32 %v1146_v9, %v1226_v4 }
 0x174   : > { %v896_v59 = vmax.f32 %v809_v57, 0.0 }
 0x175   : > { %970 = vst.msk [vmem:[#allocation2 + $0x180] sm:$0xff] %vm921_vm0, %v919_v58  ;;  %v1339_v48 = vsel %vm1314_vm2, %v1288_v13, -inf  ;;  %v1184_v37 = vld [vmem:[#allocation3 + $0x1b0] ss:$2 sm:$0xff]  ;;  %v1264_v38 = vld [vmem:[#allocation3 + $0x1b1] ss:$2 sm:$0xff] }
 0x176   : > { %v1100_v60 = vld [vmem:[#allocation2 + $0x178] sm:$0xf]  ;;  %947 = vst.msk [vmem:[#allocation2 + $0xc8] sm:$0xff] %vm921_vm0, %v896_v59  ;;  %v734_v61 = vpop.f32.mrf.mxu2  ;;  %v1307_v42 = vmax.f32 %v1184_v37, %v1264_v38 }
 0x177   : > { %1104 = vst.msk [vmem:[#allocation3 + $0x1c0] sm:$0xf] %vm977_vm1, %v1100_v60  ;;  %v735_v62 = vadd.f32 %v2224_v25, %v734_v61 }
 0x178   : > { %v1036_v18 = vld [vmem:[#allocation2 + $0xbc] sm:$0xff]  ;;  %v1037_v63 = vld [vmem:[#allocation2 + $0xc4] sm:$0xf]  ;;  %v1366_v50 = vsel %vm921_vm0, %v1307_v42, -inf }
 0x179   : > { %1040 = vst.msk [vmem:[#allocation3 + $0xe0] sm:$0xff] %vm921_vm0, %v1036_v18  ;;  %v869_v1 = vadd.f32 %v868_v0, %v735_v62 }
 0x17a   : > { %1041 = vst.msk [vmem:[#allocation3 + $0xe8] sm:$0xf] %vm977_vm1, %v1037_v63 }
 0x17b   : > { %v920_v5 = vmax.f32 %v869_v1, 0.0 }
 0x17c   : > { %v1105_v7 = vld [vmem:[#allocation2 + $0x17c] sm:$0xff] }
 0x17d   : > { %1109 = vst.msk [vmem:[#allocation3 + $0x1c8] sm:$0xff] %vm921_vm0, %v1105_v7  ;;  %v1042_v8 = vld [vmem:[#allocation2 + $0xc8] sm:$0xff] }
 0x17e   : > { %1046 = vst.msk [vmem:[#allocation3 + $0xf0] sm:$0xff] %vm921_vm0, %v1042_v8  ;;  %v1186_v40 = vld [vmem:[#allocation3 + $0x1c0] ss:$2 sm:$0x3] }
 0x17f   : > { %971 = vst.msk [vmem:[#allocation2 + $0x188] sm:$0xff] %vm921_vm0, %v920_v5  ;;  %v1266_v41 = vld [vmem:[#allocation3 + $0x1c1] ss:$2 sm:$0x3] }
 0x180   : > { %v1148_v25 = vld [vmem:[#allocation3 + $0xd8] ss:$2 sm:$0xff]  ;;  %v1228_v11 = vld [vmem:[#allocation3 + $0xd9] ss:$2 sm:$0xff]  ;;  %v1308_v45 = vmax.f32 %v1186_v40, %v1266_v41 }
 0x181   : > { %v1150_v14 = vld [vmem:[#allocation3 + $0xe8] ss:$2 sm:$0x3]  ;;  %v1289_v15 = vmax.f32 %v1148_v25, %v1228_v11  ;;  %v1230_v17 = vld [vmem:[#allocation3 + $0xe9] ss:$2 sm:$0x3] }
 0x182   : > { %v1290_v20 = vmax.f32 %v1150_v14, %v1230_v17  ;;  %v1369_v49 = vsel %vm1314_vm2, %v1308_v45, -inf }
 0x183   : > { %v1337_v21 = vsel %vm921_vm0, %v1289_v15, -inf }
 0x184   : > { %v1338_v22 = vmax.f32 %v1336_v19, %v1337_v21  ;;  %v1340_v26 = vsel %vm1314_vm2, %v1290_v20, -inf }
 0x185   : > { %v1341_v28 = vmax.f32 %v1339_v48, %v1340_v26  ;;  %v1152_v30 = vld [vmem:[#allocation3 + $0xf0] ss:$2 sm:$0xff]  ;;  %v1232_v31 = vld [vmem:[#allocation3 + $0xf1] ss:$2 sm:$0xff] }
 0x186   : > { %v1380_v29 = vpack.c.bf16 %v1338_v22, %v1338_v22  ;;  %v1291_v32 = vmax.f32 %v1152_v30, %v1232_v31  ;;  %v1106_v27 = vld [vmem:[#allocation2 + $0x184] sm:$0xff]  ;;  %v1107_v33 = vld [vmem:[#allocation2 + $0x18c] sm:$0xf] }
 0x187   : > { %v1381_v24 = vpack.c.bf16 %v1341_v28, %v1341_v28  ;;  %1110 = vst.msk [vmem:[#allocation3 + $0x1d0] sm:$0xff] %vm921_vm0, %v1106_v27 }
 0x188   : > { %1401 = vst.msk [vmem:[%s2083_s29 + $0x20] sm:$0xf] %vm977_vm1, %v1380_v29  ;;  %v1342_v34 = vsel %vm921_vm0, %v1291_v32, -inf }
 0x189   : > { %1402 = vst.msk [vmem:[%s2083_s29 + $0x24] sm:$0x1] %vm1393_vm3, %v1381_v24  ;;  %v1344_v36 = vmax.f32 %v1342_v34, %v1343_v35 }
 0x18a   : > { %1111 = vst.msk [vmem:[#allocation3 + $0x1d8] sm:$0xf] %vm977_vm1, %v1107_v33 }
 0x18b   : > { %v1382_v39 = vpack.c.bf16 %v1344_v36, %v1344_v36 }
 0x18d   : > { %1403 = vst.msk [vmem:[%s2083_s29 + $0x28] sm:$0xf] %vm977_vm1, %v1382_v39 }
 0x18e   : > { %v1188_v43 = vld [vmem:[#allocation3 + $0x1c8] ss:$2 sm:$0xff]  ;;  %v1268_v44 = vld [vmem:[#allocation3 + $0x1c9] ss:$2 sm:$0xff] }
 0x18f   : > { %v1309_v46 = vmax.f32 %v1188_v43, %v1268_v44 }
 0x191   : > { %v1190_v47 = vld [vmem:[#allocation3 + $0x1d8] ss:$2 sm:$0x3]  ;;  %v1270_v2 = vld [vmem:[#allocation3 + $0x1d9] ss:$2 sm:$0x3] }
 0x192   : > { %v1310_v51 = vmax.f32 %v1190_v47, %v1270_v2  ;;  %v1367_v52 = vsel %vm921_vm0, %v1309_v46, -inf }
 0x193   : > { %v1368_v53 = vmax.f32 %v1366_v50, %v1367_v52 }
 0x194   : > { %v1370_v54 = vsel %vm1314_vm2, %v1310_v51, -inf }
 0x195   : > { %v1371_v55 = vmax.f32 %v1369_v49, %v1370_v54  ;;  %v1390_v56 = vpack.c.bf16 %v1368_v53, %v1368_v53 }
 0x197   : > { %v1391_v57 = vpack.c.bf16 %v1371_v55, %v1371_v55  ;;  %1411 = vst.msk [vmem:[%s2083_s29 + $0x48] sm:$0xf] %vm977_vm1, %v1390_v56 }
 0x199   : > { %1412 = vst.msk [vmem:[%s2083_s29 + $0x4c] sm:$0x1] %vm1393_vm3, %v1391_v57 }
 0x19a PF: > { %s13_s12 = sadd.s32 1, %s1841_s12  }
 0x19b   : > { %p10_p4 = scmp.ge.s32.totalorder %s13_s12, 4  }
 0x19d   :  { %12 = sbr.rel (!%p10_p4) target bundleno = 1 (0x1), region = 160 }

// kernel: dqn_forward.4
= control target key start
LH: loop header
LB: loop body
LE: loop exit
PB: predicated region body
PF: predicated region fallthrough
CT: control target
= control target key end

     0   :  { %s2005_s21 = smov 0   ;;  %s2379_s0 = inlined_call_operand.vmem [shape: bf16[2,25,512], index: 0, kind: input, shape index: {}]   ;;  %s2380_s1 = inlined_call_operand.vmem [shape: bf16[512,64], index: 1, kind: input, shape index: {}]   ;;  %s2381_s2 = inlined_call_operand.vmem [shape: f32[1,64], index: 2, kind: input, shape index: {}]   ;;  %s2382_s3 = inlined_call_operand.vmem [shape: bf16[576,64], index: 3, kind: input, shape index: {}]   ;;  %s2383_s4 = inlined_call_operand.vmem [shape: f32[1,64], index: 4, kind: input, shape index: {}]   ;;  %s2384_s5 = inlined_call_operand.vmem [shape: f32[25,2], index: 5, kind: input, shape index: {}]   ;;  %s2385_s6 = inlined_call_operand.vmem [shape: bf16[2,25,64], index: 6, kind: output, shape index: {}]  }
   0x1 LB: > { %s1519_s22 = sadd.s32 4294967295, %s1966_s21   ;;  %p1523_p0 = scmp.ge.s32.totalorder %s1966_s21, 1  ;;  %s1966_s21 = sphi %s2005_s21, %s16_s21  }
   0x2   : > { %p212_p1 = scmp.lt.s32.totalorder %s1966_s21, 3 }
   0x4   : > { %p213_p2 = pnand %p1523_p0, %p212_p1 }
   0x5   : > { %p242_p3 = scmp.lt.s32.totalorder (!%p213_p2), %s1519_s22, 1 }
   0x6   : > { %216 = sbr.rel (%p213_p2) target bundleno = 442 (0x1ba), region = 44 }
   0xb   : > { %v1869_v0 = vld [vmem:[%s2380_s1 + $0x38] sm:$0xff]  ;;  %v1868_v4 = vld [vmem:[%s2380_s1 + $0x30] sm:$0xff]  ;;  %v1867_v8 = vld [vmem:[%s2380_s1 + $0x28] sm:$0xff]  ;;  %s2389_s22 = smov (!%p242_p3, %s1519_s22), 1  ;;  %vm641_vm0 = vcmask 519168   ;;  %v1968_v56 = vmov 0  }
   0xc   : > { %v1877_v1 = vld [vmem:[%s2380_s1 + $0x78] sm:$0xff]  ;;  %561 = vmatpush.bf16.msra.mxu0 %v1869_v0  ;;  %v1876_v5 = vld [vmem:[%s2380_s1 + $0x70] sm:$0xff]  ;;  %v1875_v9 = vld [vmem:[%s2380_s1 + $0x68] sm:$0xff]  ;;  %s1852_s27 = sshll.u32 %s2389_s22, 6  ;;  %642 = vst.msk [vmem:[#allocation2] sm:$0xf] %vm641_vm0, %v1968_v56  ;;  %1953 = vset.pattern.permute.xlu0 %v1968_v56 }
   0xd   : > { %v1885_v2 = vld [vmem:[%s2380_s1 + $0xb8] sm:$0xff]  ;;  %580 = vmatpush.bf16.msra.mxu1 %v1877_v1  ;;  %v1884_v6 = vld [vmem:[%s2380_s1 + $0xb0] sm:$0xff]  ;;  %v1883_v10 = vld [vmem:[%s2380_s1 + $0xa8] sm:$0xff]  ;;  %s2101_s10 = scalar_lea.vmem %s2379_s0, %s1852_s27  ;;  %1954 = vset.pattern.permute.xlu1 %v1968_v56  ;;  %646 = vst.msk [vmem:[#allocation2 + $0x10] sm:$0xf] %vm641_vm0, %v1968_v56  ;;  %vm672_vm1 = vcmask 519171  }
   0xe   : > { %v1893_v3 = vld [vmem:[%s2380_s1 + $0xf8] sm:$0xff]  ;;  %599 = vmatpush.bf16.msra.mxu2 %v1885_v2  ;;  %v1892_v7 = vld [vmem:[%s2380_s1 + $0xf0] sm:$0xff]  ;;  %v1891_v11 = vld [vmem:[%s2380_s1 + $0xe8] sm:$0xff]  ;;  %643 = vst.msk [vmem:[#allocation2 + $0x4] sm:$0xf] %vm641_vm0, %v1968_v56  ;;  %vm655_vm2 = vcmask 1042432  }
   0xf   : > { %618 = vmatpush.bf16.msra.mxu3 %v1893_v3  ;;  %v1866_v12 = vld [vmem:[%s2380_s1 + $0x20] sm:$0xff]  ;;  %v1865_v16 = vld [vmem:[%s2380_s1 + $0x18] sm:$0xff]  ;;  %v1864_v20 = vld [vmem:[%s2380_s1 + $0x10] sm:$0xff]  ;;  %644 = vst.msk [vmem:[#allocation2 + $0x8] sm:$0xf] %vm641_vm0, %v1968_v56  ;;  %vm656_vm3 = vcmask 1046532  }
  0x10   : > { %562 = vmatpush.bf16.msra.mxu0 %v1868_v4  ;;  %v1874_v13 = vld [vmem:[%s2380_s1 + $0x60] sm:$0xff]  ;;  %v1873_v17 = vld [vmem:[%s2380_s1 + $0x58] sm:$0xff]  ;;  %v1872_v21 = vld [vmem:[%s2380_s1 + $0x50] sm:$0xff]  ;;  %645 = vst.msk [vmem:[#allocation2 + $0xc] sm:$0xf] %vm641_vm0, %v1968_v56  ;;  %vm728_vm5 = vcmask 523264  }
  0x11   : > { %581 = vmatpush.bf16.msra.mxu1 %v1876_v5  ;;  %v1882_v14 = vld [vmem:[%s2380_s1 + $0xa0] sm:$0xff]  ;;  %v1881_v18 = vld [vmem:[%s2380_s1 + $0x98] sm:$0xff]  ;;  %v1880_v22 = vld [vmem:[%s2380_s1 + $0x90] sm:$0xff]  ;;  %vm677_vm6 = vsmask.f32 3328  ;;  %vm877_vm8 = vcmask 1046528  }
  0x12   : > { %600 = vmatpush.bf16.msra.mxu2 %v1884_v6  ;;  %v1890_v15 = vld [vmem:[%s2380_s1 + $0xe0] sm:$0xff]  ;;  %v1889_v19 = vld [vmem:[%s2380_s1 + $0xd8] sm:$0xff]  ;;  %v1888_v23 = vld [vmem:[%s2380_s1 + $0xd0] sm:$0xff]  ;;  %vm1061_vm9 = vcmask 1044480   ;;  %vm970_vm10 = vsmask.f32 5376 }
  0x13   : > { %619 = vmatpush.bf16.msra.mxu3 %v1892_v7  ;;  %v1863_v24 = vld [vmem:[%s2380_s1 + $0x8] sm:$0xff]  ;;  %v1862_v28 = vld [vmem:[%s2380_s1] sm:$0xff]  ;;  %v1856_v33 = vld [vmem:[%s2101_s10 + $0xc] sm:$0xf0]  ;;  %vm794_vm11 = vsmask.f32 7424 }
  0x14   : > { %563 = vmatpush.bf16.msra.mxu0 %v1867_v8  ;;  %v1871_v25 = vld [vmem:[%s2380_s1 + $0x48] sm:$0xff]  ;;  %v1870_v29 = vld [vmem:[%s2380_s1 + $0x40] sm:$0xff]  ;;  %v1532_v35 = vld [vmem:[%s2101_s10 + $0x10] sm:$0xf0]  ;;  %vm1378_vm12 = vcmask 1045504   ;;  %s1853_s19 = sshll.u32 %s2389_s22, 4 }
  0x15   : > { %582 = vmatpush.bf16.msra.mxu1 %v1875_v9  ;;  %v1879_v26 = vld [vmem:[%s2380_s1 + $0x88] sm:$0xff]  ;;  %v1878_v30 = vld [vmem:[%s2380_s1 + $0x80] sm:$0xff]  ;;  %v1857_v37 = vld [vmem:[%s2101_s10 + $0x14] sm:$0xf0]  ;;  %vm1291_vm13 = vsmask.f32 6400  ;;  %s2359_s24 = scalar_lea.vmem %s2385_s6, %s1853_s19 }
  0x16   : > { %601 = vmatpush.bf16.msra.mxu2 %v1883_v10  ;;  %v1887_v27 = vld [vmem:[%s2380_s1 + $0xc8] sm:$0xff]  ;;  %v1886_v31 = vld [vmem:[%s2380_s1 + $0xc0] sm:$0xff]  ;;  %v1540_v39 = vld [vmem:[%s2101_s10 + $0x18] sm:$0xf0]  ;;  %vm1126_vm14 = vsmask.f32 4352 }
  0x17   : > { %620 = vmatpush.bf16.msra.mxu3 %v1891_v11  ;;  %v1530_v32 = vld [vmem:[%s2101_s10] sm:$0xf]  ;;  %v1854_v34 = vld [vmem:[%s2101_s10 + $0x4] sm:$0xf]  ;;  %v1538_v36 = vld [vmem:[%s2101_s10 + $0x8] sm:$0xf] }
  0x18   : > { %564 = vmatpush.bf16.msra.mxu0 %v1866_v12  ;;  %v1855_v38 = vld [vmem:[%s2101_s10 + $0xc] sm:$0xf]  ;;  %v1531_v40 = vor.u32 %v1856_v33, %v1530_v32  ;;  %v1535_v41 = vor.u32 %v1854_v34, %v1532_v35  ;;  %v1539_v42 = vor.u32 %v1857_v37, %v1538_v36  ;;  %v1546_v44 = vld [vmem:[%s2101_s10 + $0x20] sm:$0xf]  ;;  %v1860_v45 = vld [vmem:[%s2101_s10 + $0x2c] sm:$0x10] }
  0x19   : > { %583 = vmatpush.bf16.msra.mxu1 %v1874_v13  ;;  %v1543_v43 = vor.u32 %v1855_v38, %v1540_v39  ;;  %v1858_v46 = vld [vmem:[%s2101_s10 + $0x24] sm:$0xf]  ;;  %v1548_v47 = vld [vmem:[%s2101_s10 + $0x30] sm:$0x10]  ;;  %v1554_v48 = vld [vmem:[%s2101_s10 + $0x28] sm:$0xf]  ;;  %v1547_v52 = vor.u32 %v1860_v45, %v1546_v44 }
  0x1a   : > { %602 = vmatpush.bf16.msra.mxu2 %v1882_v14  ;;  %v1861_v49 = vld [vmem:[%s2101_s10 + $0x34] sm:$0x10]  ;;  %v1859_v50 = vld [vmem:[%s2101_s10 + $0x2c] sm:$0xf]  ;;  %v1556_v51 = vld [vmem:[%s2101_s10 + $0x38] sm:$0x10]  ;;  %v1551_v53 = vor.u32 %v1858_v46, %v1548_v47 }
  0x1b   : > { %621 = vmatpush.bf16.msra.mxu3 %v1890_v15  ;;  %v1555_v54 = vor.u32 %v1861_v49, %v1554_v48  ;;  %v1559_v55 = vor.u32 %v1859_v50, %v1556_v51  ;;  %v1897_v57 = vld [vmem:[%s2382_s3 + $0x18] sm:$0xff]  ;;  %v1896_v58 = vld [vmem:[%s2382_s3 + $0x10] sm:$0xff]  ;;  %v1895_v59 = vld [vmem:[%s2382_s3 + $0x8] sm:$0xff]  ;;  %vm1458_vm15 = vcmask 516096  }
  0x1c   : > { %565 = vmatpush.bf16.msra.mxu0 %v1865_v16  ;;  %v2154_v60 = vld [vmem:[%s2381_s2] ss:$0 sm:$0xff]  ;;  %v2163_v2 = vld [vmem:[%s2384_s5 + $0x18] sm:$0x1]  ;;  %v1904_v15 = vld [vmem:[%s2382_s3 + $0x50] sm:$0xff] }
  0x1d   : > { %584 = vmatpush.bf16.msra.mxu1 %v1873_v17  ;;  %v1894_v61 = vld [vmem:[%s2382_s3] sm:$0xff]  ;;  %775 = vperm.xlu0 %1953, %v2163_v2   ;;  %v1905_v10 = vld [vmem:[%s2382_s3 + $0x58] sm:$0xff]  ;;  %v1912_v16 = vld [vmem:[%s2382_s3 + $0x90] sm:$0xff] }
  0x1e   : > { %603 = vmatpush.bf16.msra.mxu2 %v1881_v18  ;;  %v1913_v11 = vld [vmem:[%s2382_s3 + $0x98] sm:$0xff]  ;;  %v2179_v14 = vld [vmem:[%s2384_s5] sm:$0xff]  ;;  %vm2204_vm4 = vmor %vm655_vm2, %vm656_vm3 }
  0x1f   : > { %622 = vmatpush.bf16.msra.mxu3 %v1889_v19  ;;  %v1909_v13 = vld [vmem:[%s2382_s3 + $0x78] sm:$0xff]  ;;  %v1908_v19 = vld [vmem:[%s2382_s3 + $0x70] sm:$0xff]  ;;  %v1902_v37 = vld [vmem:[%s2382_s3 + $0x40] sm:$0xff] }
  0x20   : > { %566 = vmatpush.bf16.msra.mxu0 %v1864_v20  ;;  %v2193_v20 = vld [vmem:[%s2384_s5 + $0x8] sm:$0xff]  ;;  %v1910_v39 = vld [vmem:[%s2382_s3 + $0x80] sm:$0xff]  ;;  %v1901_v44 = vld [vmem:[%s2382_s3 + $0x38] sm:$0xff] }
  0x21   : > { %585 = vmatpush.bf16.msra.mxu1 %v1872_v21  ;;  %765 = vperm.xlu1 %1954, %v2193_v20   ;;  %v1907_v38 = vld [vmem:[%s2382_s3 + $0x68] sm:$0xff]  ;;  %v1900_v48 = vld [vmem:[%s2382_s3 + $0x30] sm:$0xff]  ;;  %v1906_v49 = vld [vmem:[%s2382_s3 + $0x60] sm:$0xff] }
  0x22   : > { %604 = vmatpush.bf16.msra.mxu2 %v1880_v22  ;;  %vm678_vm7 = vmand %vm641_vm0, %vm677_vm6 }
  0x23   : > { %623 = vmatpush.bf16.msra.mxu3 %v1888_v23 }
  0x24   : > { %567 = vmatpush.bf16.msra.mxu0 %v1863_v24 }
  0x25   : > { %586 = vmatpush.bf16.msra.mxu1 %v1871_v25  ;;  %760 = vperm.xlu0 %1953, %v2179_v14  }
  0x26   : > { %605 = vmatpush.bf16.msra.mxu2 %v1879_v26 }
  0x27   : > { %624 = vmatpush.bf16.msra.mxu3 %v1887_v27  ;;  %v1903_v27 = vld [vmem:[%s2382_s3 + $0x48] sm:$0xff] }
  0x28   : > { %568 = vmatpush.bf16.msra.mxu0 %v1862_v28  ;;  %v1911_v28 = vld [vmem:[%s2382_s3 + $0x88] sm:$0xff] }
  0x29   : > { %587 = vmatpush.bf16.msra.mxu1 %v1870_v29 }
  0x2a   : > { %606 = vmatpush.bf16.msra.mxu2 %v1878_v30 }
  0x2b   : > { %625 = vmatpush.bf16.msra.mxu3 %v1886_v31  ;;  %569 = vmatmul.bf16.vlgmr.msra.gmra.mxu0 %v1531_v40 }
  0x2c   : > { %588 = vmatmul.bf16.vlgmr.msra.gmra.mxu1 %v1535_v41  ;;  %739 = vmatpush.bf16.msrb.mxu0 %v1897_v57 }
  0x2d   : > { %607 = vmatmul.bf16.vlgmr.msra.gmra.mxu2 %v1539_v42  ;;  %1939 = vmatpush.bf16.msrb.mxu1 %v1897_v57 }
  0x2e   : > { %626 = vmatmul.bf16.vlgmr.msra.gmra.mxu3 %v1543_v43  ;;  %915 = vmatpush.bf16.msrb.mxu2 %v1905_v10 }
  0x2f   : > { %1022 = vmatpush.bf16.msrb.mxu3 %v1909_v13 }
  0x30   : > { %740 = vmatpush.bf16.msrb.mxu0 %v1896_v58 }
  0x31   : > { %1940 = vmatpush.bf16.msrb.mxu1 %v1896_v58  ;;  %v1899_v58 = vld [vmem:[%s2382_s3 + $0x28] sm:$0xff] }
  0x32   : > { %916 = vmatpush.bf16.msrb.mxu2 %v1904_v15 }
  0x33   : > { %1023 = vmatpush.bf16.msrb.mxu3 %v1908_v19  ;;  %v1928_v19 = vld [vmem:[%s2382_s3 + $0x110] sm:$0xff] }
  0x34   : > { %741 = vmatpush.bf16.msrb.mxu0 %v1895_v59 }
  0x35   : > { %1941 = vmatpush.bf16.msrb.mxu1 %v1895_v59  ;;  %v2236_v59 = vld [vmem:[%s2384_s5 + $0x10] sm:$0xff] }
  0x36   : > { %917 = vmatpush.bf16.msrb.mxu2 %v1903_v27  ;;  %770 = vperm.xlu1 %1954, %v2236_v59   ;;  %v1927_v27 = vld [vmem:[%s2382_s3 + $0x108] sm:$0xff] }
  0x37   : > { %1024 = vmatpush.bf16.msrb.mxu3 %v1907_v38 }
  0x38   : > { %742 = vmatpush.bf16.msrb.mxu0 %v1894_v61 }
  0x39   : > { %1942 = vmatpush.bf16.msrb.mxu1 %v1894_v61  ;;  %v1921_v61 = vld [vmem:[%s2382_s3 + $0xd8] sm:$0xff] }
  0x3a   : > { %918 = vmatpush.bf16.msrb.mxu2 %v1902_v37 }
  0x3b   : > { %574 = vmatmul.bf16.gmra.mxu0 %v1547_v52  ;;  %1025 = vmatpush.bf16.msrb.mxu3 %v1906_v49 }
  0x3c   : > { %593 = vmatmul.bf16.gmra.mxu1 %v1551_v53  ;;  %1099 = vmatpush.bf16.msra.mxu0 %v1913_v11  ;;  %v1920_v11 = vld [vmem:[%s2382_s3 + $0xd0] sm:$0xff] }
  0x3d   : > { %612 = vmatmul.bf16.gmra.mxu2 %v1555_v54  ;;  %842 = vmatpush.bf16.msra.mxu1 %v1901_v44  ;;  %v1926_v44 = vld [vmem:[%s2382_s3 + $0x100] sm:$0xff] }
  0x3e   : > { %631 = vmatmul.bf16.gmra.mxu3 %v1559_v55  ;;  %1260 = vmatpush.bf16.msra.mxu2 %v1921_v61 }
  0x40   : > { %1100 = vmatpush.bf16.msra.mxu0 %v1912_v16 }
  0x41   : > { %843 = vmatpush.bf16.msra.mxu1 %v1900_v48 }
  0x42   : > { %1261 = vmatpush.bf16.msra.mxu2 %v1920_v11 }
  0x44   : > { %1101 = vmatpush.bf16.msra.mxu0 %v1911_v28 }
  0x45   : > { %844 = vmatpush.bf16.msra.mxu1 %v1899_v58  ;;  %v1922_v58 = vld [vmem:[%s2382_s3 + $0xe0] sm:$0xff] }
  0x48   : > { %1102 = vmatpush.bf16.msra.mxu0 %v1910_v39  ;;  %v1917_v39 = vld [vmem:[%s2382_s3 + $0xb8] sm:$0xff] }
  0xa8   : > { %v570_v62 = vpop.f32.mrf.mxu0 }
  0xa9   : > { %v589_v63 = vpop.f32.mrf.mxu1  ;;  %v571_v0 = vadd.f32 %v2154_v60, %v570_v62 }
  0xab   : > { %v590_v1 = vadd.f32 %v589_v63, %v571_v0 }
  0xb0   : > { %v608_v3 = vpop.f32.mrf.mxu2  ;;  %v572_v6 = vpop.f32.mrf.mxu0 }
  0xb1   : > { %v627_v4 = vpop.f32.mrf.mxu3  ;;  %v609_v5 = vadd.f32 %v608_v3, %v590_v1  ;;  %v591_v7 = vpop.f32.mrf.mxu1  ;;  %v573_v9 = vadd.f32 %v2154_v60, %v572_v6  ;;  %v1898_v1 = vld [vmem:[%s2382_s3 + $0x20] sm:$0xff] }
  0xb2   : > { %845 = vmatpush.bf16.msra.mxu1 %v1898_v1 }
  0xb3   : > { %v628_v8 = vadd.f32 %v627_v4, %v609_v5  ;;  %v592_v18 = vadd.f32 %v591_v7, %v573_v9  ;;  %v679_v7 = vld [vmem:[#allocation2 + $0xc] sm:$0xf] }
  0xb5   : > { %v637_v12 = vmax.f32 %v628_v8, 0.0  ;;  %v1925_v8 = vld [vmem:[%s2382_s3 + $0xf8] sm:$0xff] }
  0xb6   : > { %1343 = vmatpush.bf16.msra.mxu3 %v1925_v8 }
  0xb7   : > { %v647_v17 = vpack.c.bf16 %v637_v12, %v637_v12  ;;  %v1929_v12 = vld [vmem:[%s2382_s3 + $0x118] sm:$0xff] }
  0xb8   : > { %v610_v21 = vpop.f32.mrf.mxu2  ;;  %v575_v25 = vpop.f32.mrf.mxu0 }
  0xb9   : > { %v629_v22 = vpop.f32.mrf.mxu3  ;;  %v658_v23 = vrot.slane %v647_v17, 5  ;;  %v611_v24 = vadd.f32 %v610_v21, %v592_v18  ;;  %v576_v26 = vadd.f32 %v2154_v60, %v575_v25  ;;  %v594_v30 = vpop.f32.mrf.mxu1  ;;  %v1924_v21 = vld [vmem:[%s2382_s3 + $0xf0] sm:$0xff] }
  0xba   : > { %1344 = vmatpush.bf16.msra.mxu3 %v1924_v21 }
  0xbb   : > { %673 = vst.msk [vmem:[#allocation2] sm:$0x8] %vm672_vm1, %v658_v23  ;;  %v630_v29 = vadd.f32 %v629_v22, %v611_v24  ;;  %v595_v32 = vadd.f32 %v594_v30, %v576_v26  ;;  %v659_v40 = vrot.slane %v658_v23, 4  ;;  %v1919_v22 = vld [vmem:[%s2382_s3 + $0xc8] sm:$0xff]  ;;  %v1969_v26 = vmov 1  }
  0xbc   : > { %1956 = vset.pattern.permute.xlu0 %v1969_v26  ;;  %1262 = vmatpush.bf16.msra.mxu2 %v1919_v22  ;;  %vm1459_vm1 = vsmask.f32 256 }
  0xbd   : > { %v638_v31 = vmax.f32 %v630_v29, 0.0  ;;  %935 = vperm.xlu0 %1956, %v2193_v20   ;;  %1955 = vset.pattern.permute.xlu2 %v1969_v26  ;;  %vm1460_vm2 = vmand %vm1458_vm15, %vm1459_vm1 }
  0xbe   : > { %1957 = vset.pattern.permute.xlu1 %v1969_v26  ;;  %943 = vperm.xlu2 %1955, %v2163_v2   ;;  %v1918_v2 = vld [vmem:[%s2382_s3 + $0xc0] sm:$0xff] }
  0xbf   : > { %v648_v33 = vpack.c.bf16 %v638_v31, %v638_v31  ;;  %939 = vperm.xlu1 %1957, %v2236_v59  }
  0xc0   : > { %v613_v35 = vpop.f32.mrf.mxu2  ;;  %v577_v43 = vpop.f32.mrf.mxu0  ;;  %1263 = vmatpush.bf16.msra.mxu2 %v1918_v2 }
  0xc1   : > { %v632_v36 = vpop.f32.mrf.mxu3  ;;  %v660_v41 = vrot.slane %v648_v33, 5  ;;  %v614_v42 = vadd.f32 %v613_v35, %v595_v32  ;;  %v578_v47 = vadd.f32 %v2154_v60, %v577_v43  ;;  %v596_v51 = vpop.f32.mrf.mxu1  ;;  %v1923_v43 = vld [vmem:[%s2382_s3 + $0xe8] sm:$0xff] }
  0xc2   : > { %v954_v13 = vld [vmem:[#allocation2] sm:$0xc]  ;;  %1345 = vmatpush.bf16.msra.mxu3 %v1923_v43 }
  0xc3   : > { %v661_v45 = vsel %vm2204_vm4, %v659_v40, %v660_v41  ;;  %v633_v46 = vadd.f32 %v632_v36, %v614_v42  ;;  %v597_v53 = vadd.f32 %v596_v51, %v578_v47  ;;  %v662_v55 = vrot.slane %v660_v41, 4  ;;  %v1045_v16 = vld [vmem:[#allocation2] sm:$0x8] }
  0xc4   : > { %674 = vst.msk [vmem:[#allocation2 + $0x4] sm:$0xf] %vm641_vm0, %v661_v45  ;;  %v861_v17 = vld [vmem:[#allocation2] sm:$0xe]  ;;  %v966_v18 = vunpack.c.l.b16 %v954_v13  ;;  %v1057_v24 = vunpack.c.l.b16 %v1045_v16 }
  0xc5   : > { %v639_v50 = vmax.f32 %v633_v46, 0.0  ;;  %v873_v25 = vunpack.c.l.b16 %v861_v17 }
  0xc6   : > { %931 = vperm.xlu2 %1955, %v2179_v14   ;;  %1346 = vmatpush.bf16.msra.mxu3 %v1922_v58  ;;  %v1914_v14 = vld [vmem:[%s2382_s3 + $0xa0] sm:$0xff] }
  0xc7   : > { %v649_v52 = vpack.c.bf16 %v639_v50, %v639_v50 }
  0xc8   : > { %v615_v54 = vpop.f32.mrf.mxu2 }
  0xc9   : > { %v663_v56 = vrot.slane %v649_v52, 5  ;;  %v616_v57 = vadd.f32 %v615_v54, %v597_v53  ;;  %v634_v60 = vpop.f32.mrf.mxu3  ;;  %v1916_v53 = vld [vmem:[%s2382_s3 + $0xb0] sm:$0xff] }
  0xcb   : > { %v664_v62 = vsel %vm2204_vm4, %v662_v55, %v663_v56  ;;  %v635_v63 = vadd.f32 %v634_v60, %v616_v57  ;;  %v2244_v0 = vld [vmem:[#allocation2] sm:$0xff]   ;;  %v665_v5 = vrot.slane %v663_v56, 4 }
  0xcc   : > { %675 = vst.msk [vmem:[#allocation2 + $0x8] sm:$0xf] %vm641_vm0, %v664_v62  ;;  %1704 = vmatmul.msk.bf16.vlgmr.msrb.gmra.mxu0 %vm728_vm5, %v2244_v0  ;;  %v1933_v15 = vunpack.c.h.b16 %v2244_v0  ;;  %v797_v59 = vshll.u32 %v2244_v0, 16  ;;  %v1915_v62 = vld [vmem:[%s2382_s3 + $0xa8] sm:$0xff] }
  0xcd   : > { %v640_v3 = vmax.f32 %v635_v63, 0.0  ;;  %1416 = vmatpush.bf16.msrb.mxu0 %v1929_v12 }
  0xce   : > { %v968_v23 = vpack.c.b16 %v1933_v15, %v966_v18  ;;  %v2278_v28 = vpack.c.b16 %v1933_v15, %v1057_v24  ;;  %v875_v32 = vpack.c.b16 %v1933_v15, %v873_v25  ;;  %v1363_v15 = vld [vmem:[#allocation2 + $0x10] sm:$0x7] }
  0xcf   : > { %v650_v4 = vpack.c.bf16 %v640_v3, %v640_v3  ;;  %v799_v3 = vrot.slane %v797_v59, 1  ;;  %v1375_v17 = vunpack.c.l.b16 %v1363_v15 }
  0xd0   : > { %v972_v38 = vshrl.u32 %v968_v23, 16  ;;  %v975_v20 = vshll.u32 %v968_v23, 16  ;;  %v878_v45 = vrot.slane %v875_v32, 1  ;;  %v1062_v47 = vrot.slane %v2278_v28, 3 }
  0xd1   : > { %v666_v6 = vrot.slane %v650_v4, 5  ;;  %1417 = vmatpush.bf16.msrb.mxu0 %v1928_v19  ;;  %v795_v4 = vshrl.u32 %v2244_v0, 16  ;;  %v1362_v0 = vld [vmem:[#allocation2 + $0x4] sm:$0xc] }
  0xd2   : > { %v974_v49 = vrot.slane %v972_v38, 2  ;;  %v977_v50 = vrot.slane %v975_v20, 3  ;;  %v1374_v21 = vunpack.c.l.b16 %v1362_v0 }
  0xd3   : > { %v667_v9 = vsel %vm2204_vm4, %v665_v5, %v666_v6  ;;  %v800_v6 = vor.u32 %v799_v3, %v795_v4 }
  0xd4   : > { %v680_v10 = vsel %vm678_vm7, %v667_v9, %v679_v7  ;;  %v978_v60 = vor.u32 %v977_v50, %v974_v49  ;;  %v1204_v9 = vld [vmem:[#allocation2 + $0x10] sm:$0x3] }
  0xd5   : > { %681 = vst [vmem:[#allocation2 + $0xc] sm:$0xf] %v680_v10  ;;  %1418 = vmatpush.bf16.msrb.mxu0 %v1927_v27  ;;  %v1201_v10 = vld [vmem:[#allocation2 + $0x4] sm:$0xe]  ;;  %v1220_v13 = vunpack.c.l.b16 %v1204_v9 }
  0xd6   : > { %v1217_v16 = vunpack.c.l.b16 %v1201_v10  ;;  %v766_v10 = vpop.permute.xlu1 %765 }
  0xd9   : > { %1419 = vmatpush.bf16.msrb.mxu0 %v1926_v44  ;;  %v1128_v44 = vshrl.u32 %v2278_v28, 16 }
  0xdb   : > { %v1130_v49 = vrot.slane %v1128_v44, 3 }
  0xdc   : > { %v2280_v29 = vld [vmem:[#allocation2 + $0x8] sm:$0xff]  }
  0xdd   : > { %v685_v30 = vld [vmem:[#allocation2 + $0xc] sm:$0x1]  ;;  %v700_v33 = vunpack.c.l.b16 %v2280_v29  ;;  %v1063_v48 = vrot.slane %v2280_v29, 3  ;;  %v1136_v2 = vshrl.u32 %v2280_v29, 16  ;;  %v1139_v43 = vshll.u32 %v2280_v29, 16 }
  0xde   : > { %v862_v31 = vld [vmem:[#allocation2 + $0xc] sm:$0x3]  ;;  %v701_v34 = vunpack.c.l.b16 %v685_v30 }
  0xdf   : > { %v874_v35 = vunpack.c.l.b16 %v862_v31  ;;  %v955_v36 = vld [vmem:[#allocation2 + $0xc] sm:$0x7]  ;;  %v1064_v55 = vsel %vm1061_vm9, %v1062_v47, %v1063_v48  ;;  %v1138_v47 = vrot.slane %v1136_v2, 3 }
  0xe0   : > { %v967_v37 = vunpack.c.l.b16 %v955_v36  ;;  %v2288_v40 = vpack.c.b16 %v701_v34, %v700_v33  ;;  %1776 = vmatmul.msk.bf16.vlgmr.msra.gmra.mxu0 %vm728_vm5, %v1064_v55  ;;  %v1938_v8 = vld [vmem:[#allocation2 + $0x8] sm:$0xff]  }
  0xe1   : > { %v876_v41 = vpack.c.b16 %v874_v35, %v700_v33  ;;  %v1936_v11 = vunpack.c.l.b16 %v1938_v8  ;;  %v1937_v12 = vunpack.c.h.b16 %v1938_v8 }
  0xe2   : > { %v969_v42 = vpack.c.b16 %v967_v37, %v700_v33  ;;  %1705 = vmatmul.msk.bf16.vlgmr.msrb.gmra.mxu1 %vm728_vm5, %v2288_v40  ;;  %v801_v1 = vshll.u32 %v2288_v40, 16  ;;  %v805_v30 = vshrl.u32 %v2288_v40, 16 }
  0xe3   : > { %v879_v46 = vrot.slane %v876_v41, 1  ;;  %1178 = vmatpush.bf16.msrb.mxu1 %v1917_v39  ;;  %v1221_v18 = vpack.c.b16 %v1936_v11, %v1217_v16  ;;  %v1222_v19 = vpack.c.b16 %v1220_v13, %v1937_v12  ;;  %v1376_v22 = vpack.c.b16 %v1936_v11, %v1374_v21 }
  0xe4   : > { %v980_v51 = vshrl.u32 %v969_v42, 16  ;;  %v983_v52 = vshll.u32 %v969_v42, 16  ;;  %v803_v5 = vrot.slane %v801_v1, 1  ;;  %v1377_v23 = vpack.c.b16 %v1375_v17, %v1937_v12 }
  0xe5   : > { %v880_v54 = vsel %vm877_vm8, %v878_v45, %v879_v46  ;;  %v1293_v24 = vshrl.u32 %v1221_v18, 16  ;;  %v1296_v25 = vshll.u32 %v1221_v18, 16  ;;  %v1301_v26 = vshrl.u32 %v1222_v19, 16 }
  0xe6   : > { %1740 = vmatmul.msk.bf16.vlgmr.msrb.gmra.mxu2 %vm728_vm5, %v880_v54  ;;  %v982_v56 = vrot.slane %v980_v51, 2  ;;  %v985_v57 = vrot.slane %v983_v52, 3  ;;  %v804_v7 = vsel %vm794_vm11, %v800_v6, %v803_v5  ;;  %v1304_v27 = vshll.u32 %v1222_v19, 16 }
  0xe7   : > { %1179 = vmatpush.bf16.msrb.mxu1 %v1916_v53  ;;  %v1223_v31 = vrot.slane %v1221_v18, 1  ;;  %v807_v32 = vor.u32 %v805_v30, %v803_v5  ;;  %v1224_v33 = vrot.slane %v1222_v19, 1  ;;  %v1379_v34 = vrot.slane %v1376_v22, 2  ;;  %v771_v22 = vpop.permute.xlu1 %770 }
  0xe8   : > { %v986_v61 = vor.u32 %v985_v57, %v982_v56  ;;  %v1380_v35 = vrot.slane %v1377_v23, 2  ;;  %v1295_v36 = vrot.slane %v1293_v24, 1  ;;  %v1298_v37 = vrot.slane %v1296_v25, 2 }
  0xe9   : > { %v1303_v38 = vrot.slane %v1301_v26, 1  ;;  %v1306_v20 = vrot.slane %v1304_v27, 2  ;;  %v1225_v39 = vsel %vm877_vm8, %v1223_v31, %v1224_v33  ;;  %v1131_v45 = vshll.u32 %v2278_v28, 16 }
  0xea   : > { %v987_v63 = vsel %vm970_vm10, %v978_v60, %v986_v61  ;;  %v1381_v41 = vsel %vm1378_vm12, %v1379_v34, %v1380_v35  ;;  %v1299_v40 = vor.u32 %v1298_v37, %v1295_v36 }
  0xeb   : > { %1758 = vmatmul.msk.bf16.vlgmr.msrb.gmra.mxu3 %vm728_vm5, %v987_v63  ;;  %1180 = vmatpush.bf16.msrb.mxu1 %v1915_v62  ;;  %v1307_v42 = vor.u32 %v1306_v20, %v1303_v38  ;;  %v1133_v50 = vrot.slane %v1131_v45, 4  ;;  %v2343_v62 = vpop.permute.xlu0 %775  ;;  %v1959_v45 = vld [vmem:[%s2383_s4] ss:$0 sm:$0xff] }
  0xed   : > { %v1134_v52 = vor.u32 %v1133_v50, %v1130_v49 }
  0xef   : > { %1181 = vmatpush.bf16.msrb.mxu1 %v1914_v14 }
  0xf0   : > { %1777 = vmatmul.msk.bf16.gmra.mxu0 %vm728_vm5, %v1063_v48  ;;  %v1141_v48 = vrot.slane %v1139_v43, 4 }
  0xf2   : > { %1722 = vmatmul.msk.bf16.vlgmr.msra.gmra.mxu1 %vm728_vm5, %v804_v7  ;;  %v1142_v51 = vor.u32 %v1141_v48, %v1138_v47 }
  0xf3   : > { %v761_v6 = vpop.permute.xlu0 %760 }
  0xf4   : > { %v1143_v53 = vsel %vm1126_vm14, %v1134_v52, %v1142_v51 }
  0xf6   : > { %1741 = vmatmul.msk.bf16.gmra.mxu2 %vm728_vm5, %v879_v46  ;;  %v1308_v46 = vsel %vm1291_vm13, %v1299_v40, %v1307_v42 }
  0xfb   : > { %1759 = vmatmul.msk.bf16.gmra.mxu3 %vm728_vm5, %v986_v61 }
 0x100   : > { %1848 = vmatmul.msk.bf16.vlgmr.msrb.gmra.mxu0 %vm728_vm5, %v1381_v41 }
 0x102   : > { %1723 = vmatmul.msk.bf16.gmra.mxu1 %vm728_vm5, %v807_v32 }
 0x106   : > { %1812 = vmatmul.msk.bf16.vlgmr.msra.gmra.mxu2 %vm728_vm5, %v1225_v39 }
 0x10b   : > { %1830 = vmatmul.msk.bf16.vlgmr.msra.gmra.mxu3 %vm728_vm5, %v1308_v46 }
 0x110   : > { %1849 = vmatmul.msk.bf16.gmra.mxu0 %vm728_vm5, %v1380_v35 }
 0x112   : > { %1794 = vmatmul.msk.bf16.vlgmr.msrb.gmra.mxu1 %vm728_vm5, %v1143_v53 }
 0x116   : > { %1813 = vmatmul.msk.bf16.gmra.mxu2 %vm728_vm5, %v1224_v33 }
 0x118   : > { %v2345_v14 = vpop.permute.xlu2 %943 }
 0x11b   : > { %1831 = vmatmul.msk.bf16.gmra.mxu3 %vm728_vm5, %v1307_v42 }
 0x120   : > { %v932_v11 = vpop.permute.xlu2 %931 }
 0x122   : > { %1795 = vmatmul.msk.bf16.gmra.mxu1 %vm728_vm5, %v1142_v51 }
 0x12f   : > { %v936_v23 = vpop.permute.xlu0 %935 }
 0x131   : > { %v940_v20 = vpop.permute.xlu1 %939 }
 0x149   : > { %v744_v28 = vpop.f32.mrf.mxu0 }
 0x14a   : > { %v778_v9 = vmul.f32 %v761_v6, %v744_v28 }
 0x151   : > { %v746_v29 = vpop.f32.mrf.mxu0 }
 0x152   : > { %v779_v19 = vmul.f32 %v766_v10, %v746_v29 }
 0x15d   : > { %v1104_v55 = vpop.f32.mrf.mxu0 }
 0x15f   : > { %v749_v54 = vpop.f32.mrf.mxu1 }
 0x160   : > { %v780_v35 = vmul.f32 %v771_v22, %v749_v54 }
 0x165   : > { %v1106_v59 = vpop.f32.mrf.mxu0 }
 0x167   : > { %v751_v56 = vpop.f32.mrf.mxu1 }
 0x168   : > { %v781_v52 = vmul.f32 %v2343_v62, %v751_v56 }
 0x169   : > { %v920_v57 = vpop.f32.mrf.mxu2 }
 0x16a   : > { %v946_v16 = vmul.f32 %v932_v11, %v920_v57 }
 0x16d   : > { %v2347_v4 = vpop.f32.mrf.mxu0 }
 0x16e   : > { %v1027_v58 = vpop.f32.mrf.mxu3 }
 0x16f   : > { %v847_v60 = vpop.f32.mrf.mxu1  ;;  %v1037_v21 = vmul.f32 %v1027_v58, %v761_v6 }
 0x170   : > { %v857_v13 = vadd.f32 %v847_v60, %v778_v9 }
 0x171   : > { %v922_v61 = vpop.f32.mrf.mxu2 }
 0x172   : > { %v950_v17 = vadd.f32 %v946_v16, %v857_v13  ;;  %v947_v27 = vmul.f32 %v936_v23, %v922_v61 }
 0x174   : > { %v1041_v24 = vadd.f32 %v1037_v21, %v950_v17 }
 0x175   : > { %v2349_v12 = vpop.f32.mrf.mxu0 }
 0x176   : > { %v1029_v63 = vpop.f32.mrf.mxu3  ;;  %v1114_v33 = vadd.f32 %v1104_v55, %v1041_v24 }
 0x177   : > { %v849_v1 = vpop.f32.mrf.mxu1  ;;  %v1038_v36 = vmul.f32 %v1029_v63, %v766_v10 }
 0x178   : > { %v858_v25 = vadd.f32 %v849_v1, %v779_v19 }
 0x179   : > { %v925_v3 = vpop.f32.mrf.mxu2 }
 0x17a   : > { %v951_v32 = vadd.f32 %v947_v27, %v858_v25  ;;  %v948_v2 = vmul.f32 %v940_v20, %v925_v3 }
 0x17c   : > { %v1042_v41 = vadd.f32 %v1038_v36, %v951_v32 }
 0x17d   : > { %v1421_v26 = vpop.f32.mrf.mxu0 }
 0x17e   : > { %v1032_v5 = vpop.f32.mrf.mxu3  ;;  %v1431_v43 = vmul.f32 %v1421_v26, %v932_v11  ;;  %v1115_v50 = vadd.f32 %v1106_v59, %v1042_v41 }
 0x17f   : > { %v852_v7 = vpop.f32.mrf.mxu1  ;;  %v1039_v28 = vmul.f32 %v1032_v5, %v771_v22 }
 0x180   : > { %v859_v40 = vadd.f32 %v852_v7, %v780_v35 }
 0x181   : > { %v927_v8 = vpop.f32.mrf.mxu2 }
 0x182   : > { %v952_v48 = vadd.f32 %v948_v2, %v859_v40  ;;  %v949_v63 = vmul.f32 %v2345_v14, %v927_v8 }
 0x184   : > { %v1043_v57 = vadd.f32 %v1039_v28, %v952_v48 }
 0x185   : > { %v1423_v46 = vpop.f32.mrf.mxu0 }
 0x186   : > { %v1034_v15 = vpop.f32.mrf.mxu3  ;;  %v1432_v56 = vmul.f32 %v1423_v46, %v936_v23  ;;  %v1116_v9 = vadd.f32 %v2347_v4, %v1043_v57 }
 0x187   : > { %v854_v0 = vpop.f32.mrf.mxu1  ;;  %v1040_v13 = vmul.f32 %v1034_v15, %v2343_v62 }
 0x188   : > { %v860_v58 = vadd.f32 %v854_v0, %v781_v52 }
 0x189   : > { %v1265_v18 = vpop.f32.mrf.mxu2 }
 0x18a   : > { %v1275_v37 = vmul.f32 %v1265_v18, %v761_v6  ;;  %v953_v6 = vadd.f32 %v949_v63, %v860_v58 }
 0x18c   : > { %v1044_v8 = vadd.f32 %v1040_v13, %v953_v6 }
 0x18e   : > { %v1348_v30 = vpop.f32.mrf.mxu3 }
 0x18f   : > { %v1183_v31 = vpop.f32.mrf.mxu1 }
 0x190   : > { %v1193_v34 = vmul.f32 %v1183_v31, %v932_v11  ;;  %v1426_v11 = vpop.f32.mrf.mxu0 }
 0x191   : > { %v1267_v39 = vpop.f32.mrf.mxu2 }
 0x192   : > { %v1197_v38 = vadd.f32 %v1193_v34, %v1114_v33  ;;  %v1276_v54 = vmul.f32 %v1267_v39, %v766_v10 }
 0x194   : > { %v1279_v42 = vadd.f32 %v1275_v37, %v1197_v38 }
 0x196   : > { %v1358_v44 = vadd.f32 %v1348_v30, %v1279_v42  ;;  %v1350_v53 = vpop.f32.mrf.mxu3  ;;  %v1117_v30 = vadd.f32 %v2349_v12, %v1044_v8 }
 0x197   : > { %v1185_v47 = vpop.f32.mrf.mxu1 }
 0x198   : > { %v1435_v49 = vadd.f32 %v1431_v43, %v1358_v44  ;;  %v1194_v51 = vmul.f32 %v1185_v47, %v936_v23  ;;  %v1433_v23 = vmul.f32 %v1426_v11, %v940_v20  ;;  %v1428_v33 = vpop.f32.mrf.mxu0 }
 0x199   : > { %v1270_v59 = vpop.f32.mrf.mxu2  ;;  %v1434_v37 = vmul.f32 %v1428_v33, %v2345_v14 }
 0x19a   : > { %v1443_v29 = vadd.f32 %v1959_v45, %v1435_v49  ;;  %v1198_v55 = vadd.f32 %v1194_v51, %v1115_v50  ;;  %v1277_v0 = vmul.f32 %v1270_v59, %v771_v22 }
 0x19c   : > { %v1447_v60 = vmax.f32 %v1443_v29, 0.0  ;;  %v1280_v61 = vadd.f32 %v1276_v54, %v1198_v55 }
 0x19e   : > { %v1451_v1 = vpack.c.bf16 %v1447_v60, %v1447_v60  ;;  %v1359_v3 = vadd.f32 %v1350_v53, %v1280_v61  ;;  %v1353_v18 = vpop.f32.mrf.mxu3 }
 0x19f   : > { %v1188_v5 = vpop.f32.mrf.mxu1 }
 0x1a0   : > { %1455 = vst.msk [vmem:[%s2359_s24] sm:$0xf] %vm641_vm0, %v1451_v1  ;;  %v1436_v7 = vadd.f32 %v1432_v56, %v1359_v3  ;;  %v1195_v10 = vmul.f32 %v1188_v5, %v940_v20 }
 0x1a1   : > { %v1272_v26 = vpop.f32.mrf.mxu2 }
 0x1a2   : > { %v1444_v16 = vadd.f32 %v1959_v45, %v1436_v7  ;;  %v1199_v17 = vadd.f32 %v1195_v10, %v1116_v9  ;;  %v1278_v22 = vmul.f32 %v1272_v26, %v2343_v62  ;;  %v1461_v62 = vld [vmem:[%s2359_s24 + $0xc] sm:$0x1] }
 0x1a4   : > { %v1448_v19 = vmax.f32 %v1444_v16, 0.0  ;;  %v1281_v21 = vadd.f32 %v1277_v0, %v1199_v17 }
 0x1a6   : > { %v1452_v24 = vpack.c.bf16 %v1448_v19, %v1448_v19  ;;  %v1360_v25 = vadd.f32 %v1353_v18, %v1281_v21  ;;  %v1355_v36 = vpop.f32.mrf.mxu3 }
 0x1a7   : > { %v1190_v27 = vpop.f32.mrf.mxu1 }
 0x1a8   : > { %1456 = vst.msk [vmem:[%s2359_s24 + $0x4] sm:$0xf] %vm641_vm0, %v1452_v24  ;;  %v1437_v4 = vadd.f32 %v1433_v23, %v1360_v25  ;;  %v1196_v15 = vmul.f32 %v1190_v27, %v2345_v14 }
 0x1aa   : > { %v1445_v31 = vadd.f32 %v1959_v45, %v1437_v4  ;;  %v1200_v32 = vadd.f32 %v1196_v15, %v1117_v30 }
 0x1ac   : > { %v1449_v34 = vmax.f32 %v1445_v31, 0.0  ;;  %v1282_v35 = vadd.f32 %v1278_v22, %v1200_v32 }
 0x1ae   : > { %v1453_v38 = vpack.c.bf16 %v1449_v34, %v1449_v34  ;;  %v1361_v20 = vadd.f32 %v1355_v36, %v1282_v35 }
 0x1b0   : > { %1457 = vst.msk [vmem:[%s2359_s24 + $0x8] sm:$0xf] %vm641_vm0, %v1453_v38  ;;  %v1438_v39 = vadd.f32 %v1434_v37, %v1361_v20 }
 0x1b2   : > { %v1446_v12 = vadd.f32 %v1959_v45, %v1438_v39 }
 0x1b4   : > { %v1450_v41 = vmax.f32 %v1446_v12, 0.0 }
 0x1b6   : > { %v1454_v40 = vpack.c.bf16 %v1450_v41, %v1450_v41 }
 0x1b8   : > { %v1462_v42 = vsel %vm1460_vm2, %v1454_v40, %v1461_v62 }
 0x1b9   : > { %1463 = vst [vmem:[%s2359_s24 + $0xc] sm:$0x1] %v1462_v42 }
 0x1ba PF: > { %s16_s21 = sadd.s32 1, %s1966_s21  }
 0x1bb   : > { %p13_p4 = scmp.ge.s32.totalorder %s16_s21, 4  }
 0x1bd   :  { %15 = sbr.rel (!%p13_p4) target bundleno = 1 (0x1), region = 74 }

// kernel: dqn_forward.5
= control target key start
LH: loop header
LB: loop body
LE: loop exit
PB: predicated region body
PF: predicated region fallthrough
CT: control target
= control target key end

     0   :  { %s8353_s0 = inlined_call_operand.vmem [shape: bf16[2,1600], index: 0, kind: input, shape index: {}]   ;;  %s8354_s1 = inlined_call_operand.vmem [shape: bf16[1600,512], index: 1, kind: input, shape index: {}]   ;;  %s8355_s2 = inlined_call_operand.vmem [shape: f32[1,512], index: 2, kind: input, shape index: {}]   ;;  %s8356_s3 = inlined_call_operand.vmem [shape: bf16[512,2], index: 3, kind: input, shape index: {}]   ;;  %s8357_s4 = inlined_call_operand.vmem [shape: f32[1,2], index: 4, kind: input, shape index: {}]   ;;  %s8358_s5 = inlined_call_operand.hbm [shape: f32[2,2], index: 5, kind: output, shape index: {}]  }
   0x1   :  { %v3594_v0 = vld [vmem:[%s8354_s1 + $0xe0] sm:$0xf]  ;;  %v5242_v1 = vld [vmem:[%s8354_s1 + $0xec] sm:$0xf0] }
   0x2   :  { %v3722_v2 = vld [vmem:[%s8354_s1 + $0x1e0] sm:$0xf]  ;;  %v3595_v3 = vor.u32 %v5242_v1, %v3594_v0  ;;  %v5274_v4 = vld [vmem:[%s8354_s1 + $0x1ec] sm:$0xf0] }
   0x3   :  { %v3850_v5 = vld [vmem:[%s8354_s1 + $0x2e0] sm:$0xf]  ;;  %v5306_v6 = vld [vmem:[%s8354_s1 + $0x2ec] sm:$0xf0]  ;;  %v3723_v7 = vor.u32 %v5274_v4, %v3722_v2 }
   0x4   :  { %v3851_v8 = vor.u32 %v5306_v6, %v3850_v5  ;;  %v3978_v9 = vld [vmem:[%s8354_s1 + $0x3e0] sm:$0xf]  ;;  %v5338_v10 = vld [vmem:[%s8354_s1 + $0x3ec] sm:$0xf0]  ;;  %2466 = vmatpush.bf16.msra.mxu0 %v3595_v3 }
   0x5   :  { %v3578_v11 = vld [vmem:[%s8354_s1 + $0xc0] sm:$0xf]  ;;  %v3979_v12 = vor.u32 %v5338_v10, %v3978_v9  ;;  %v5238_v13 = vld [vmem:[%s8354_s1 + $0xcc] sm:$0xf0]  ;;  %2479 = vmatpush.bf16.msra.mxu1 %v3723_v7 }
   0x6   :  { %v3706_v14 = vld [vmem:[%s8354_s1 + $0x1c0] sm:$0xf]  ;;  %v5270_v15 = vld [vmem:[%s8354_s1 + $0x1cc] sm:$0xf0]  ;;  %2492 = vmatpush.bf16.msra.mxu2 %v3851_v8  ;;  %v3579_v16 = vor.u32 %v5238_v13, %v3578_v11 }
   0x7   :  { %v3707_v17 = vor.u32 %v5270_v15, %v3706_v14  ;;  %v3834_v18 = vld [vmem:[%s8354_s1 + $0x2c0] sm:$0xf]  ;;  %v5302_v19 = vld [vmem:[%s8354_s1 + $0x2cc] sm:$0xf0]  ;;  %2505 = vmatpush.bf16.msra.mxu3 %v3979_v12 }
   0x8   :  { %v3962_v20 = vld [vmem:[%s8354_s1 + $0x3c0] sm:$0xf]  ;;  %v3835_v21 = vor.u32 %v5302_v19, %v3834_v18  ;;  %v5334_v22 = vld [vmem:[%s8354_s1 + $0x3cc] sm:$0xf0]  ;;  %2467 = vmatpush.bf16.msra.mxu0 %v3579_v16 }
   0x9   :  { %v3562_v23 = vld [vmem:[%s8354_s1 + $0xa0] sm:$0xf]  ;;  %v5234_v24 = vld [vmem:[%s8354_s1 + $0xac] sm:$0xf0]  ;;  %v3963_v25 = vor.u32 %v5334_v22, %v3962_v20  ;;  %2480 = vmatpush.bf16.msra.mxu1 %v3707_v17 }
   0xa   :  { %v3690_v26 = vld [vmem:[%s8354_s1 + $0x1a0] sm:$0xf]  ;;  %v5266_v27 = vld [vmem:[%s8354_s1 + $0x1ac] sm:$0xf0]  ;;  %v3563_v29 = vor.u32 %v5234_v24, %v3562_v23  ;;  %2493 = vmatpush.bf16.msra.mxu2 %v3835_v21 }
   0xb   :  { %v3818_v28 = vld [vmem:[%s8354_s1 + $0x2a0] sm:$0xf]  ;;  %v5298_v30 = vld [vmem:[%s8354_s1 + $0x2ac] sm:$0xf0]  ;;  %v3691_v33 = vor.u32 %v5266_v27, %v3690_v26  ;;  %2506 = vmatpush.bf16.msra.mxu3 %v3963_v25 }
   0xc   :  { %v3946_v31 = vld [vmem:[%s8354_s1 + $0x3a0] sm:$0xf]  ;;  %v5330_v32 = vld [vmem:[%s8354_s1 + $0x3ac] sm:$0xf0]  ;;  %v3819_v34 = vor.u32 %v5298_v30, %v3818_v28  ;;  %2468 = vmatpush.bf16.msra.mxu0 %v3563_v29 }
   0xd   :  { %v3546_v35 = vld [vmem:[%s8354_s1 + $0x80] sm:$0xf]  ;;  %v5230_v36 = vld [vmem:[%s8354_s1 + $0x8c] sm:$0xf0]  ;;  %v3947_v38 = vor.u32 %v5330_v32, %v3946_v31  ;;  %2481 = vmatpush.bf16.msra.mxu1 %v3691_v33 }
   0xe   :  { %v3674_v37 = vld [vmem:[%s8354_s1 + $0x180] sm:$0xf]  ;;  %v5262_v39 = vld [vmem:[%s8354_s1 + $0x18c] sm:$0xf0]  ;;  %v3547_v44 = vor.u32 %v5230_v36, %v3546_v35  ;;  %2494 = vmatpush.bf16.msra.mxu2 %v3819_v34 }
   0xf   :  { %v3802_v40 = vld [vmem:[%s8354_s1 + $0x280] sm:$0xf]  ;;  %v5294_v41 = vld [vmem:[%s8354_s1 + $0x28c] sm:$0xf0]  ;;  %v3675_v45 = vor.u32 %v5262_v39, %v3674_v37  ;;  %2507 = vmatpush.bf16.msra.mxu3 %v3947_v38 }
  0x10   :  { %v3930_v42 = vld [vmem:[%s8354_s1 + $0x380] sm:$0xf]  ;;  %v5326_v43 = vld [vmem:[%s8354_s1 + $0x38c] sm:$0xf0]  ;;  %v3803_v46 = vor.u32 %v5294_v41, %v3802_v40  ;;  %2469 = vmatpush.bf16.msra.mxu0 %v3547_v44 }
  0x11   :  { %v3530_v47 = vld [vmem:[%s8354_s1 + $0x60] sm:$0xf]  ;;  %v5226_v48 = vld [vmem:[%s8354_s1 + $0x6c] sm:$0xf0]  ;;  %v3931_v50 = vor.u32 %v5326_v43, %v3930_v42  ;;  %2482 = vmatpush.bf16.msra.mxu1 %v3675_v45 }
  0x12   :  { %v3658_v49 = vld [vmem:[%s8354_s1 + $0x160] sm:$0xf]  ;;  %v5258_v51 = vld [vmem:[%s8354_s1 + $0x16c] sm:$0xf0]  ;;  %v3531_v56 = vor.u32 %v5226_v48, %v3530_v47  ;;  %2495 = vmatpush.bf16.msra.mxu2 %v3803_v46 }
  0x13   :  { %v3786_v52 = vld [vmem:[%s8354_s1 + $0x260] sm:$0xf]  ;;  %v5290_v53 = vld [vmem:[%s8354_s1 + $0x26c] sm:$0xf0]  ;;  %v3659_v57 = vor.u32 %v5258_v51, %v3658_v49  ;;  %2508 = vmatpush.bf16.msra.mxu3 %v3931_v50 }
  0x14   :  { %v3914_v54 = vld [vmem:[%s8354_s1 + $0x360] sm:$0xf]  ;;  %v5322_v55 = vld [vmem:[%s8354_s1 + $0x36c] sm:$0xf0]  ;;  %v3787_v58 = vor.u32 %v5290_v53, %v3786_v52  ;;  %2470 = vmatpush.bf16.msra.mxu0 %v3531_v56 }
  0x15   :  { %v3514_v59 = vld [vmem:[%s8354_s1 + $0x40] sm:$0xf]  ;;  %v5222_v60 = vld [vmem:[%s8354_s1 + $0x4c] sm:$0xf0]  ;;  %v3915_v62 = vor.u32 %v5322_v55, %v3914_v54  ;;  %2483 = vmatpush.bf16.msra.mxu1 %v3659_v57 }
  0x16   :  { %v3642_v61 = vld [vmem:[%s8354_s1 + $0x140] sm:$0xf]  ;;  %v5254_v63 = vld [vmem:[%s8354_s1 + $0x14c] sm:$0xf0]  ;;  %v3515_v4 = vor.u32 %v5222_v60, %v3514_v59  ;;  %2496 = vmatpush.bf16.msra.mxu2 %v3787_v58 }
  0x17   :  { %v3770_v0 = vld [vmem:[%s8354_s1 + $0x240] sm:$0xf]  ;;  %v5286_v1 = vld [vmem:[%s8354_s1 + $0x24c] sm:$0xf0]  ;;  %v3643_v5 = vor.u32 %v5254_v63, %v3642_v61  ;;  %2509 = vmatpush.bf16.msra.mxu3 %v3915_v62 }
  0x18   :  { %v3898_v2 = vld [vmem:[%s8354_s1 + $0x340] sm:$0xf]  ;;  %v5318_v3 = vld [vmem:[%s8354_s1 + $0x34c] sm:$0xf0]  ;;  %v3771_v6 = vor.u32 %v5286_v1, %v3770_v0  ;;  %2471 = vmatpush.bf16.msra.mxu0 %v3515_v4 }
  0x19   :  { %v3498_v7 = vld [vmem:[%s8354_s1 + $0x20] sm:$0xf]  ;;  %v5218_v8 = vld [vmem:[%s8354_s1 + $0x2c] sm:$0xf0]  ;;  %v3899_v10 = vor.u32 %v5318_v3, %v3898_v2  ;;  %2484 = vmatpush.bf16.msra.mxu1 %v3643_v5 }
  0x1a   :  { %v3626_v9 = vld [vmem:[%s8354_s1 + $0x120] sm:$0xf]  ;;  %v5250_v11 = vld [vmem:[%s8354_s1 + $0x12c] sm:$0xf0]  ;;  %v3499_v16 = vor.u32 %v5218_v8, %v3498_v7  ;;  %2497 = vmatpush.bf16.msra.mxu2 %v3771_v6 }
  0x1b   :  { %v3754_v12 = vld [vmem:[%s8354_s1 + $0x220] sm:$0xf]  ;;  %v5282_v13 = vld [vmem:[%s8354_s1 + $0x22c] sm:$0xf0]  ;;  %v3627_v19 = vor.u32 %v5250_v11, %v3626_v9  ;;  %2510 = vmatpush.bf16.msra.mxu3 %v3899_v10 }
  0x1c   :  { %v3882_v14 = vld [vmem:[%s8354_s1 + $0x320] sm:$0xf]  ;;  %v5314_v15 = vld [vmem:[%s8354_s1 + $0x32c] sm:$0xf0]  ;;  %v3755_v20 = vor.u32 %v5282_v13, %v3754_v12  ;;  %2472 = vmatpush.bf16.msra.mxu0 %v3499_v16 }
  0x1d   :  { %v3482_v17 = vld [vmem:[%s8354_s1] sm:$0xf]  ;;  %v5214_v18 = vld [vmem:[%s8354_s1 + $0xc] sm:$0xf0]  ;;  %v3883_v24 = vor.u32 %v5314_v15, %v3882_v14  ;;  %2485 = vmatpush.bf16.msra.mxu1 %v3627_v19 }
  0x1e   :  { %v3610_v21 = vld [vmem:[%s8354_s1 + $0x100] sm:$0xf]  ;;  %v5246_v22 = vld [vmem:[%s8354_s1 + $0x10c] sm:$0xf0]  ;;  %v3483_v31 = vor.u32 %v5214_v18, %v3482_v17  ;;  %2498 = vmatpush.bf16.msra.mxu2 %v3755_v20 }
  0x1f   :  { %v3738_v23 = vld [vmem:[%s8354_s1 + $0x200] sm:$0xf]  ;;  %v5278_v25 = vld [vmem:[%s8354_s1 + $0x20c] sm:$0xf0]  ;;  %v3611_v35 = vor.u32 %v5246_v22, %v3610_v21  ;;  %2511 = vmatpush.bf16.msra.mxu3 %v3883_v24 }
  0x20   :  { %v3866_v26 = vld [vmem:[%s8354_s1 + $0x300] sm:$0xf]  ;;  %v5310_v27 = vld [vmem:[%s8354_s1 + $0x30c] sm:$0xf0]  ;;  %v3739_v36 = vor.u32 %v5278_v25, %v3738_v23  ;;  %2473 = vmatpush.bf16.msra.mxu0 %v3483_v31 }
  0x21   :  { %v4106_v28 = vld [vmem:[%s8354_s1 + $0x4e0] sm:$0xf]  ;;  %v5370_v29 = vld [vmem:[%s8354_s1 + $0x4ec] sm:$0xf0]  ;;  %v3867_v39 = vor.u32 %v5310_v27, %v3866_v26  ;;  %2486 = vmatpush.bf16.msra.mxu1 %v3611_v35 }
  0x22   :  { %v4234_v30 = vld [vmem:[%s8354_s1 + $0x5e0] sm:$0xf]  ;;  %v5402_v32 = vld [vmem:[%s8354_s1 + $0x5ec] sm:$0xf0]  ;;  %v4107_v40 = vor.u32 %v5370_v29, %v4106_v28  ;;  %2499 = vmatpush.bf16.msra.mxu2 %v3739_v36 }
  0x23   :  { %v4362_v33 = vld [vmem:[%s8354_s1 + $0x6e0] sm:$0xf]  ;;  %v5434_v34 = vld [vmem:[%s8354_s1 + $0x6ec] sm:$0xf0]  ;;  %v4235_v41 = vor.u32 %v5402_v32, %v4234_v30  ;;  %2512 = vmatpush.bf16.msra.mxu3 %v3867_v39 }
  0x24   :  { %v4490_v37 = vld [vmem:[%s8354_s1 + $0x7e0] sm:$0xf]  ;;  %v5466_v38 = vld [vmem:[%s8354_s1 + $0x7ec] sm:$0xf0]  ;;  %v4363_v42 = vor.u32 %v5434_v34, %v4362_v33  ;;  %2518 = vmatpush.bf16.msrb.mxu0 %v4107_v40 }
  0x25   :  { %v4090_v43 = vld [vmem:[%s8354_s1 + $0x4c0] sm:$0xf]  ;;  %v5366_v44 = vld [vmem:[%s8354_s1 + $0x4cc] sm:$0xf0]  ;;  %v4491_v46 = vor.u32 %v5466_v38, %v4490_v37  ;;  %2531 = vmatpush.bf16.msrb.mxu1 %v4235_v41 }
  0x26   :  { %v4218_v45 = vld [vmem:[%s8354_s1 + $0x5c0] sm:$0xf]  ;;  %v5398_v47 = vld [vmem:[%s8354_s1 + $0x5cc] sm:$0xf0]  ;;  %v4091_v52 = vor.u32 %v5366_v44, %v4090_v43  ;;  %2544 = vmatpush.bf16.msrb.mxu2 %v4363_v42 }
  0x27   :  { %v4346_v48 = vld [vmem:[%s8354_s1 + $0x6c0] sm:$0xf]  ;;  %v5430_v49 = vld [vmem:[%s8354_s1 + $0x6cc] sm:$0xf0]  ;;  %v4219_v55 = vor.u32 %v5398_v47, %v4218_v45  ;;  %2557 = vmatpush.bf16.msrb.mxu3 %v4491_v46 }
  0x28   :  { %v4474_v50 = vld [vmem:[%s8354_s1 + $0x7c0] sm:$0xf]  ;;  %v5462_v51 = vld [vmem:[%s8354_s1 + $0x7cc] sm:$0xf0]  ;;  %v4347_v56 = vor.u32 %v5430_v49, %v4346_v48  ;;  %2519 = vmatpush.bf16.msrb.mxu0 %v4091_v52 }
  0x29   :  { %v4074_v53 = vld [vmem:[%s8354_s1 + $0x4a0] sm:$0xf]  ;;  %v5362_v54 = vld [vmem:[%s8354_s1 + $0x4ac] sm:$0xf0]  ;;  %v4475_v60 = vor.u32 %v5462_v51, %v4474_v50  ;;  %2532 = vmatpush.bf16.msrb.mxu1 %v4219_v55 }
  0x2a   :  { %v4202_v57 = vld [vmem:[%s8354_s1 + $0x5a0] sm:$0xf]  ;;  %v5394_v58 = vld [vmem:[%s8354_s1 + $0x5ac] sm:$0xf0]  ;;  %v4075_v1 = vor.u32 %v5362_v54, %v4074_v53  ;;  %2545 = vmatpush.bf16.msrb.mxu2 %v4347_v56 }
  0x2b   :  { %v22_v59 = vld [vmem:[%s8353_s0] sm:$0xff]  ;;  %v5426_v62 = vld [vmem:[%s8354_s1 + $0x6ac] sm:$0xf0]  ;;  %v4203_v2 = vor.u32 %v5394_v58, %v4202_v57  ;;  %2558 = vmatpush.bf16.msrb.mxu3 %v4475_v60 }
  0x2c   :  { %v4330_v61 = vld [vmem:[%s8354_s1 + $0x6a0] sm:$0xf]  ;;  %435 = vst [vmem:[#allocation1] ss:$9 sm:$0xff] %v22_v59  ;;  %v5458_v0 = vld [vmem:[%s8354_s1 + $0x7ac] sm:$0xf0]  ;;  %2520 = vmatpush.bf16.msrb.mxu0 %v4075_v1 }
  0x2d   :  { %v4458_v63 = vld [vmem:[%s8354_s1 + $0x7a0] sm:$0xf]  ;;  %v4331_v3 = vor.u32 %v5426_v62, %v4330_v61  ;;  %v5358_v5 = vld [vmem:[%s8354_s1 + $0x48c] sm:$0xf0]  ;;  %2533 = vmatpush.bf16.msrb.mxu1 %v4203_v2  ;;  %v23_v61 = vld [vmem:[%s8353_s0 + $0x8] sm:$0x1f] }
  0x2e   :  { %v4058_v4 = vld [vmem:[%s8354_s1 + $0x480] sm:$0xf]  ;;  %v4459_v7 = vor.u32 %v5458_v0, %v4458_v63  ;;  %v5390_v8 = vld [vmem:[%s8354_s1 + $0x58c] sm:$0xf0] }
  0x2f   :  { %v4186_v6 = vld [vmem:[%s8354_s1 + $0x580] sm:$0xf]  ;;  %v5422_v10 = vld [vmem:[%s8354_s1 + $0x68c] sm:$0xf0]  ;;  %v4059_v14 = vor.u32 %v5358_v5, %v4058_v4  ;;  %2546 = vmatpush.bf16.msrb.mxu2 %v4331_v3 }
  0x30   :  { %v4314_v9 = vld [vmem:[%s8354_s1 + $0x680] sm:$0xf]  ;;  %v5454_v12 = vld [vmem:[%s8354_s1 + $0x78c] sm:$0xf0]  ;;  %v4187_v18 = vor.u32 %v5390_v8, %v4186_v6  ;;  %2559 = vmatpush.bf16.msrb.mxu3 %v4459_v7 }
  0x31   :  { %v4442_v11 = vld [vmem:[%s8354_s1 + $0x780] sm:$0xf]  ;;  %v5354_v15 = vld [vmem:[%s8354_s1 + $0x46c] sm:$0xf0]  ;;  %v4315_v19 = vor.u32 %v5422_v10, %v4314_v9  ;;  %2521 = vmatpush.bf16.msrb.mxu0 %v4059_v14 }
  0x32   :  { %v4042_v13 = vld [vmem:[%s8354_s1 + $0x460] sm:$0xf]  ;;  %v5386_v17 = vld [vmem:[%s8354_s1 + $0x56c] sm:$0xf0]  ;;  %v4443_v23 = vor.u32 %v5454_v12, %v4442_v11  ;;  %2534 = vmatpush.bf16.msrb.mxu1 %v4187_v18 }
  0x33   :  { %v4170_v16 = vld [vmem:[%s8354_s1 + $0x560] sm:$0xf]  ;;  %v6012_v20 = vld [vmem:[#allocation1 + $0x12] sm:$0xff]  ;;  %v6025_v26 = vld [vmem:[#allocation1 + $0x9] sm:$0xff]  ;;  %v4043_v29 = vor.u32 %v5354_v15, %v4042_v13  ;;  %2547 = vmatpush.bf16.msrb.mxu2 %v4315_v19 }
  0x34   :  { %v6014_v21 = vld [vmem:[#allocation1] sm:$0xff]  ;;  %v5418_v25 = vld [vmem:[%s8354_s1 + $0x66c] sm:$0xf0]  ;;  %2500 = vmatmul.bf16.vlgmr.msra.gmra.mxu2 %v6012_v20  ;;  %2487 = vmatmul.bf16.vlgmr.msra.gmra.mxu1 %v6025_v26  ;;  %v4171_v30 = vor.u32 %v5386_v17, %v4170_v16  ;;  %v6102_v60 = vld [vmem:[#allocation1 + $0x36] sm:$0xff] }
  0x35   :  { %v6016_v22 = vld [vmem:[#allocation1 + $0x1b] sm:$0xff]  ;;  %v5450_v28 = vld [vmem:[%s8354_s1 + $0x76c] sm:$0xf0]  ;;  %2474 = vmatmul.bf16.vlgmr.msra.gmra.mxu0 %v6014_v21  ;;  %2560 = vmatpush.bf16.msrb.mxu3 %v4443_v23  ;;  %v6107_v0 = vld [vmem:[#allocation1 + $0x24] sm:$0xff] }
  0x36   :  { %v4298_v24 = vld [vmem:[%s8354_s1 + $0x660] sm:$0xf]  ;;  %2513 = vmatmul.bf16.vlgmr.msra.gmra.mxu3 %v6016_v22  ;;  %v5350_v33 = vld [vmem:[%s8354_s1 + $0x44c] sm:$0xf0]  ;;  %2522 = vmatpush.bf16.msrb.mxu0 %v4043_v29 }
  0x37   :  { %v4426_v27 = vld [vmem:[%s8354_s1 + $0x760] sm:$0xf]  ;;  %v4299_v31 = vor.u32 %v5418_v25, %v4298_v24  ;;  %v5382_v36 = vld [vmem:[%s8354_s1 + $0x54c] sm:$0xf0]  ;;  %2535 = vmatpush.bf16.msrb.mxu1 %v4171_v30 }
  0x38   :  { %v4026_v32 = vld [vmem:[%s8354_s1 + $0x440] sm:$0xf]  ;;  %v4427_v35 = vor.u32 %v5450_v28, %v4426_v27  ;;  %v5414_v38 = vld [vmem:[%s8354_s1 + $0x64c] sm:$0xf0] }
  0x39   :  { %v4154_v34 = vld [vmem:[%s8354_s1 + $0x540] sm:$0xf]  ;;  %v5446_v40 = vld [vmem:[%s8354_s1 + $0x74c] sm:$0xf0]  ;;  %v4027_v41 = vor.u32 %v5350_v33, %v4026_v32  ;;  %2548 = vmatpush.bf16.msrb.mxu2 %v4299_v31 }
  0x3a   :  { %v4282_v37 = vld [vmem:[%s8354_s1 + $0x640] sm:$0xf]  ;;  %v4155_v43 = vor.u32 %v5382_v36, %v4154_v34  ;;  %v5346_v45 = vld [vmem:[%s8354_s1 + $0x42c] sm:$0xf0]  ;;  %2561 = vmatpush.bf16.msrb.mxu3 %v4427_v35 }
  0x3b   :  { %v4410_v39 = vld [vmem:[%s8354_s1 + $0x740] sm:$0xf]  ;;  %v4283_v44 = vor.u32 %v5414_v38, %v4282_v37  ;;  %v5378_v47 = vld [vmem:[%s8354_s1 + $0x52c] sm:$0xf0]  ;;  %2523 = vmatpush.bf16.msrb.mxu0 %v4027_v41 }
  0x3c   :  { %v4010_v42 = vld [vmem:[%s8354_s1 + $0x420] sm:$0xf]  ;;  %v4411_v48 = vor.u32 %v5446_v40, %v4410_v39  ;;  %v5410_v50 = vld [vmem:[%s8354_s1 + $0x62c] sm:$0xf0]  ;;  %2536 = vmatpush.bf16.msrb.mxu1 %v4155_v43 }
  0x3d   :  { %v4138_v46 = vld [vmem:[%s8354_s1 + $0x520] sm:$0xf]  ;;  %v5442_v52 = vld [vmem:[%s8354_s1 + $0x72c] sm:$0xf0]  ;;  %v4011_v55 = vor.u32 %v5346_v45, %v4010_v42  ;;  %2549 = vmatpush.bf16.msrb.mxu2 %v4283_v44 }
  0x3e   :  { %v4266_v49 = vld [vmem:[%s8354_s1 + $0x620] sm:$0xf]  ;;  %v5342_v54 = vld [vmem:[%s8354_s1 + $0x40c] sm:$0xf0]  ;;  %v4139_v62 = vor.u32 %v5378_v47, %v4138_v46  ;;  %2562 = vmatpush.bf16.msrb.mxu3 %v4411_v48 }
  0x3f   :  { %v4394_v51 = vld [vmem:[%s8354_s1 + $0x720] sm:$0xf]  ;;  %v5374_v57 = vld [vmem:[%s8354_s1 + $0x50c] sm:$0xf0]  ;;  %v4267_v63 = vor.u32 %v5410_v50, %v4266_v49  ;;  %2524 = vmatpush.bf16.msrb.mxu0 %v4011_v55 }
  0x40   :  { %v3994_v53 = vld [vmem:[%s8354_s1 + $0x400] sm:$0xf]  ;;  %v5406_v59 = vld [vmem:[%s8354_s1 + $0x60c] sm:$0xf0]  ;;  %v4395_v3 = vor.u32 %v5442_v52, %v4394_v51  ;;  %2537 = vmatpush.bf16.msrb.mxu1 %v4139_v62 }
  0x41   :  { %v4122_v56 = vld [vmem:[%s8354_s1 + $0x500] sm:$0xf]  ;;  %v6111_v2 = vld [vmem:[#allocation1 + $0x2d] sm:$0xff]  ;;  %v3995_v9 = vor.u32 %v5342_v54, %v3994_v53  ;;  %2550 = vmatpush.bf16.msrb.mxu2 %v4267_v63 }
  0x42   :  { %v4250_v58 = vld [vmem:[%s8354_s1 + $0x600] sm:$0xf]  ;;  %v5438_v5 = vld [vmem:[%s8354_s1 + $0x70c] sm:$0xf0]  ;;  %v4123_v13 = vor.u32 %v5374_v57, %v4122_v56  ;;  %2563 = vmatpush.bf16.msrb.mxu3 %v4395_v3 }
  0x43   :  { %v6109_v1 = vld [vmem:[#allocation1 + $0x3f] sm:$0xff]  ;;  %v5498_v7 = vld [vmem:[%s8354_s1 + $0x8ec] sm:$0xf0]  ;;  %v4251_v14 = vor.u32 %v5406_v59, %v4250_v58  ;;  %2525 = vmatpush.bf16.msrb.mxu0 %v3995_v9 }
  0x44   :  { %v4378_v4 = vld [vmem:[%s8354_s1 + $0x700] sm:$0xf]  ;;  %445 = vst [vmem:[#allocation1] ss:$9 sm:$0xff] %v23_v61  ;;  %v5530_v10 = vld [vmem:[%s8354_s1 + $0x9ec] sm:$0xf0]  ;;  %2538 = vmatpush.bf16.msrb.mxu1 %v4123_v13 }
  0x45   :  { %v4618_v6 = vld [vmem:[%s8354_s1 + $0x8e0] sm:$0xf]  ;;  %v5562_v12 = vld [vmem:[%s8354_s1 + $0xaec] sm:$0xf0]  ;;  %v4379_v17 = vor.u32 %v5438_v5, %v4378_v4  ;;  %2551 = vmatpush.bf16.msrb.mxu2 %v4251_v14 }
  0x46   :  { %v4746_v8 = vld [vmem:[%s8354_s1 + $0x9e0] sm:$0xf]  ;;  %v5594_v16 = vld [vmem:[%s8354_s1 + $0xbec] sm:$0xf0]  ;;  %v4619_v18 = vor.u32 %v5498_v7, %v4618_v6  ;;  %2526 = vmatmul.bf16.vlgmr.msrb.gmra.mxu0 %v6107_v0 }
  0x47   :  { %v4874_v11 = vld [vmem:[%s8354_s1 + $0xae0] sm:$0xf]  ;;  %v4747_v19 = vor.u32 %v5530_v10, %v4746_v8  ;;  %v5494_v25 = vld [vmem:[%s8354_s1 + $0x8cc] sm:$0xf0]  ;;  %2564 = vmatpush.bf16.msrb.mxu3 %v4379_v17  ;;  %2539 = vmatmul.bf16.vlgmr.msrb.gmra.mxu1 %v6111_v2 }
  0x48   :  { %v5002_v15 = vld [vmem:[%s8354_s1 + $0xbe0] sm:$0xf]  ;;  %v4875_v23 = vor.u32 %v5562_v12, %v4874_v11  ;;  %v5526_v29 = vld [vmem:[%s8354_s1 + $0x9cc] sm:$0xf0]  ;;  %2570 = vmatpush.bf16.msra.mxu0 %v4619_v18  ;;  %2552 = vmatmul.bf16.vlgmr.msrb.gmra.mxu2 %v6102_v60 }
  0x49   :  { %v4602_v24 = vld [vmem:[%s8354_s1 + $0x8c0] sm:$0xf]  ;;  %v5003_v28 = vor.u32 %v5594_v16, %v5002_v15  ;;  %v5558_v31 = vld [vmem:[%s8354_s1 + $0xacc] sm:$0xf0]  ;;  %2583 = vmatpush.bf16.msra.mxu1 %v4747_v19 }
  0x4a   :  { %v4730_v27 = vld [vmem:[%s8354_s1 + $0x9c0] sm:$0xf]  ;;  %v5590_v33 = vld [vmem:[%s8354_s1 + $0xbcc] sm:$0xf0]  ;;  %v4603_v34 = vor.u32 %v5494_v25, %v4602_v24  ;;  %2596 = vmatpush.bf16.msra.mxu2 %v4875_v23  ;;  %2565 = vmatmul.bf16.vlgmr.msrb.gmra.mxu3 %v6109_v1 }
  0x4b   :  { %v4858_v30 = vld [vmem:[%s8354_s1 + $0xac0] sm:$0xf]  ;;  %v4731_v35 = vor.u32 %v5526_v29, %v4730_v27  ;;  %v5490_v38 = vld [vmem:[%s8354_s1 + $0x8ac] sm:$0xf0]  ;;  %2609 = vmatpush.bf16.msra.mxu3 %v5003_v28 }
  0x4c   :  { %v4986_v32 = vld [vmem:[%s8354_s1 + $0xbc0] sm:$0xf]  ;;  %v4859_v36 = vor.u32 %v5558_v31, %v4858_v30  ;;  %v5522_v41 = vld [vmem:[%s8354_s1 + $0x9ac] sm:$0xf0]  ;;  %2571 = vmatpush.bf16.msra.mxu0 %v4603_v34 }
  0x4d   :  { %v4586_v37 = vld [vmem:[%s8354_s1 + $0x8a0] sm:$0xf]  ;;  %v4987_v40 = vor.u32 %v5590_v33, %v4986_v32  ;;  %v5554_v43 = vld [vmem:[%s8354_s1 + $0xaac] sm:$0xf0]  ;;  %2584 = vmatpush.bf16.msra.mxu1 %v4731_v35 }
  0x4e   :  { %v4714_v39 = vld [vmem:[%s8354_s1 + $0x9a0] sm:$0xf]  ;;  %v5586_v45 = vld [vmem:[%s8354_s1 + $0xbac] sm:$0xf0]  ;;  %v4587_v46 = vor.u32 %v5490_v38, %v4586_v37  ;;  %2597 = vmatpush.bf16.msra.mxu2 %v4859_v36 }
  0x4f   :  { %v4842_v42 = vld [vmem:[%s8354_s1 + $0xaa0] sm:$0xf]  ;;  %v4715_v47 = vor.u32 %v5522_v41, %v4714_v39  ;;  %v5486_v50 = vld [vmem:[%s8354_s1 + $0x88c] sm:$0xf0]  ;;  %2610 = vmatpush.bf16.msra.mxu3 %v4987_v40 }
  0x50   :  { %v4970_v44 = vld [vmem:[%s8354_s1 + $0xba0] sm:$0xf]  ;;  %v4843_v48 = vor.u32 %v5554_v43, %v4842_v42  ;;  %v5518_v53 = vld [vmem:[%s8354_s1 + $0x98c] sm:$0xf0]  ;;  %2572 = vmatpush.bf16.msra.mxu0 %v4587_v46 }
  0x51   :  { %v4570_v49 = vld [vmem:[%s8354_s1 + $0x880] sm:$0xf]  ;;  %v4971_v52 = vor.u32 %v5586_v45, %v4970_v44  ;;  %v5550_v55 = vld [vmem:[%s8354_s1 + $0xa8c] sm:$0xf0]  ;;  %2585 = vmatpush.bf16.msra.mxu1 %v4715_v47 }
  0x52   :  { %v4698_v51 = vld [vmem:[%s8354_s1 + $0x980] sm:$0xf]  ;;  %v5582_v57 = vld [vmem:[%s8354_s1 + $0xb8c] sm:$0xf0]  ;;  %v4571_v58 = vor.u32 %v5486_v50, %v4570_v49  ;;  %2598 = vmatpush.bf16.msra.mxu2 %v4843_v48 }
  0x53   :  { %v4826_v54 = vld [vmem:[%s8354_s1 + $0xa80] sm:$0xf]  ;;  %v4699_v59 = vor.u32 %v5518_v53, %v4698_v51  ;;  %v5482_v63 = vld [vmem:[%s8354_s1 + $0x86c] sm:$0xf0]  ;;  %2611 = vmatpush.bf16.msra.mxu3 %v4971_v52  ;;  %v5240_v52 = vld [vmem:[%s8354_s1 + $0xe4] sm:$0xf] }
  0x54   :  { %v4954_v56 = vld [vmem:[%s8354_s1 + $0xb80] sm:$0xf]  ;;  %v4827_v61 = vor.u32 %v5550_v55, %v4826_v54  ;;  %v5514_v5 = vld [vmem:[%s8354_s1 + $0x96c] sm:$0xf0]  ;;  %2573 = vmatpush.bf16.msra.mxu0 %v4571_v58  ;;  %v3596_v54 = vld [vmem:[%s8354_s1 + $0xf0] sm:$0xf0] }
  0x55   :  { %v4554_v62 = vld [vmem:[%s8354_s1 + $0x860] sm:$0xf]  ;;  %v4955_v4 = vor.u32 %v5582_v57, %v4954_v56  ;;  %v5546_v7 = vld [vmem:[%s8354_s1 + $0xa6c] sm:$0xf0]  ;;  %2586 = vmatpush.bf16.msra.mxu1 %v4699_v59  ;;  %v5272_v55 = vld [vmem:[%s8354_s1 + $0x1e4] sm:$0xf] }
  0x56   :  { %v4682_v3 = vld [vmem:[%s8354_s1 + $0x960] sm:$0xf]  ;;  %v5578_v9 = vld [vmem:[%s8354_s1 + $0xb6c] sm:$0xf0]  ;;  %v4555_v10 = vor.u32 %v5482_v63, %v4554_v62  ;;  %2599 = vmatpush.bf16.msra.mxu2 %v4827_v61  ;;  %v3724_v56 = vld [vmem:[%s8354_s1 + $0x1f0] sm:$0xf0] }
  0x57   :  { %v4810_v6 = vld [vmem:[%s8354_s1 + $0xa60] sm:$0xf]  ;;  %v4683_v11 = vor.u32 %v5514_v5, %v4682_v3  ;;  %v5478_v14 = vld [vmem:[%s8354_s1 + $0x84c] sm:$0xf0]  ;;  %2612 = vmatpush.bf16.msra.mxu3 %v4955_v4  ;;  %v5304_v59 = vld [vmem:[%s8354_s1 + $0x2e4] sm:$0xf]  ;;  %v3599_v3 = vor.u32 %v5240_v52, %v3596_v54  ;;  %v3727_v4 = vor.u32 %v5272_v55, %v3724_v56 }
  0x58   :  { %v4938_v8 = vld [vmem:[%s8354_s1 + $0xb60] sm:$0xf]  ;;  %v4811_v12 = vor.u32 %v5546_v7, %v4810_v6  ;;  %v5510_v17 = vld [vmem:[%s8354_s1 + $0x94c] sm:$0xf0]  ;;  %2574 = vmatpush.bf16.msra.mxu0 %v4555_v10  ;;  %v3852_v61 = vld [vmem:[%s8354_s1 + $0x2f0] sm:$0xf0] }
  0x59   :  { %v4538_v13 = vld [vmem:[%s8354_s1 + $0x840] sm:$0xf]  ;;  %v4939_v16 = vor.u32 %v5578_v9, %v4938_v8  ;;  %v5542_v19 = vld [vmem:[%s8354_s1 + $0xa4c] sm:$0xf0]  ;;  %2587 = vmatpush.bf16.msra.mxu1 %v4683_v11  ;;  %v5236_v8 = vld [vmem:[%s8354_s1 + $0xc4] sm:$0xf]  ;;  %v3855_v9 = vor.u32 %v5304_v59, %v3852_v61 }
  0x5a   :  { %v4666_v15 = vld [vmem:[%s8354_s1 + $0x940] sm:$0xf]  ;;  %v5574_v24 = vld [vmem:[%s8354_s1 + $0xb4c] sm:$0xf0]  ;;  %v4539_v25 = vor.u32 %v5478_v14, %v4538_v13  ;;  %2600 = vmatpush.bf16.msra.mxu2 %v4811_v12  ;;  %v3580_v10 = vld [vmem:[%s8354_s1 + $0xd0] sm:$0xf0] }
  0x5b   :  { %v4794_v18 = vld [vmem:[%s8354_s1 + $0xa40] sm:$0xf]  ;;  %v4667_v27 = vor.u32 %v5510_v17, %v4666_v15  ;;  %v5474_v30 = vld [vmem:[%s8354_s1 + $0x82c] sm:$0xf0]  ;;  %2613 = vmatpush.bf16.msra.mxu3 %v4939_v16  ;;  %v5268_v11 = vld [vmem:[%s8354_s1 + $0x1c4] sm:$0xf] }
  0x5c   :  { %v4922_v23 = vld [vmem:[%s8354_s1 + $0xb40] sm:$0xf]  ;;  %v4795_v28 = vor.u32 %v5542_v19, %v4794_v18  ;;  %v5506_v33 = vld [vmem:[%s8354_s1 + $0x92c] sm:$0xf0]  ;;  %2575 = vmatpush.bf16.msra.mxu0 %v4539_v25  ;;  %v3708_v12 = vld [vmem:[%s8354_s1 + $0x1d0] sm:$0xf0] }
  0x5d   :  { %v4522_v29 = vld [vmem:[%s8354_s1 + $0x820] sm:$0xf]  ;;  %v4923_v32 = vor.u32 %v5574_v24, %v4922_v23  ;;  %v5538_v35 = vld [vmem:[%s8354_s1 + $0xa2c] sm:$0xf0]  ;;  %2588 = vmatpush.bf16.msra.mxu1 %v4667_v27  ;;  %v5300_v14 = vld [vmem:[%s8354_s1 + $0x2c4] sm:$0xf]  ;;  %v3583_v23 = vor.u32 %v5236_v8, %v3580_v10  ;;  %v3711_v24 = vor.u32 %v5268_v11, %v3708_v12 }
  0x5e   :  { %v4650_v31 = vld [vmem:[%s8354_s1 + $0x920] sm:$0xf]  ;;  %v5570_v37 = vld [vmem:[%s8354_s1 + $0xb2c] sm:$0xf0]  ;;  %v4523_v38 = vor.u32 %v5474_v30, %v4522_v29  ;;  %2601 = vmatpush.bf16.msra.mxu2 %v4795_v28  ;;  %v3836_v15 = vld [vmem:[%s8354_s1 + $0x2d0] sm:$0xf0] }
  0x5f   :  { %v4778_v34 = vld [vmem:[%s8354_s1 + $0xa20] sm:$0xf]  ;;  %v5470_v40 = vld [vmem:[%s8354_s1 + $0x80c] sm:$0xf0]  ;;  %v4651_v41 = vor.u32 %v5506_v33, %v4650_v31  ;;  %2614 = vmatpush.bf16.msra.mxu3 %v4923_v32  ;;  %v5232_v27 = vld [vmem:[%s8354_s1 + $0xa4] sm:$0xf]  ;;  %v3839_v29 = vor.u32 %v5300_v14, %v3836_v15 }
  0x60   :  { %v4906_v36 = vld [vmem:[%s8354_s1 + $0xb20] sm:$0xf]  ;;  %v4779_v42 = vor.u32 %v5538_v35, %v4778_v34  ;;  %v5502_v44 = vld [vmem:[%s8354_s1 + $0x90c] sm:$0xf0]  ;;  %2576 = vmatpush.bf16.msra.mxu0 %v4523_v38  ;;  %v3564_v28 = vld [vmem:[%s8354_s1 + $0xb0] sm:$0xf0] }
  0x61   :  { %v4506_v39 = vld [vmem:[%s8354_s1 + $0x800] sm:$0xf]  ;;  %v4907_v46 = vor.u32 %v5570_v37, %v4906_v36  ;;  %v5534_v47 = vld [vmem:[%s8354_s1 + $0xa0c] sm:$0xf0]  ;;  %2589 = vmatpush.bf16.msra.mxu1 %v4651_v41  ;;  %v5264_v30 = vld [vmem:[%s8354_s1 + $0x1a4] sm:$0xf] }
  0x62   :  { %v4634_v43 = vld [vmem:[%s8354_s1 + $0x900] sm:$0xf]  ;;  %v5566_v49 = vld [vmem:[%s8354_s1 + $0xb0c] sm:$0xf0]  ;;  %v4507_v53 = vor.u32 %v5470_v40, %v4506_v39  ;;  %2602 = vmatpush.bf16.msra.mxu2 %v4779_v42  ;;  %v3692_v31 = vld [vmem:[%s8354_s1 + $0x1b0] sm:$0xf0] }
  0x63   :  { %v4762_v45 = vld [vmem:[%s8354_s1 + $0xa00] sm:$0xf]  ;;  %v5610_v51 = vld [vmem:[%s8354_s1 + $0xc6c] sm:$0xf0]  ;;  %v4635_v57 = vor.u32 %v5502_v44, %v4634_v43  ;;  %2615 = vmatpush.bf16.msra.mxu3 %v4907_v46  ;;  %v5296_v32 = vld [vmem:[%s8354_s1 + $0x2a4] sm:$0xf] }
  0x64   :  { %v4890_v48 = vld [vmem:[%s8354_s1 + $0xb00] sm:$0xf]  ;;  %v4763_v58 = vor.u32 %v5534_v47, %v4762_v45  ;;  %v5606_v7 = vld [vmem:[%s8354_s1 + $0xc4c] sm:$0xf0]  ;;  %2577 = vmatpush.bf16.msra.mxu0 %v4507_v53  ;;  %v3820_v33 = vld [vmem:[%s8354_s1 + $0x2b0] sm:$0xf0] }
  0x65   :  { %v5066_v50 = vld [vmem:[%s8354_s1 + $0xc60] sm:$0xf]  ;;  %v4891_v62 = vor.u32 %v5566_v49, %v4890_v48  ;;  %2590 = vmatpush.bf16.msra.mxu1 %v4635_v57  ;;  %v6359_v13 = vld [vmem:[#allocation1 + $0x12] sm:$0xff]  ;;  %v6367_v16 = vld [vmem:[#allocation1 + $0x9] sm:$0xff] }
  0x66   :  { %v5067_v63 = vor.u32 %v5610_v51, %v5066_v50  ;;  %v6339_v5 = vld [vmem:[#allocation1] sm:$0xff]  ;;  %2603 = vmatpush.bf16.msra.mxu2 %v4763_v58  ;;  %v5602_v25 = vld [vmem:[%s8354_s1 + $0xc2c] sm:$0xf0] }
  0x67   :  { %v5050_v6 = vld [vmem:[%s8354_s1 + $0xc40] sm:$0xf]  ;;  %2616 = vmatpush.bf16.msra.mxu3 %v4891_v62  ;;  %2578 = vmatmul.bf16.vlgmr.msra.gmra.mxu0 %v6339_v5 }
  0x68   :  { %2626 = vmatpush.bf16.msrb.mxu0 %v5067_v63  ;;  %v6369_v17 = vld [vmem:[#allocation1 + $0x1b] sm:$0xff]  ;;  %v5051_v18 = vor.u32 %v5606_v7, %v5050_v6  ;;  %2591 = vmatmul.bf16.vlgmr.msra.gmra.mxu1 %v6367_v16 }
  0x69   :  { %v5034_v19 = vld [vmem:[%s8354_s1 + $0xc20] sm:$0xf]  ;;  %2635 = vmatpush.bf16.msrb.mxu1 %v3599_v3  ;;  %2604 = vmatmul.bf16.vlgmr.msra.gmra.mxu2 %v6359_v13 }
  0x6a   :  { %2648 = vmatpush.bf16.msrb.mxu2 %v3727_v4 }
  0x6b   :  { %2661 = vmatpush.bf16.msrb.mxu3 %v3855_v9 }
  0x6c   :  { %10 = vsyncpa [#allocation3], 0  ;;  %2617 = vmatmul.bf16.vlgmr.msra.gmra.mxu3 %v6369_v17  ;;  %2627 = vmatpush.bf16.msrb.mxu0 %v5051_v18  ;;  %v5035_v34 = vor.u32 %v5602_v25, %v5034_v19  ;;  %v5018_v35 = vld [vmem:[%s8354_s1 + $0xc00] sm:$0xf]  ;;  %v3567_v36 = vor.u32 %v5232_v27, %v3564_v28  ;;  %v3695_v37 = vor.u32 %v5264_v30, %v3692_v31  ;;  %v5598_v38 = vld [vmem:[%s8354_s1 + $0xc0c] sm:$0xf0] }
  0x6d   :  { %2636 = vmatpush.bf16.msrb.mxu1 %v3583_v23  ;;  %v5228_v39 = vld [vmem:[%s8354_s1 + $0x84] sm:$0xf]  ;;  %v3548_v40 = vld [vmem:[%s8354_s1 + $0x90] sm:$0xf0]  ;;  %v3823_v41 = vor.u32 %v5296_v32, %v3820_v33  ;;  %v5019_v48 = vor.u32 %v5598_v38, %v5018_v35  ;;  %vm2463_vm0 = vcmask 523264   ;;  %s5678_s6 = smov [#allocation2]  }
  0x6e   :  { %2649 = vmatpush.bf16.msrb.mxu2 %v3711_v24  ;;  %v5260_v42 = vld [vmem:[%s8354_s1 + $0x184] sm:$0xf]  ;;  %v3676_v43 = vld [vmem:[%s8354_s1 + $0x190] sm:$0xf0]  ;;  %v3551_v49 = vor.u32 %v5228_v39, %v3548_v40  ;;  %s3469_s7 = sshll.u32 %s5678_s6, 4  ;;  %s3471_s10 = sshll.u32 %s8358_s5, 4  ;;  %s3470_s7 = int_to_ptr.vmem [resolvable:$true] %s3469_s7  ;;  %s3472_s10 = int_to_ptr.hbm [resolvable:$true] %s3471_s10 }
  0x6f   :  { %2662 = vmatpush.bf16.msrb.mxu3 %v3839_v29  ;;  %v5292_v44 = vld [vmem:[%s8354_s1 + $0x284] sm:$0xf]  ;;  %v3804_v45 = vld [vmem:[%s8354_s1 + $0x290] sm:$0xf0]  ;;  %v3679_v50 = vor.u32 %v5260_v42, %v3676_v43  ;;  %vm3462_vm1 = vcmask 9216  }
  0x70   :  { %v5336_v46 = vld [vmem:[%s8354_s1 + $0x3e4] sm:$0xf]  ;;  %v3980_v47 = vld [vmem:[%s8354_s1 + $0x3f0] sm:$0xf0]  ;;  %2628 = vmatpush.bf16.msrb.mxu0 %v5035_v34  ;;  %v3807_v53 = vor.u32 %v5292_v44, %v3804_v45 }
  0x71   :  { %2637 = vmatpush.bf16.msrb.mxu1 %v3567_v36  ;;  %v5224_v51 = vld [vmem:[%s8354_s1 + $0x64] sm:$0xf]  ;;  %v3532_v52 = vld [vmem:[%s8354_s1 + $0x70] sm:$0xf0]  ;;  %v3983_v54 = vor.u32 %v5336_v46, %v3980_v47 }
  0x72   :  { %2650 = vmatpush.bf16.msrb.mxu2 %v3695_v37  ;;  %v5256_v55 = vld [vmem:[%s8354_s1 + $0x164] sm:$0xf]  ;;  %v3660_v56 = vld [vmem:[%s8354_s1 + $0x170] sm:$0xf0]  ;;  %v3535_v62 = vor.u32 %v5224_v51, %v3532_v52 }
  0x73   :  { %2663 = vmatpush.bf16.msrb.mxu3 %v3823_v41  ;;  %v5288_v57 = vld [vmem:[%s8354_s1 + $0x264] sm:$0xf]  ;;  %v3788_v58 = vld [vmem:[%s8354_s1 + $0x270] sm:$0xf0]  ;;  %v3663_v63 = vor.u32 %v5256_v55, %v3660_v56 }
  0x74   :  { %v5332_v59 = vld [vmem:[%s8354_s1 + $0x3c4] sm:$0xf]  ;;  %v3964_v61 = vld [vmem:[%s8354_s1 + $0x3d0] sm:$0xf0]  ;;  %2629 = vmatpush.bf16.msrb.mxu0 %v5019_v48  ;;  %v3791_v6 = vor.u32 %v5288_v57, %v3788_v58 }
  0x75   :  { %2638 = vmatpush.bf16.msrb.mxu1 %v3551_v49  ;;  %v5220_v3 = vld [vmem:[%s8354_s1 + $0x44] sm:$0xf]  ;;  %v3516_v4 = vld [vmem:[%s8354_s1 + $0x50] sm:$0xf0]  ;;  %v3967_v7 = vor.u32 %v5332_v59, %v3964_v61 }
  0x76   :  { %2651 = vmatpush.bf16.msrb.mxu2 %v3679_v50  ;;  %v5252_v8 = vld [vmem:[%s8354_s1 + $0x144] sm:$0xf]  ;;  %v3644_v9 = vld [vmem:[%s8354_s1 + $0x150] sm:$0xf0]  ;;  %v3519_v18 = vor.u32 %v5220_v3, %v3516_v4 }
  0x77   :  { %2664 = vmatpush.bf16.msrb.mxu3 %v3807_v53  ;;  %v5284_v10 = vld [vmem:[%s8354_s1 + $0x244] sm:$0xf]  ;;  %v3772_v11 = vld [vmem:[%s8354_s1 + $0x250] sm:$0xf0]  ;;  %v3647_v19 = vor.u32 %v5252_v8, %v3644_v9 }
  0x78   :  { %2674 = vmatpush.bf16.msra.mxu0 %v3983_v54  ;;  %v5328_v12 = vld [vmem:[%s8354_s1 + $0x3a4] sm:$0xf]  ;;  %v3948_v14 = vld [vmem:[%s8354_s1 + $0x3b0] sm:$0xf0]  ;;  %v3775_v25 = vor.u32 %v5284_v10, %v3772_v11 }
  0x79   :  { %v6477_v15 = vld [vmem:[#allocation1 + $0x24] sm:$0xff]  ;;  %2639 = vmatpush.bf16.msrb.mxu1 %v3535_v62  ;;  %v3500_v24 = vld [vmem:[%s8354_s1 + $0x30] sm:$0xf0]  ;;  %v3951_v27 = vor.u32 %v5328_v12, %v3948_v14 }
  0x7a   :  { %2652 = vmatpush.bf16.msrb.mxu2 %v3663_v63  ;;  %v5216_v23 = vld [vmem:[%s8354_s1 + $0x24] sm:$0xf]  ;;  %v3628_v29 = vld [vmem:[%s8354_s1 + $0x130] sm:$0xf0]  ;;  %5080 = vmatmul.msk.bf16.vlgmr.msrb.gmra.mxu0 %vm2463_vm0, %v6477_v15 }
  0x7b   :  { %2665 = vmatpush.bf16.msrb.mxu3 %v3791_v6  ;;  %v5248_v28 = vld [vmem:[%s8354_s1 + $0x124] sm:$0xf]  ;;  %v3756_v31 = vld [vmem:[%s8354_s1 + $0x230] sm:$0xf0]  ;;  %v3503_v34 = vor.u32 %v5216_v23, %v3500_v24 }
  0x7c   :  { %2675 = vmatpush.bf16.msra.mxu0 %v3967_v7  ;;  %v5280_v30 = vld [vmem:[%s8354_s1 + $0x224] sm:$0xf]  ;;  %v3932_v33 = vld [vmem:[%s8354_s1 + $0x390] sm:$0xf0]  ;;  %v3631_v35 = vor.u32 %v5248_v28, %v3628_v29 }
  0x7d   :  { %v5324_v32 = vld [vmem:[%s8354_s1 + $0x384] sm:$0xf]  ;;  %2640 = vmatpush.bf16.msrb.mxu1 %v3519_v18  ;;  %v3484_v37 = vld [vmem:[%s8354_s1 + $0x10] sm:$0xf0]  ;;  %v3759_v39 = vor.u32 %v5280_v30, %v3756_v31 }
  0x7e   :  { %2653 = vmatpush.bf16.msrb.mxu2 %v3647_v19  ;;  %v5212_v36 = vld [vmem:[%s8354_s1 + $0x4] sm:$0xf]  ;;  %v3935_v40 = vor.u32 %v5324_v32, %v3932_v33  ;;  %v3612_v41 = vld [vmem:[%s8354_s1 + $0x110] sm:$0xf0] }
  0x7f   :  { %v5244_v38 = vld [vmem:[%s8354_s1 + $0x104] sm:$0xf]  ;;  %2666 = vmatpush.bf16.msrb.mxu3 %v3775_v25  ;;  %v3740_v43 = vld [vmem:[%s8354_s1 + $0x210] sm:$0xf0]  ;;  %v3487_v50 = vor.u32 %v5212_v36, %v3484_v37 }
  0x80   :  { %2676 = vmatpush.bf16.msra.mxu0 %v3951_v27  ;;  %v5276_v42 = vld [vmem:[%s8354_s1 + $0x204] sm:$0xf]  ;;  %v3916_v45 = vld [vmem:[%s8354_s1 + $0x370] sm:$0xf0]  ;;  %v3615_v51 = vor.u32 %v5244_v38, %v3612_v41 }
  0x81   :  { %v5320_v44 = vld [vmem:[%s8354_s1 + $0x364] sm:$0xf]  ;;  %v4108_v47 = vld [vmem:[%s8354_s1 + $0x4f0] sm:$0xf0]  ;;  %2641 = vmatpush.bf16.msrb.mxu1 %v3503_v34  ;;  %v3743_v54 = vor.u32 %v5276_v42, %v3740_v43 }
  0x82   :  { %v5368_v46 = vld [vmem:[%s8354_s1 + $0x4e4] sm:$0xf]  ;;  %v4236_v49 = vld [vmem:[%s8354_s1 + $0x5f0] sm:$0xf0]  ;;  %2654 = vmatpush.bf16.msrb.mxu2 %v3631_v35  ;;  %v3919_v55 = vor.u32 %v5320_v44, %v3916_v45 }
  0x83   :  { %v5400_v48 = vld [vmem:[%s8354_s1 + $0x5e4] sm:$0xf]  ;;  %v4364_v53 = vld [vmem:[%s8354_s1 + $0x6f0] sm:$0xf0]  ;;  %2667 = vmatpush.bf16.msrb.mxu3 %v3759_v39  ;;  %v4111_v56 = vor.u32 %v5368_v46, %v4108_v47 }
  0x84   :  { %v5432_v52 = vld [vmem:[%s8354_s1 + $0x6e4] sm:$0xf]  ;;  %2677 = vmatpush.bf16.msra.mxu0 %v3935_v40  ;;  %v4239_v57 = vor.u32 %v5400_v48, %v4236_v49  ;;  %v3900_v59 = vld [vmem:[%s8354_s1 + $0x350] sm:$0xf0] }
  0x85   :  { %v5316_v58 = vld [vmem:[%s8354_s1 + $0x344] sm:$0xf]  ;;  %v4367_v62 = vor.u32 %v5432_v52, %v4364_v53  ;;  %v4092_v63 = vld [vmem:[%s8354_s1 + $0x4d0] sm:$0xf0]  ;;  %2642 = vmatpush.bf16.msrb.mxu1 %v3487_v50 }
  0x86   :  { %v5364_v61 = vld [vmem:[%s8354_s1 + $0x4c4] sm:$0xf]  ;;  %v4220_v4 = vld [vmem:[%s8354_s1 + $0x5d0] sm:$0xf0]  ;;  %2655 = vmatpush.bf16.msrb.mxu2 %v3615_v51  ;;  %v3903_v8 = vor.u32 %v5316_v58, %v3900_v59 }
  0x87   :  { %v5396_v3 = vld [vmem:[%s8354_s1 + $0x5c4] sm:$0xf]  ;;  %v4348_v7 = vld [vmem:[%s8354_s1 + $0x6d0] sm:$0xf0]  ;;  %2668 = vmatpush.bf16.msrb.mxu3 %v3743_v54  ;;  %v4095_v9 = vor.u32 %v5364_v61, %v4092_v63 }
  0x88   :  { %v5428_v6 = vld [vmem:[%s8354_s1 + $0x6c4] sm:$0xf]  ;;  %2678 = vmatpush.bf16.msra.mxu0 %v3919_v55  ;;  %v4223_v10 = vor.u32 %v5396_v3, %v4220_v4  ;;  %v3884_v12 = vld [vmem:[%s8354_s1 + $0x330] sm:$0xf0]  ;;  %2643 = vmatmul.bf16.vlgmr.msrb.gmra.mxu1 %v6014_v21 }
  0x89   :  { %2687 = vmatpush.bf16.msra.mxu1 %v4111_v56  ;;  %v5312_v11 = vld [vmem:[%s8354_s1 + $0x324] sm:$0xf]  ;;  %v4351_v18 = vor.u32 %v5428_v6, %v4348_v7  ;;  %v4076_v19 = vld [vmem:[%s8354_s1 + $0x4b0] sm:$0xf0]  ;;  %2656 = vmatmul.bf16.vlgmr.msrb.gmra.mxu2 %v6025_v26 }
  0x8a   :  { %2700 = vmatpush.bf16.msra.mxu2 %v4239_v57  ;;  %v5360_v14 = vld [vmem:[%s8354_s1 + $0x4a4] sm:$0xf]  ;;  %v4204_v24 = vld [vmem:[%s8354_s1 + $0x5b0] sm:$0xf0]  ;;  %2669 = vmatmul.bf16.vlgmr.msrb.gmra.mxu3 %v6012_v20  ;;  %v3887_v28 = vor.u32 %v5312_v11, %v3884_v12 }
  0x8b   :  { %2713 = vmatpush.bf16.msra.mxu3 %v4367_v62  ;;  %v5392_v23 = vld [vmem:[%s8354_s1 + $0x5a4] sm:$0xf]  ;;  %v4332_v27 = vld [vmem:[%s8354_s1 + $0x6b0] sm:$0xf0]  ;;  %v4079_v30 = vor.u32 %v5360_v14, %v4076_v19 }
  0x8c   :  { %v5424_v25 = vld [vmem:[%s8354_s1 + $0x6a4] sm:$0xf]  ;;  %2679 = vmatpush.bf16.msra.mxu0 %v3903_v8  ;;  %v4207_v31 = vor.u32 %v5392_v23, %v4204_v24  ;;  %v3868_v32 = vld [vmem:[%s8354_s1 + $0x310] sm:$0xf0] }
  0x8d   :  { %v5308_v29 = vld [vmem:[%s8354_s1 + $0x304] sm:$0xf]  ;;  %2688 = vmatpush.bf16.msra.mxu1 %v4095_v9  ;;  %v4060_v34 = vld [vmem:[%s8354_s1 + $0x490] sm:$0xf0]  ;;  %v4335_v35 = vor.u32 %v5424_v25, %v4332_v27 }
  0x8e   :  { %2701 = vmatpush.bf16.msra.mxu2 %v4223_v10  ;;  %v5356_v33 = vld [vmem:[%s8354_s1 + $0x484] sm:$0xf]  ;;  %v4188_v37 = vld [vmem:[%s8354_s1 + $0x590] sm:$0xf0]  ;;  %v3871_v42 = vor.u32 %v5308_v29, %v3868_v32 }
  0x8f   :  { %2714 = vmatpush.bf16.msra.mxu3 %v4351_v18  ;;  %v5388_v36 = vld [vmem:[%s8354_s1 + $0x584] sm:$0xf]  ;;  %v4316_v39 = vld [vmem:[%s8354_s1 + $0x690] sm:$0xf0]  ;;  %v4063_v43 = vor.u32 %v5356_v33, %v4060_v34 }
  0x90   :  { %v5420_v38 = vld [vmem:[%s8354_s1 + $0x684] sm:$0xf]  ;;  %v4492_v41 = vld [vmem:[%s8354_s1 + $0x7f0] sm:$0xf0]  ;;  %2680 = vmatpush.bf16.msra.mxu0 %v3887_v28  ;;  %v4191_v44 = vor.u32 %v5388_v36, %v4188_v37 }
  0x91   :  { %v5464_v40 = vld [vmem:[%s8354_s1 + $0x7e4] sm:$0xf]  ;;  %2689 = vmatpush.bf16.msra.mxu1 %v4079_v30  ;;  %v4044_v46 = vld [vmem:[%s8354_s1 + $0x470] sm:$0xf0]  ;;  %v4319_v47 = vor.u32 %v5420_v38, %v4316_v39 }
  0x92   :  { %2702 = vmatpush.bf16.msra.mxu2 %v4207_v31  ;;  %v5352_v45 = vld [vmem:[%s8354_s1 + $0x464] sm:$0xf]  ;;  %v4495_v48 = vor.u32 %v5464_v40, %v4492_v41  ;;  %v4172_v50 = vld [vmem:[%s8354_s1 + $0x570] sm:$0xf0] }
  0x93   :  { %2715 = vmatpush.bf16.msra.mxu3 %v4335_v35  ;;  %v5384_v49 = vld [vmem:[%s8354_s1 + $0x564] sm:$0xf]  ;;  %v4300_v52 = vld [vmem:[%s8354_s1 + $0x670] sm:$0xf0]  ;;  %v4047_v55 = vor.u32 %v5352_v45, %v4044_v46 }
  0x94   :  { %v5416_v51 = vld [vmem:[%s8354_s1 + $0x664] sm:$0xf]  ;;  %v4476_v54 = vld [vmem:[%s8354_s1 + $0x7d0] sm:$0xf0]  ;;  %2681 = vmatpush.bf16.msra.mxu0 %v3871_v42  ;;  %v4175_v56 = vor.u32 %v5384_v49, %v4172_v50 }
  0x95   :  { %v5460_v53 = vld [vmem:[%s8354_s1 + $0x7c4] sm:$0xf]  ;;  %2690 = vmatpush.bf16.msra.mxu1 %v4063_v43  ;;  %v4028_v58 = vld [vmem:[%s8354_s1 + $0x450] sm:$0xf0]  ;;  %v4303_v59 = vor.u32 %v5416_v51, %v4300_v52 }
  0x96   :  { %2703 = vmatpush.bf16.msra.mxu2 %v4191_v44  ;;  %v5348_v57 = vld [vmem:[%s8354_s1 + $0x444] sm:$0xf]  ;;  %v4479_v61 = vor.u32 %v5460_v53, %v4476_v54  ;;  %v4156_v63 = vld [vmem:[%s8354_s1 + $0x550] sm:$0xf0] }
  0x97   :  { %2716 = vmatpush.bf16.msra.mxu3 %v4319_v47  ;;  %v5380_v62 = vld [vmem:[%s8354_s1 + $0x544] sm:$0xf]  ;;  %v4284_v4 = vld [vmem:[%s8354_s1 + $0x650] sm:$0xf0]  ;;  %2682 = vmatmul.bf16.vlgmr.msra.gmra.mxu0 %v6016_v22  ;;  %v4031_v8 = vor.u32 %v5348_v57, %v4028_v58 }
  0x98   :  { %2726 = vmatpush.bf16.msrb.mxu0 %v4495_v48  ;;  %v5412_v3 = vld [vmem:[%s8354_s1 + $0x644] sm:$0xf]  ;;  %v4460_v7 = vld [vmem:[%s8354_s1 + $0x7b0] sm:$0xf0]  ;;  %v4159_v9 = vor.u32 %v5380_v62, %v4156_v63 }
  0x99   :  { %v5456_v6 = vld [vmem:[%s8354_s1 + $0x7a4] sm:$0xf]  ;;  %2691 = vmatpush.bf16.msra.mxu1 %v4047_v55  ;;  %v4012_v11 = vld [vmem:[%s8354_s1 + $0x430] sm:$0xf0]  ;;  %v4287_v12 = vor.u32 %v5412_v3, %v4284_v4 }
  0x9a   :  { %2704 = vmatpush.bf16.msra.mxu2 %v4175_v56  ;;  %v5344_v10 = vld [vmem:[%s8354_s1 + $0x424] sm:$0xf]  ;;  %v4463_v14 = vor.u32 %v5456_v6, %v4460_v7  ;;  %v4140_v19 = vld [vmem:[%s8354_s1 + $0x530] sm:$0xf0] }
  0x9b   :  { %2717 = vmatpush.bf16.msra.mxu3 %v4303_v59  ;;  %v5376_v18 = vld [vmem:[%s8354_s1 + $0x524] sm:$0xf]  ;;  %v4268_v24 = vld [vmem:[%s8354_s1 + $0x630] sm:$0xf0]  ;;  %v4015_v28 = vor.u32 %v5344_v10, %v4012_v11 }
  0x9c   :  { %2727 = vmatpush.bf16.msrb.mxu0 %v4479_v61  ;;  %v5408_v23 = vld [vmem:[%s8354_s1 + $0x624] sm:$0xf]  ;;  %v4444_v27 = vld [vmem:[%s8354_s1 + $0x790] sm:$0xf0]  ;;  %v4143_v29 = vor.u32 %v5376_v18, %v4140_v19 }
  0x9d   :  { %v5452_v25 = vld [vmem:[%s8354_s1 + $0x784] sm:$0xf]  ;;  %2692 = vmatpush.bf16.msra.mxu1 %v4031_v8  ;;  %v3996_v31 = vld [vmem:[%s8354_s1 + $0x410] sm:$0xf0]  ;;  %v4271_v33 = vor.u32 %v5408_v23, %v4268_v24 }
  0x9e   :  { %2705 = vmatpush.bf16.msra.mxu2 %v4159_v9  ;;  %v5340_v30 = vld [vmem:[%s8354_s1 + $0x404] sm:$0xf]  ;;  %v4447_v34 = vor.u32 %v5452_v25, %v4444_v27  ;;  %v4124_v35 = vld [vmem:[%s8354_s1 + $0x510] sm:$0xf0] }
  0x9f   :  { %v5372_v32 = vld [vmem:[%s8354_s1 + $0x504] sm:$0xf]  ;;  %2718 = vmatpush.bf16.msra.mxu3 %v4287_v12  ;;  %v4252_v37 = vld [vmem:[%s8354_s1 + $0x610] sm:$0xf0]  ;;  %v3999_v44 = vor.u32 %v5340_v30, %v3996_v31 }
  0xa0   :  { %2728 = vmatpush.bf16.msrb.mxu0 %v4463_v14  ;;  %v5404_v36 = vld [vmem:[%s8354_s1 + $0x604] sm:$0xf]  ;;  %v4428_v39 = vld [vmem:[%s8354_s1 + $0x770] sm:$0xf0]  ;;  %v4127_v45 = vor.u32 %v5372_v32, %v4124_v35 }
  0xa1   :  { %v5448_v38 = vld [vmem:[%s8354_s1 + $0x764] sm:$0xf]  ;;  %v4620_v41 = vld [vmem:[%s8354_s1 + $0x8f0] sm:$0xf0]  ;;  %2693 = vmatpush.bf16.msra.mxu1 %v4015_v28  ;;  %v4255_v48 = vor.u32 %v5404_v36, %v4252_v37 }
  0xa2   :  { %v5496_v40 = vld [vmem:[%s8354_s1 + $0x8e4] sm:$0xf]  ;;  %v4748_v43 = vld [vmem:[%s8354_s1 + $0x9f0] sm:$0xf0]  ;;  %2706 = vmatpush.bf16.msra.mxu2 %v4143_v29  ;;  %v4431_v49 = vor.u32 %v5448_v38, %v4428_v39 }
  0xa3   :  { %v5528_v42 = vld [vmem:[%s8354_s1 + $0x9e4] sm:$0xf]  ;;  %v4876_v47 = vld [vmem:[%s8354_s1 + $0xaf0] sm:$0xf0]  ;;  %2719 = vmatpush.bf16.msra.mxu3 %v4271_v33  ;;  %v4623_v50 = vor.u32 %v5496_v40, %v4620_v41 }
  0xa4   :  { %v5560_v46 = vld [vmem:[%s8354_s1 + $0xae4] sm:$0xf]  ;;  %2729 = vmatpush.bf16.msrb.mxu0 %v4447_v34  ;;  %v4751_v51 = vor.u32 %v5528_v42, %v4748_v43  ;;  %v4412_v53 = vld [vmem:[%s8354_s1 + $0x750] sm:$0xf0] }
  0xa5   :  { %v5444_v52 = vld [vmem:[%s8354_s1 + $0x744] sm:$0xf]  ;;  %v4879_v55 = vor.u32 %v5560_v46, %v4876_v47  ;;  %v4604_v56 = vld [vmem:[%s8354_s1 + $0x8d0] sm:$0xf0]  ;;  %2694 = vmatpush.bf16.msra.mxu1 %v3999_v44  ;;  %v6842_v46 = vld [vmem:[%s8355_s2] sm:$0xf] }
  0xa6   :  { %v5492_v54 = vld [vmem:[%s8354_s1 + $0x8c4] sm:$0xf]  ;;  %v4732_v58 = vld [vmem:[%s8354_s1 + $0x9d0] sm:$0xf0]  ;;  %2707 = vmatpush.bf16.msra.mxu2 %v4127_v45  ;;  %v4415_v62 = vor.u32 %v5444_v52, %v4412_v53 }
  0xa7   :  { %v5524_v57 = vld [vmem:[%s8354_s1 + $0x9c4] sm:$0xf]  ;;  %v4860_v61 = vld [vmem:[%s8354_s1 + $0xad0] sm:$0xf0]  ;;  %2720 = vmatpush.bf16.msra.mxu3 %v4255_v48  ;;  %v4607_v63 = vor.u32 %v5492_v54, %v4604_v56  ;;  %v426_v54 = vperm.slane %v6842_v46, 0 }
  0xa8   :  { %v5556_v59 = vld [vmem:[%s8354_s1 + $0xac4] sm:$0xf]  ;;  %2730 = vmatpush.bf16.msrb.mxu0 %v4431_v49  ;;  %v4735_v3 = vor.u32 %v5524_v57, %v4732_v58  ;;  %v4396_v6 = vld [vmem:[%s8354_s1 + $0x730] sm:$0xf0]  ;;  %2695 = vmatmul.bf16.vlgmr.msra.gmra.mxu1 %v6107_v0 }
  0xa9   :  { %2739 = vmatpush.bf16.msrb.mxu1 %v4623_v50  ;;  %v5440_v4 = vld [vmem:[%s8354_s1 + $0x724] sm:$0xf]  ;;  %v4863_v8 = vor.u32 %v5556_v59, %v4860_v61  ;;  %2708 = vmatmul.bf16.vlgmr.msra.gmra.mxu2 %v6111_v2  ;;  %v4588_v9 = vld [vmem:[%s8354_s1 + $0x8b0] sm:$0xf0] }
  0xaa   :  { %2752 = vmatpush.bf16.msrb.mxu2 %v4751_v51  ;;  %v5488_v7 = vld [vmem:[%s8354_s1 + $0x8a4] sm:$0xf]  ;;  %v4716_v11 = vld [vmem:[%s8354_s1 + $0x9b0] sm:$0xf0]  ;;  %2721 = vmatmul.bf16.vlgmr.msra.gmra.mxu3 %v6102_v60  ;;  %v4399_v18 = vor.u32 %v5440_v4, %v4396_v6 }
  0xab   :  { %2765 = vmatpush.bf16.msrb.mxu3 %v4879_v55  ;;  %v5520_v10 = vld [vmem:[%s8354_s1 + $0x9a4] sm:$0xf]  ;;  %v4844_v14 = vld [vmem:[%s8354_s1 + $0xab0] sm:$0xf0]  ;;  %v4591_v23 = vor.u32 %v5488_v7, %v4588_v9 }
  0xac   :  { %v5552_v12 = vld [vmem:[%s8354_s1 + $0xaa4] sm:$0xf]  ;;  %2731 = vmatpush.bf16.msrb.mxu0 %v4415_v62  ;;  %v4719_v24 = vor.u32 %v5520_v10, %v4716_v11  ;;  %v4380_v25 = vld [vmem:[%s8354_s1 + $0x710] sm:$0xf0] }
  0xad   :  { %v5436_v19 = vld [vmem:[%s8354_s1 + $0x704] sm:$0xf]  ;;  %2740 = vmatpush.bf16.msrb.mxu1 %v4607_v63  ;;  %v4572_v28 = vld [vmem:[%s8354_s1 + $0x890] sm:$0xf0]  ;;  %v4847_v29 = vor.u32 %v5552_v12, %v4844_v14 }
  0xae   :  { %2753 = vmatpush.bf16.msrb.mxu2 %v4735_v3  ;;  %v5484_v27 = vld [vmem:[%s8354_s1 + $0x884] sm:$0xf]  ;;  %v4700_v31 = vld [vmem:[%s8354_s1 + $0x990] sm:$0xf0]  ;;  %v4383_v36 = vor.u32 %v5436_v19, %v4380_v25 }
  0xaf   :  { %2766 = vmatpush.bf16.msrb.mxu3 %v4863_v8  ;;  %v5516_v30 = vld [vmem:[%s8354_s1 + $0x984] sm:$0xf]  ;;  %v4828_v33 = vld [vmem:[%s8354_s1 + $0xa90] sm:$0xf0]  ;;  %v4575_v37 = vor.u32 %v5484_v27, %v4572_v28 }
  0xb0   :  { %v5548_v32 = vld [vmem:[%s8354_s1 + $0xa84] sm:$0xf]  ;;  %v5004_v35 = vld [vmem:[%s8354_s1 + $0xbf0] sm:$0xf0]  ;;  %2732 = vmatpush.bf16.msrb.mxu0 %v4399_v18  ;;  %v4703_v38 = vor.u32 %v5516_v30, %v4700_v31 }
  0xb1   :  { %v5592_v34 = vld [vmem:[%s8354_s1 + $0xbe4] sm:$0xf]  ;;  %2741 = vmatpush.bf16.msrb.mxu1 %v4591_v23  ;;  %v4556_v40 = vld [vmem:[%s8354_s1 + $0x870] sm:$0xf0]  ;;  %v4831_v42 = vor.u32 %v5548_v32, %v4828_v33  ;;  %v2488_v10 = vpop.f32.mrf.mxu1 }
  0xb2   :  { %2754 = vmatpush.bf16.msrb.mxu2 %v4719_v24  ;;  %v5480_v39 = vld [vmem:[%s8354_s1 + $0x864] sm:$0xf]  ;;  %v5007_v43 = vor.u32 %v5592_v34, %v5004_v35  ;;  %v4684_v44 = vld [vmem:[%s8354_s1 + $0x970] sm:$0xf0]  ;;  %v2475_v3 = vpop.f32.mrf.mxu0 }
  0xb3   :  { %v5512_v41 = vld [vmem:[%s8354_s1 + $0x964] sm:$0xf]  ;;  %2767 = vmatpush.bf16.msrb.mxu3 %v4847_v29  ;;  %v4812_v47 = vld [vmem:[%s8354_s1 + $0xa70] sm:$0xf0]  ;;  %v4559_v50 = vor.u32 %v5480_v39, %v4556_v40  ;;  %v2476_v9 = vadd.f32 %v2475_v3, %v426_v54 }
  0xb4   :  { %v5544_v45 = vld [vmem:[%s8354_s1 + $0xa64] sm:$0xf]  ;;  %v4988_v49 = vld [vmem:[%s8354_s1 + $0xbd0] sm:$0xf0]  ;;  %2733 = vmatpush.bf16.msrb.mxu0 %v4383_v36  ;;  %v4687_v51 = vor.u32 %v5512_v41, %v4684_v44 }
  0xb5   :  { %v5588_v48 = vld [vmem:[%s8354_s1 + $0xbc4] sm:$0xf]  ;;  %2742 = vmatpush.bf16.msrb.mxu1 %v4575_v37  ;;  %v4540_v53 = vld [vmem:[%s8354_s1 + $0x850] sm:$0xf0]  ;;  %v4815_v55 = vor.u32 %v5544_v45, %v4812_v47  ;;  %v2489_v27 = vadd.f32 %v2488_v10, %v2476_v9  ;;  %v3602_v45 = vld [vmem:[%s8354_s1 + $0xe8] sm:$0xf] }
  0xb6   :  { %2755 = vmatpush.bf16.msrb.mxu2 %v4703_v38  ;;  %v5476_v52 = vld [vmem:[%s8354_s1 + $0x844] sm:$0xf]  ;;  %v4991_v56 = vor.u32 %v5588_v48, %v4988_v49  ;;  %v4668_v58 = vld [vmem:[%s8354_s1 + $0x950] sm:$0xf0]  ;;  %v5243_v47 = vld [vmem:[%s8354_s1 + $0xf4] sm:$0xf0] }
  0xb7   :  { %2768 = vmatpush.bf16.msrb.mxu3 %v4831_v42  ;;  %v5508_v57 = vld [vmem:[%s8354_s1 + $0x944] sm:$0xf]  ;;  %2734 = vmatmul.bf16.vlgmr.msrb.gmra.mxu0 %v6109_v1  ;;  %v4796_v61 = vld [vmem:[%s8354_s1 + $0xa50] sm:$0xf0]  ;;  %v4543_v4 = vor.u32 %v5476_v52, %v4540_v53  ;;  %v2501_v33 = vpop.f32.mrf.mxu2  ;;  %v3730_v52 = vld [vmem:[%s8354_s1 + $0x1e8] sm:$0xf] }
  0xb8   :  { %2778 = vmatpush.bf16.msra.mxu0 %v5007_v43  ;;  %v5540_v59 = vld [vmem:[%s8354_s1 + $0xa44] sm:$0xf]  ;;  %v4972_v63 = vld [vmem:[%s8354_s1 + $0xbb0] sm:$0xf0]  ;;  %v4671_v6 = vor.u32 %v5508_v57, %v4668_v58  ;;  %v2502_v39 = vadd.f32 %v2501_v33, %v2489_v27  ;;  %v5275_v53 = vld [vmem:[%s8354_s1 + $0x1f4] sm:$0xf0]  ;;  %v3603_v58 = vor.u32 %v5243_v47, %v3602_v45 }
  0xb9   :  { %v5584_v62 = vld [vmem:[%s8354_s1 + $0xba4] sm:$0xf]  ;;  %2743 = vmatpush.bf16.msrb.mxu1 %v4559_v50  ;;  %v4524_v8 = vld [vmem:[%s8354_s1 + $0x830] sm:$0xf0]  ;;  %v4799_v11 = vor.u32 %v5540_v59, %v4796_v61  ;;  %v2514_v40 = vpop.f32.mrf.mxu3  ;;  %v2490_v54 = vpop.f32.mrf.mxu1  ;;  %v3570_v27 = vld [vmem:[%s8354_s1 + $0xa8] sm:$0xf] }
  0xba   :  { %2756 = vmatpush.bf16.msrb.mxu2 %v4687_v51  ;;  %v5472_v7 = vld [vmem:[%s8354_s1 + $0x824] sm:$0xf]  ;;  %v4975_v12 = vor.u32 %v5584_v62, %v4972_v63  ;;  %v4652_v18 = vld [vmem:[%s8354_s1 + $0x930] sm:$0xf0]  ;;  %v6939_v48 = vadd.f32 %v2514_v40, %v2502_v39  ;;  %v2477_v49 = vpop.f32.mrf.mxu0  ;;  %v3731_v63 = vor.u32 %v5275_v53, %v3730_v52  ;;  %v5263_v39 = vld [vmem:[%s8354_s1 + $0x194] sm:$0xf0] }
  0xbb   :  { %2769 = vmatpush.bf16.msrb.mxu3 %v4815_v55  ;;  %v5504_v14 = vld [vmem:[%s8354_s1 + $0x924] sm:$0xf]  ;;  %v4780_v23 = vld [vmem:[%s8354_s1 + $0xa30] sm:$0xf0]  ;;  %v4527_v28 = vor.u32 %v5472_v7, %v4524_v8  ;;  %v3714_v7 = vld [vmem:[%s8354_s1 + $0x1c8] sm:$0xf] }
  0xbc   :  { %2779 = vmatpush.bf16.msra.mxu0 %v4991_v56  ;;  %v5536_v19 = vld [vmem:[%s8354_s1 + $0xa24] sm:$0xf]  ;;  %v4956_v25 = vld [vmem:[%s8354_s1 + $0xb90] sm:$0xf0]  ;;  %v4655_v29 = vor.u32 %v5504_v14, %v4652_v18  ;;  %v5271_v8 = vld [vmem:[%s8354_s1 + $0x1d4] sm:$0xf0] }
  0xbd   :  { %v5580_v24 = vld [vmem:[%s8354_s1 + $0xb84] sm:$0xf]  ;;  %2744 = vmatpush.bf16.msrb.mxu1 %v4543_v4  ;;  %v4508_v31 = vld [vmem:[%s8354_s1 + $0x810] sm:$0xf0]  ;;  %v4783_v34 = vor.u32 %v5536_v19, %v4780_v23  ;;  %v3586_v4 = vld [vmem:[%s8354_s1 + $0xc8] sm:$0xf] }
  0xbe   :  { %2757 = vmatpush.bf16.msrb.mxu2 %v4671_v6  ;;  %v5468_v30 = vld [vmem:[%s8354_s1 + $0x804] sm:$0xf]  ;;  %v4959_v35 = vor.u32 %v5580_v24, %v4956_v25  ;;  %v4636_v36 = vld [vmem:[%s8354_s1 + $0x910] sm:$0xf0]  ;;  %v5239_v6 = vld [vmem:[%s8354_s1 + $0xd4] sm:$0xf0]  ;;  %v3715_v24 = vor.u32 %v5271_v8, %v3714_v7 }
  0xbf   :  { %v5500_v32 = vld [vmem:[%s8354_s1 + $0x904] sm:$0xf]  ;;  %2770 = vmatpush.bf16.msrb.mxu3 %v4799_v11  ;;  %v4764_v38 = vld [vmem:[%s8354_s1 + $0xa10] sm:$0xf0]  ;;  %v4511_v50 = vor.u32 %v5468_v30, %v4508_v31  ;;  %v2503_v9 = vpop.f32.mrf.mxu2  ;;  %v3587_v14 = vor.u32 %v5239_v6, %v3586_v4  ;;  %v3858_v40 = vld [vmem:[%s8354_s1 + $0x2e8] sm:$0xf] }
  0xc0   :  { %2780 = vmatpush.bf16.msra.mxu0 %v4975_v12  ;;  %v5532_v37 = vld [vmem:[%s8354_s1 + $0xa04] sm:$0xf]  ;;  %v4940_v42 = vld [vmem:[%s8354_s1 + $0xb70] sm:$0xf0]  ;;  %v4639_v51 = vor.u32 %v5500_v32, %v4636_v36  ;;  %v3554_v36 = vld [vmem:[%s8354_s1 + $0x88] sm:$0xf] }
  0xc1   :  { %v5576_v41 = vld [vmem:[%s8354_s1 + $0xb64] sm:$0xf]  ;;  %v5068_v44 = vld [vmem:[%s8354_s1 + $0xc70] sm:$0xf0]  ;;  %2745 = vmatpush.bf16.msrb.mxu1 %v4527_v28  ;;  %v4767_v55 = vor.u32 %v5532_v37, %v4764_v38  ;;  %v2516_v11 = vpop.f32.mrf.mxu3  ;;  %v5235_v28 = vld [vmem:[%s8354_s1 + $0xb4] sm:$0xf0] }
  0xc2   :  { %v5608_v43 = vld [vmem:[%s8354_s1 + $0xc64] sm:$0xf]  ;;  %2758 = vmatpush.bf16.msrb.mxu2 %v4655_v29  ;;  %v4943_v56 = vor.u32 %v5576_v41, %v4940_v42  ;;  %v4924_v61 = vld [vmem:[%s8354_s1 + $0xb50] sm:$0xf0]  ;;  %v5267_v29 = vld [vmem:[%s8354_s1 + $0x1b4] sm:$0xf0] }
  0xc3   :  { %2771 = vmatpush.bf16.msrb.mxu3 %v4783_v34  ;;  %v5071_v57 = vor.u32 %v5608_v43, %v5068_v44  ;;  %v5572_v59 = vld [vmem:[%s8354_s1 + $0xb44] sm:$0xf]  ;;  %v5052_v3 = vld [vmem:[%s8354_s1 + $0xc50] sm:$0xf0]  ;;  %v5231_v37 = vld [vmem:[%s8354_s1 + $0x94] sm:$0xf0]  ;;  %v2527_v45 = vpop.f32.mrf.mxu0 }
  0xc4   :  { %2781 = vmatpush.bf16.msra.mxu0 %v4959_v35  ;;  %v5604_v62 = vld [vmem:[%s8354_s1 + $0xc44] sm:$0xf]  ;;  %v4927_v10 = vor.u32 %v5572_v59, %v4924_v61  ;;  %v4908_v19 = vld [vmem:[%s8354_s1 + $0xb30] sm:$0xf0]  ;;  %v3682_v38 = vld [vmem:[%s8354_s1 + $0x188] sm:$0xf]  ;;  %v3555_v49 = vor.u32 %v5231_v37, %v3554_v36 }
  0xc5   :  { %2746 = vmatpush.bf16.msrb.mxu1 %v4511_v50  ;;  %v5055_v12 = vor.u32 %v5604_v62, %v5052_v3  ;;  %v5568_v18 = vld [vmem:[%s8354_s1 + $0xb24] sm:$0xf]  ;;  %v5036_v25 = vld [vmem:[%s8354_s1 + $0xc30] sm:$0xf0]  ;;  %v5307_v41 = vld [vmem:[%s8354_s1 + $0x2f4] sm:$0xf0]  ;;  %v2528_v50 = vadd.f32 %v2527_v45, %v6939_v48  ;;  %v3683_v52 = vor.u32 %v5263_v39, %v3682_v38 }
  0xc6   :  { %2759 = vmatpush.bf16.msrb.mxu2 %v4639_v51  ;;  %v5600_v23 = vld [vmem:[%s8354_s1 + $0xc24] sm:$0xf]  ;;  %v4911_v30 = vor.u32 %v5568_v18, %v4908_v19  ;;  %v5020_v34 = vld [vmem:[%s8354_s1 + $0xc10] sm:$0xf0]  ;;  %v3986_v43 = vld [vmem:[%s8354_s1 + $0x3e8] sm:$0xf]  ;;  %v2540_v51 = vpop.f32.mrf.mxu1  ;;  %v3859_v53 = vor.u32 %v5307_v41, %v3858_v40 }
  0xc7   :  { %2772 = vmatpush.bf16.msrb.mxu3 %v4767_v55  ;;  %v5564_v31 = vld [vmem:[%s8354_s1 + $0xb04] sm:$0xf]  ;;  %v5039_v32 = vor.u32 %v5600_v23, %v5036_v25  ;;  %v5339_v44 = vld [vmem:[%s8354_s1 + $0x3f4] sm:$0xf0]  ;;  %v3538_v54 = vld [vmem:[%s8354_s1 + $0x68] sm:$0xf]  ;;  %v2541_v61 = vadd.f32 %v2540_v51, %v2528_v50 }
  0xc8   :  { %2782 = vmatpush.bf16.msra.mxu0 %v4943_v56  ;;  %2747 = vmatmul.bf16.vlgmr.msrb.gmra.mxu1 %v6339_v5  ;;  %v3698_v5 = vld [vmem:[%s8354_s1 + $0x1a8] sm:$0xf]  ;;  %v5596_v33 = vld [vmem:[%s8354_s1 + $0xc04] sm:$0xf]  ;;  %v5227_v55 = vld [vmem:[%s8354_s1 + $0x74] sm:$0xf0] }
  0xc9   :  { %2795 = vmatpush.bf16.msra.mxu1 %v5071_v57  ;;  %2760 = vmatmul.bf16.vlgmr.msrb.gmra.mxu2 %v6367_v16  ;;  %v3571_v16 = vor.u32 %v5235_v28, %v3570_v27  ;;  %v3699_v35 = vor.u32 %v5267_v29, %v3698_v5  ;;  %v5023_v47 = vor.u32 %v5596_v33, %v5020_v34  ;;  %v3666_v56 = vld [vmem:[%s8354_s1 + $0x168] sm:$0xf]  ;;  %v5259_v48 = vld [vmem:[%s8354_s1 + $0x174] sm:$0xf0] }
  0xca   :  { %2804 = vmatpush.bf16.msra.mxu2 %v3603_v58  ;;  %2773 = vmatmul.bf16.vlgmr.msrb.gmra.mxu3 %v6359_v13  ;;  %v4892_v13 = vld [vmem:[%s8354_s1 + $0xb10] sm:$0xf0]  ;;  %v3987_v57 = vor.u32 %v5339_v44, %v3986_v43  ;;  %v3842_v58 = vld [vmem:[%s8354_s1 + $0x2c8] sm:$0xf]  ;;  %v5303_v59 = vld [vmem:[%s8354_s1 + $0x2d4] sm:$0xf0]  ;;  %v3539_v3 = vor.u32 %v5227_v55, %v3538_v54  ;;  %v3667_v6 = vor.u32 %v5259_v48, %v3666_v56 }
  0xcb   :  { %2817 = vmatpush.bf16.msra.mxu3 %v3731_v63  ;;  %v4895_v42 = vor.u32 %v5564_v31, %v4892_v13  ;;  %v3970_v62 = vld [vmem:[%s8354_s1 + $0x3c8] sm:$0xf]  ;;  %v5335_v63 = vld [vmem:[%s8354_s1 + $0x3d4] sm:$0xf0]  ;;  %v2553_v4 = vpop.f32.mrf.mxu2  ;;  %v3843_v7 = vor.u32 %v5303_v59, %v3842_v58  ;;  %v2529_v27 = vpop.f32.mrf.mxu0 }
  0xcc   :  { %2783 = vmatpush.bf16.msra.mxu0 %v4927_v10  ;;  %v3522_v8 = vld [vmem:[%s8354_s1 + $0x48] sm:$0xf]  ;;  %v5223_v9 = vld [vmem:[%s8354_s1 + $0x54] sm:$0xf0]  ;;  %v2554_v11 = vadd.f32 %v2553_v4, %v2541_v61 }
  0xcd   :  { %2796 = vmatpush.bf16.msra.mxu1 %v5055_v12  ;;  %v3650_v10 = vld [vmem:[%s8354_s1 + $0x148] sm:$0xf]  ;;  %v2566_v12 = vpop.f32.mrf.mxu3  ;;  %v5255_v18 = vld [vmem:[%s8354_s1 + $0x154] sm:$0xf0]  ;;  %v3523_v28 = vor.u32 %v5223_v9, %v3522_v8 }
  0xce   :  { %2805 = vmatpush.bf16.msra.mxu2 %v3587_v14  ;;  %v3971_v14 = vor.u32 %v5335_v63, %v3970_v62  ;;  %v3826_v19 = vld [vmem:[%s8354_s1 + $0x2a8] sm:$0xf]  ;;  %v5299_v23 = vld [vmem:[%s8354_s1 + $0x2b4] sm:$0xf0]  ;;  %v7084_v25 = vadd.f32 %v2566_v12, %v2554_v11  ;;  %v2542_v5 = vpop.f32.mrf.mxu1  ;;  %v3651_v29 = vor.u32 %v5255_v18, %v3650_v10 }
  0xcf   :  { %2818 = vmatpush.bf16.msra.mxu3 %v3715_v24  ;;  %v3954_v24 = vld [vmem:[%s8354_s1 + $0x3a8] sm:$0xf]  ;;  %v5251_v33 = vld [vmem:[%s8354_s1 + $0x134] sm:$0xf0] }
  0xd0   :  { %2784 = vmatpush.bf16.msra.mxu0 %v4911_v30  ;;  %v3827_v30 = vor.u32 %v5299_v23, %v3826_v19  ;;  %v3506_v31 = vld [vmem:[%s8354_s1 + $0x28] sm:$0xf]  ;;  %v5327_v37 = vld [vmem:[%s8354_s1 + $0x394] sm:$0xf0] }
  0xd1   :  { %2797 = vmatpush.bf16.msra.mxu1 %v5039_v32  ;;  %v5219_v32 = vld [vmem:[%s8354_s1 + $0x34] sm:$0xf0]  ;;  %v3810_v34 = vld [vmem:[%s8354_s1 + $0x288] sm:$0xf] }
  0xd2   :  { %2806 = vmatpush.bf16.msra.mxu2 %v3571_v16  ;;  %v3634_v16 = vld [vmem:[%s8354_s1 + $0x128] sm:$0xf]  ;;  %v3507_v38 = vor.u32 %v5219_v32, %v3506_v31  ;;  %v5247_v44 = vld [vmem:[%s8354_s1 + $0x114] sm:$0xf0] }
  0xd3   :  { %2819 = vmatpush.bf16.msra.mxu3 %v3699_v35  ;;  %v5295_v35 = vld [vmem:[%s8354_s1 + $0x294] sm:$0xf0]  ;;  %v3938_v36 = vld [vmem:[%s8354_s1 + $0x388] sm:$0xf]  ;;  %v2555_v40 = vpop.f32.mrf.mxu2  ;;  %v3635_v41 = vor.u32 %v5251_v33, %v3634_v16 }
  0xd4   :  { %2785 = vmatpush.bf16.msra.mxu0 %v4895_v42  ;;  %v3490_v39 = vld [vmem:[%s8354_s1 + $0x8] sm:$0xf]  ;;  %v3811_v42 = vor.u32 %v5295_v35, %v3810_v34  ;;  %v5291_v50 = vld [vmem:[%s8354_s1 + $0x274] sm:$0xf0] }
  0xd5   :  { %2798 = vmatpush.bf16.msra.mxu1 %v5023_v47  ;;  %v3618_v43 = vld [vmem:[%s8354_s1 + $0x108] sm:$0xf]  ;;  %v2568_v45 = vpop.f32.mrf.mxu3  ;;  %v3939_v47 = vor.u32 %v5327_v37, %v3938_v36  ;;  %v5371_v54 = vld [vmem:[%s8354_s1 + $0x4f4] sm:$0xf0] }
  0xd6   :  { %2807 = vmatpush.bf16.msra.mxu2 %v3555_v49  ;;  %v3794_v49 = vld [vmem:[%s8354_s1 + $0x268] sm:$0xf]  ;;  %v3619_v48 = vor.u32 %v5247_v44, %v3618_v43  ;;  %v5287_v63 = vld [vmem:[%s8354_s1 + $0x254] sm:$0xf0] }
  0xd7   :  { %2820 = vmatpush.bf16.msra.mxu3 %v3683_v52  ;;  %2786 = vmatmul.bf16.vlgmr.msra.gmra.mxu0 %v6369_v17  ;;  %v5331_v17 = vld [vmem:[%s8354_s1 + $0x3b4] sm:$0xf0]  ;;  %v3922_v51 = vld [vmem:[%s8354_s1 + $0x368] sm:$0xf]  ;;  %v3795_v58 = vor.u32 %v5291_v50, %v3794_v49 }
  0xd8   :  { %2830 = vmatpush.bf16.msrb.mxu0 %v3859_v53  ;;  %v3955_v13 = vor.u32 %v5331_v17, %v3954_v24  ;;  %5081 = vmatmul.msk.bf16.vlgmr.msra.gmra.mxu1 %vm2463_vm0, %v6477_v15  ;;  %v5215_v15 = vld [vmem:[%s8354_s1 + $0x14] sm:$0xf0]  ;;  %v4114_v53 = vld [vmem:[%s8354_s1 + $0x4e8] sm:$0xf] }
  0xd9   :  { %2843 = vmatpush.bf16.msrb.mxu1 %v3987_v57  ;;  %v5323_v52 = vld [vmem:[%s8354_s1 + $0x374] sm:$0xf0]  ;;  %v3491_v55 = vor.u32 %v5215_v15, %v3490_v39  ;;  %v4242_v56 = vld [vmem:[%s8354_s1 + $0x5e8] sm:$0xf]  ;;  %v4115_v61 = vor.u32 %v5371_v54, %v4114_v53 }
  0xda   :  { %2808 = vmatpush.bf16.msra.mxu2 %v3539_v3  ;;  %v5403_v57 = vld [vmem:[%s8354_s1 + $0x5f4] sm:$0xf0]  ;;  %v3923_v59 = vor.u32 %v5323_v52, %v3922_v51  ;;  %v3778_v62 = vld [vmem:[%s8354_s1 + $0x248] sm:$0xf] }
  0xdb   :  { %2821 = vmatpush.bf16.msra.mxu3 %v3667_v6  ;;  %v3906_v3 = vld [vmem:[%s8354_s1 + $0x348] sm:$0xf]  ;;  %v4243_v4 = vor.u32 %v5403_v57, %v4242_v56  ;;  %v5319_v6 = vld [vmem:[%s8354_s1 + $0x354] sm:$0xf0]  ;;  %v3779_v11 = vor.u32 %v5287_v63, %v3778_v62 }
  0xdc   :  { %2831 = vmatpush.bf16.msrb.mxu0 %v3843_v7  ;;  %v4098_v7 = vld [vmem:[%s8354_s1 + $0x4c8] sm:$0xf]  ;;  %v5367_v8 = vld [vmem:[%s8354_s1 + $0x4d4] sm:$0xf0]  ;;  %v3907_v12 = vor.u32 %v5319_v6, %v3906_v3 }
  0xdd   :  { %2844 = vmatpush.bf16.msrb.mxu1 %v3971_v14  ;;  %v4226_v9 = vld [vmem:[%s8354_s1 + $0x5c8] sm:$0xf]  ;;  %v5399_v10 = vld [vmem:[%s8354_s1 + $0x5d4] sm:$0xf0]  ;;  %v4099_v14 = vor.u32 %v5367_v8, %v4098_v7 }
  0xde   :  { %2809 = vmatpush.bf16.msra.mxu2 %v3523_v28  ;;  %v3762_v18 = vld [vmem:[%s8354_s1 + $0x228] sm:$0xf]  ;;  %v5283_v19 = vld [vmem:[%s8354_s1 + $0x234] sm:$0xf0]  ;;  %v4227_v24 = vor.u32 %v5399_v10, %v4226_v9 }
  0xdf   :  { %2822 = vmatpush.bf16.msra.mxu3 %v3651_v29  ;;  %v3890_v23 = vld [vmem:[%s8354_s1 + $0x328] sm:$0xf]  ;;  %v5315_v17 = vld [vmem:[%s8354_s1 + $0x334] sm:$0xf0] }
  0xe0   :  { %2832 = vmatpush.bf16.msrb.mxu0 %v3827_v30  ;;  %v4082_v27 = vld [vmem:[%s8354_s1 + $0x4a8] sm:$0xf]  ;;  %v5363_v28 = vld [vmem:[%s8354_s1 + $0x4b4] sm:$0xf0]  ;;  %v3763_v30 = vor.u32 %v5283_v19, %v3762_v18  ;;  %v3891_v32 = vor.u32 %v5315_v17, %v3890_v23 }
  0xe1   :  { %2845 = vmatpush.bf16.msrb.mxu1 %v3955_v13  ;;  %v4210_v5 = vld [vmem:[%s8354_s1 + $0x5a8] sm:$0xf]  ;;  %v5395_v29 = vld [vmem:[%s8354_s1 + $0x5b4] sm:$0xf0]  ;;  %v4083_v16 = vor.u32 %v5363_v28, %v4082_v27 }
  0xe2   :  { %2810 = vmatpush.bf16.msra.mxu2 %v3507_v38  ;;  %v3746_v31 = vld [vmem:[%s8354_s1 + $0x208] sm:$0xf]  ;;  %v5279_v13 = vld [vmem:[%s8354_s1 + $0x214] sm:$0xf0]  ;;  %v4211_v35 = vor.u32 %v5395_v29, %v4210_v5 }
  0xe3   :  { %2823 = vmatpush.bf16.msra.mxu3 %v3635_v41  ;;  %v3874_v33 = vld [vmem:[%s8354_s1 + $0x308] sm:$0xf]  ;;  %v5311_v34 = vld [vmem:[%s8354_s1 + $0x314] sm:$0xf0]  ;;  %v3747_v43 = vor.u32 %v5279_v13, %v3746_v31 }
  0xe4   :  { %2833 = vmatpush.bf16.msrb.mxu0 %v3811_v42  ;;  %v4066_v36 = vld [vmem:[%s8354_s1 + $0x488] sm:$0xf]  ;;  %v5359_v37 = vld [vmem:[%s8354_s1 + $0x494] sm:$0xf0]  ;;  %v2579_v39 = vpop.f32.mrf.mxu0  ;;  %v3875_v49 = vor.u32 %v5311_v34, %v3874_v33 }
  0xe5   :  { %2846 = vmatpush.bf16.msrb.mxu1 %v3939_v47  ;;  %v4194_v38 = vld [vmem:[%s8354_s1 + $0x588] sm:$0xf]  ;;  %v5391_v40 = vld [vmem:[%s8354_s1 + $0x594] sm:$0xf0]  ;;  %v2580_v15 = vadd.f32 %v2579_v39, %v7084_v25  ;;  %v2592_v44 = vpop.f32.mrf.mxu1  ;;  %v4067_v50 = vor.u32 %v5359_v37, %v4066_v36 }
  0xe6   :  { %2811 = vmatpush.bf16.msra.mxu2 %v3491_v55  ;;  %v4370_v41 = vld [vmem:[%s8354_s1 + $0x6e8] sm:$0xf]  ;;  %v5435_v42 = vld [vmem:[%s8354_s1 + $0x6f4] sm:$0xf0]  ;;  %v4195_v51 = vor.u32 %v5391_v40, %v4194_v38 }
  0xe7   :  { %2824 = vmatpush.bf16.msra.mxu3 %v3619_v48  ;;  %v4498_v45 = vld [vmem:[%s8354_s1 + $0x7e8] sm:$0xf]  ;;  %v5467_v47 = vld [vmem:[%s8354_s1 + $0x7f4] sm:$0xf0]  ;;  %v2593_v52 = vadd.f32 %v2592_v44, %v2580_v15  ;;  %v4371_v53 = vor.u32 %v5435_v42, %v4370_v41 }
  0xe8   :  { %2834 = vmatpush.bf16.msrb.mxu0 %v3795_v58  ;;  %v4050_v25 = vld [vmem:[%s8354_s1 + $0x468] sm:$0xf]  ;;  %v5355_v54 = vld [vmem:[%s8354_s1 + $0x474] sm:$0xf0]  ;;  %v4499_v56 = vor.u32 %v5467_v47, %v4498_v45 }
  0xe9   :  { %2847 = vmatpush.bf16.msrb.mxu1 %v3923_v59  ;;  %2812 = vmatmul.bf16.vlgmr.msra.gmra.mxu2 %v6014_v21  ;;  %v4178_v55 = vld [vmem:[%s8354_s1 + $0x568] sm:$0xf]  ;;  %v5387_v57 = vld [vmem:[%s8354_s1 + $0x574] sm:$0xf0]  ;;  %v4051_v62 = vor.u32 %v5355_v54, %v4050_v25 }
  0xea   :  { %2856 = vmatpush.bf16.msrb.mxu2 %v4115_v61  ;;  %2825 = vmatmul.bf16.vlgmr.msra.gmra.mxu3 %v6025_v26  ;;  %v4354_v48 = vld [vmem:[%s8354_s1 + $0x6c8] sm:$0xf]  ;;  %v5431_v58 = vld [vmem:[%s8354_s1 + $0x6d4] sm:$0xf0]  ;;  %v4179_v63 = vor.u32 %v5387_v57, %v4178_v55 }
  0xeb   :  { %2869 = vmatpush.bf16.msrb.mxu3 %v4243_v4  ;;  %v4482_v59 = vld [vmem:[%s8354_s1 + $0x7c8] sm:$0xf]  ;;  %v5463_v61 = vld [vmem:[%s8354_s1 + $0x7d4] sm:$0xf0]  ;;  %v4355_v4 = vor.u32 %v5431_v58, %v4354_v48 }
  0xec   :  { %2835 = vmatpush.bf16.msrb.mxu0 %v3779_v11  ;;  %v2605_v3 = vpop.f32.mrf.mxu2  ;;  %v4034_v6 = vld [vmem:[%s8354_s1 + $0x448] sm:$0xf]  ;;  %v5351_v7 = vld [vmem:[%s8354_s1 + $0x454] sm:$0xf0]  ;;  %v4483_v10 = vor.u32 %v5463_v61, %v4482_v59  ;;  %v2581_v11 = vpop.f32.mrf.mxu0 }
  0xed   :  { %2848 = vmatpush.bf16.msrb.mxu1 %v3907_v12  ;;  %v4162_v8 = vld [vmem:[%s8354_s1 + $0x548] sm:$0xf]  ;;  %v2606_v9 = vadd.f32 %v2605_v3, %v2593_v52  ;;  %v5427_v19 = vld [vmem:[%s8354_s1 + $0x6b4] sm:$0xf0]  ;;  %v2594_v17 = vpop.f32.mrf.mxu1  ;;  %v4035_v28 = vor.u32 %v5351_v7, %v4034_v6 }
  0xee   :  { %2857 = vmatpush.bf16.msrb.mxu2 %v4099_v14  ;;  %v5383_v14 = vld [vmem:[%s8354_s1 + $0x554] sm:$0xf0]  ;;  %v4338_v18 = vld [vmem:[%s8354_s1 + $0x6a8] sm:$0xf] }
  0xef   :  { %2870 = vmatpush.bf16.msrb.mxu3 %v4227_v24  ;;  %v2618_v12 = vpop.f32.mrf.mxu3  ;;  %v4466_v23 = vld [vmem:[%s8354_s1 + $0x7a8] sm:$0xf]  ;;  %v5459_v24 = vld [vmem:[%s8354_s1 + $0x7b4] sm:$0xf0]  ;;  %v4163_v5 = vor.u32 %v5383_v14, %v4162_v8  ;;  %v4339_v29 = vor.u32 %v5427_v19, %v4338_v18 }
  0xf0   :  { %2836 = vmatpush.bf16.msrb.mxu0 %v3763_v30  ;;  %v2619_v27 = vadd.f32 %v2618_v12, %v2606_v9  ;;  %v4018_v30 = vld [vmem:[%s8354_s1 + $0x428] sm:$0xf]  ;;  %v5347_v31 = vld [vmem:[%s8354_s1 + $0x434] sm:$0xf0] }
  0xf1   :  { %2849 = vmatpush.bf16.msrb.mxu1 %v3891_v32  ;;  %v4146_v32 = vld [vmem:[%s8354_s1 + $0x528] sm:$0xf]  ;;  %v5379_v13 = vld [vmem:[%s8354_s1 + $0x534] sm:$0xf0]  ;;  %v4019_v37 = vor.u32 %v5347_v31, %v4018_v30 }
  0xf2   :  { %2858 = vmatpush.bf16.msrb.mxu2 %v4083_v16  ;;  %v4467_v16 = vor.u32 %v5459_v24, %v4466_v23  ;;  %v4322_v33 = vld [vmem:[%s8354_s1 + $0x688] sm:$0xf]  ;;  %v5423_v34 = vld [vmem:[%s8354_s1 + $0x694] sm:$0xf0]  ;;  %v4147_v39 = vor.u32 %v5379_v13, %v4146_v32 }
  0xf3   :  { %2871 = vmatpush.bf16.msrb.mxu3 %v4211_v35  ;;  %v4450_v35 = vld [vmem:[%s8354_s1 + $0x788] sm:$0xf]  ;;  %v5455_v36 = vld [vmem:[%s8354_s1 + $0x794] sm:$0xf0]  ;;  %v4323_v40 = vor.u32 %v5423_v34, %v4322_v33 }
  0xf4   :  { %2837 = vmatpush.bf16.msrb.mxu0 %v3747_v43  ;;  %v4002_v38 = vld [vmem:[%s8354_s1 + $0x408] sm:$0xf]  ;;  %v5343_v41 = vld [vmem:[%s8354_s1 + $0x414] sm:$0xf0]  ;;  %v2607_v43 = vpop.f32.mrf.mxu2  ;;  %v4451_v44 = vor.u32 %v5455_v36, %v4450_v35 }
  0xf5   :  { %2850 = vmatpush.bf16.msrb.mxu1 %v3875_v49  ;;  %v4130_v42 = vld [vmem:[%s8354_s1 + $0x508] sm:$0xf]  ;;  %v5375_v15 = vld [vmem:[%s8354_s1 + $0x514] sm:$0xf0]  ;;  %v4003_v55 = vor.u32 %v5343_v41, %v4002_v38 }
  0xf6   :  { %2859 = vmatpush.bf16.msrb.mxu2 %v4067_v50  ;;  %v4306_v45 = vld [vmem:[%s8354_s1 + $0x668] sm:$0xf]  ;;  %v5419_v47 = vld [vmem:[%s8354_s1 + $0x674] sm:$0xf0]  ;;  %v4131_v48 = vor.u32 %v5375_v15, %v4130_v42 }
  0xf7   :  { %2872 = vmatpush.bf16.msrb.mxu3 %v4195_v51  ;;  %2838 = vmatmul.bf16.vlgmr.msrb.gmra.mxu0 %v6012_v20  ;;  %v4434_v49 = vld [vmem:[%s8354_s1 + $0x768] sm:$0xf]  ;;  %v2620_v50 = vpop.f32.mrf.mxu3  ;;  %v2631_v51 = vpop.f32.mrf.mxu0  ;;  %v5451_v52 = vld [vmem:[%s8354_s1 + $0x774] sm:$0xf0]  ;;  %v4307_v58 = vor.u32 %v5419_v47, %v4306_v45 }
  0xf8   :  { %2882 = vmatpush.bf16.msra.mxu0 %v4371_v53  ;;  %2851 = vmatmul.bf16.vlgmr.msrb.gmra.mxu1 %v6016_v22  ;;  %v4626_v53 = vld [vmem:[%s8354_s1 + $0x8e8] sm:$0xf]  ;;  %v5499_v25 = vld [vmem:[%s8354_s1 + $0x8f4] sm:$0xf0]  ;;  %v7339_v54 = vadd.f32 %v2631_v51, %v2619_v27  ;;  %v4435_v59 = vor.u32 %v5451_v52, %v4434_v49 }
  0xf9   :  { %2895 = vmatpush.bf16.msra.mxu1 %v4499_v56  ;;  %v4754_v56 = vld [vmem:[%s8354_s1 + $0x9e8] sm:$0xf]  ;;  %v5531_v57 = vld [vmem:[%s8354_s1 + $0x9f4] sm:$0xf0]  ;;  %v4627_v61 = vor.u32 %v5499_v25, %v4626_v53 }
  0xfa   :  { %2860 = vmatpush.bf16.msrb.mxu2 %v4051_v62  ;;  %v4290_v62 = vld [vmem:[%s8354_s1 + $0x648] sm:$0xf]  ;;  %v5447_v6 = vld [vmem:[%s8354_s1 + $0x754] sm:$0xf0] }
  0xfb   :  { %2873 = vmatpush.bf16.msrb.mxu3 %v4179_v63  ;;  %v5415_v63 = vld [vmem:[%s8354_s1 + $0x654] sm:$0xf0]  ;;  %v4418_v3 = vld [vmem:[%s8354_s1 + $0x748] sm:$0xf] }
  0xfc   :  { %2883 = vmatpush.bf16.msra.mxu0 %v4355_v4  ;;  %v4755_v4 = vor.u32 %v5531_v57, %v4754_v56  ;;  %v4610_v7 = vld [vmem:[%s8354_s1 + $0x8c8] sm:$0xf]  ;;  %v5495_v8 = vld [vmem:[%s8354_s1 + $0x8d4] sm:$0xf0]  ;;  %v4291_v11 = vor.u32 %v5415_v63, %v4290_v62  ;;  %v4419_v12 = vor.u32 %v5447_v6, %v4418_v3 }
  0xfd   :  { %2896 = vmatpush.bf16.msra.mxu1 %v4483_v10  ;;  %v4738_v9 = vld [vmem:[%s8354_s1 + $0x9c8] sm:$0xf]  ;;  %v5527_v10 = vld [vmem:[%s8354_s1 + $0x9d4] sm:$0xf0]  ;;  %v4611_v14 = vor.u32 %v5495_v8, %v4610_v7 }
  0xfe   :  { %2861 = vmatpush.bf16.msrb.mxu2 %v4035_v28  ;;  %v4274_v18 = vld [vmem:[%s8354_s1 + $0x628] sm:$0xf]  ;;  %v5411_v19 = vld [vmem:[%s8354_s1 + $0x634] sm:$0xf0]  ;;  %v4739_v24 = vor.u32 %v5527_v10, %v4738_v9 }
  0xff   :  { %2874 = vmatpush.bf16.msrb.mxu3 %v4163_v5  ;;  %v4402_v23 = vld [vmem:[%s8354_s1 + $0x728] sm:$0xf]  ;;  %v5443_v17 = vld [vmem:[%s8354_s1 + $0x734] sm:$0xf0]  ;;  %v2633_v5 = vpop.f32.mrf.mxu0  ;;  %v4275_v31 = vor.u32 %v5411_v19, %v4274_v18 }
 0x100   :  { %2884 = vmatpush.bf16.msra.mxu0 %v4339_v29  ;;  %v4594_v27 = vld [vmem:[%s8354_s1 + $0x8a8] sm:$0xf]  ;;  %v5491_v28 = vld [vmem:[%s8354_s1 + $0x8b4] sm:$0xf0]  ;;  %v4403_v13 = vor.u32 %v5443_v17, %v4402_v23 }
 0x101   :  { %2897 = vmatpush.bf16.msra.mxu1 %v4467_v16  ;;  %v4722_v29 = vld [vmem:[%s8354_s1 + $0x9a8] sm:$0xf]  ;;  %v5523_v30 = vld [vmem:[%s8354_s1 + $0x9b4] sm:$0xf0]  ;;  %v4595_v33 = vor.u32 %v5491_v28, %v4594_v27 }
 0x102   :  { %2862 = vmatpush.bf16.msrb.mxu2 %v4019_v37  ;;  %v4258_v32 = vld [vmem:[%s8354_s1 + $0x608] sm:$0xf]  ;;  %v5407_v16 = vld [vmem:[%s8354_s1 + $0x614] sm:$0xf0]  ;;  %v4723_v37 = vor.u32 %v5523_v30, %v4722_v29 }
 0x103   :  { %2875 = vmatpush.bf16.msrb.mxu3 %v4147_v39  ;;  %v4386_v34 = vld [vmem:[%s8354_s1 + $0x708] sm:$0xf]  ;;  %v5439_v35 = vld [vmem:[%s8354_s1 + $0x714] sm:$0xf0]  ;;  %v4259_v43 = vor.u32 %v5407_v16, %v4258_v32 }
 0x104   :  { %2885 = vmatpush.bf16.msra.mxu0 %v4323_v40  ;;  %v4578_v36 = vld [vmem:[%s8354_s1 + $0x888] sm:$0xf]  ;;  %v5487_v38 = vld [vmem:[%s8354_s1 + $0x894] sm:$0xf0]  ;;  %v427_v40 = vperm.slane %v6842_v46, 1  ;;  %v4387_v47 = vor.u32 %v5439_v35, %v4386_v34 }
 0x105   :  { %2898 = vmatpush.bf16.msra.mxu1 %v4451_v44  ;;  %v4706_v39 = vld [vmem:[%s8354_s1 + $0x988] sm:$0xf]  ;;  %v5519_v41 = vld [vmem:[%s8354_s1 + $0x994] sm:$0xf0]  ;;  %v2644_v45 = vpop.f32.mrf.mxu1  ;;  %v4579_v49 = vor.u32 %v5487_v38, %v4578_v36 }
 0x106   :  { %2863 = vmatpush.bf16.msrb.mxu2 %v4003_v55  ;;  %v4882_v42 = vld [vmem:[%s8354_s1 + $0xae8] sm:$0xf]  ;;  %v5563_v15 = vld [vmem:[%s8354_s1 + $0xaf4] sm:$0xf0]  ;;  %v4707_v50 = vor.u32 %v5519_v41, %v4706_v39  ;;  %v2645_v55 = vadd.f32 %v2644_v45, %v427_v40 }
 0x107   :  { %2876 = vmatpush.bf16.msrb.mxu3 %v4131_v48  ;;  %v5010_v44 = vld [vmem:[%s8354_s1 + $0xbe8] sm:$0xf]  ;;  %v5595_v46 = vld [vmem:[%s8354_s1 + $0xbf4] sm:$0xf0]  ;;  %v4883_v51 = vor.u32 %v5563_v15, %v4882_v42 }
 0x108   :  { %2886 = vmatpush.bf16.msra.mxu0 %v4307_v58  ;;  %v4562_v52 = vld [vmem:[%s8354_s1 + $0x868] sm:$0xf]  ;;  %v5483_v53 = vld [vmem:[%s8354_s1 + $0x874] sm:$0xf0]  ;;  %v5011_v56 = vor.u32 %v5595_v46, %v5010_v44 }
 0x109   :  { %2899 = vmatpush.bf16.msra.mxu1 %v4435_v59  ;;  %2864 = vmatmul.bf16.vlgmr.msrb.gmra.mxu2 %v6107_v0  ;;  %v4690_v25 = vld [vmem:[%s8354_s1 + $0x968] sm:$0xf]  ;;  %v5515_v57 = vld [vmem:[%s8354_s1 + $0x974] sm:$0xf0]  ;;  %v4563_v62 = vor.u32 %v5483_v53, %v4562_v52 }
 0x10a   :  { %2908 = vmatpush.bf16.msra.mxu2 %v4627_v61  ;;  %2877 = vmatmul.bf16.vlgmr.msrb.gmra.mxu3 %v6111_v2  ;;  %v4866_v48 = vld [vmem:[%s8354_s1 + $0xac8] sm:$0xf]  ;;  %v5559_v58 = vld [vmem:[%s8354_s1 + $0xad4] sm:$0xf0]  ;;  %v4691_v3 = vor.u32 %v5515_v57, %v4690_v25 }
 0x10b   :  { %2921 = vmatpush.bf16.msra.mxu3 %v4755_v4  ;;  %v4994_v59 = vld [vmem:[%s8354_s1 + $0xbc8] sm:$0xf]  ;;  %v5591_v61 = vld [vmem:[%s8354_s1 + $0xbd4] sm:$0xf0]  ;;  %v4867_v4 = vor.u32 %v5559_v58, %v4866_v48 }
 0x10c   :  { %2887 = vmatpush.bf16.msra.mxu0 %v4291_v11  ;;  %v2657_v63 = vpop.f32.mrf.mxu2  ;;  %v4546_v6 = vld [vmem:[%s8354_s1 + $0x848] sm:$0xf]  ;;  %v5479_v7 = vld [vmem:[%s8354_s1 + $0x854] sm:$0xf0]  ;;  %v4995_v11 = vor.u32 %v5591_v61, %v4994_v59 }
 0x10d   :  { %2900 = vmatpush.bf16.msra.mxu1 %v4419_v12  ;;  %v4674_v8 = vld [vmem:[%s8354_s1 + $0x948] sm:$0xf]  ;;  %v2658_v9 = vadd.f32 %v2657_v63, %v2645_v55  ;;  %v2670_v10 = vpop.f32.mrf.mxu3  ;;  %v5511_v12 = vld [vmem:[%s8354_s1 + $0x954] sm:$0xf0]  ;;  %v2646_v17 = vpop.f32.mrf.mxu1  ;;  %v4547_v27 = vor.u32 %v5479_v7, %v4546_v6  ;;  %v5241_v55 = vld [vmem:[%s8354_s1 + $0xec] sm:$0xf] }
 0x10e   :  { %2909 = vmatpush.bf16.msra.mxu2 %v4611_v14  ;;  %v4850_v14 = vld [vmem:[%s8354_s1 + $0xaa8] sm:$0xf]  ;;  %v5555_v18 = vld [vmem:[%s8354_s1 + $0xab4] sm:$0xf0]  ;;  %v4675_v28 = vor.u32 %v5511_v12, %v4674_v8 }
 0x10f   :  { %2922 = vmatpush.bf16.msra.mxu3 %v4739_v24  ;;  %v4978_v19 = vld [vmem:[%s8354_s1 + $0xba8] sm:$0xf]  ;;  %v5587_v23 = vld [vmem:[%s8354_s1 + $0xbb4] sm:$0xf0]  ;;  %v2671_v24 = vadd.f32 %v2670_v10, %v2658_v9  ;;  %v4851_v5 = vor.u32 %v5555_v18, %v4850_v14  ;;  %v5237_v9 = vld [vmem:[%s8354_s1 + $0xcc] sm:$0xf] }
 0x110   :  { %2888 = vmatpush.bf16.msra.mxu0 %v4275_v31  ;;  %v4530_v29 = vld [vmem:[%s8354_s1 + $0x828] sm:$0xf]  ;;  %v5475_v30 = vld [vmem:[%s8354_s1 + $0x834] sm:$0xf0]  ;;  %v4979_v32 = vor.u32 %v5587_v23, %v4978_v19  ;;  %v3588_v10 = vld [vmem:[%s8354_s1 + $0xd8] sm:$0xf0] }
 0x111   :  { %2901 = vmatpush.bf16.msra.mxu1 %v4403_v13  ;;  %v4658_v31 = vld [vmem:[%s8354_s1 + $0x928] sm:$0xf]  ;;  %v5507_v16 = vld [vmem:[%s8354_s1 + $0x934] sm:$0xf0]  ;;  %v3591_v17 = vor.u32 %v5237_v9, %v3588_v10  ;;  %v3524_v9 = vld [vmem:[%s8354_s1 + $0x58] sm:$0xf0] }
 0x112   :  { %2910 = vmatpush.bf16.msra.mxu2 %v4595_v33  ;;  %v4834_v13 = vld [vmem:[%s8354_s1 + $0xa88] sm:$0xf]  ;;  %v5551_v33 = vld [vmem:[%s8354_s1 + $0xa94] sm:$0xf0]  ;;  %v4659_v41 = vor.u32 %v5507_v16, %v4658_v31  ;;  %v3572_v31 = vld [vmem:[%s8354_s1 + $0xb8] sm:$0xf0] }
 0x113   :  { %2923 = vmatpush.bf16.msra.mxu3 %v4723_v37  ;;  %v4962_v34 = vld [vmem:[%s8354_s1 + $0xb88] sm:$0xf]  ;;  %v5583_v35 = vld [vmem:[%s8354_s1 + $0xb94] sm:$0xf0]  ;;  %v4531_v37 = vor.u32 %v5475_v30, %v4530_v29  ;;  %v4835_v42 = vor.u32 %v5551_v33, %v4834_v13  ;;  %v5233_v30 = vld [vmem:[%s8354_s1 + $0xac] sm:$0xf] }
 0x114   :  { %2889 = vmatpush.bf16.msra.mxu0 %v4259_v43  ;;  %v2683_v36 = vpop.f32.mrf.mxu0  ;;  %v4514_v38 = vld [vmem:[%s8354_s1 + $0x808] sm:$0xf]  ;;  %v2659_v40 = vpop.f32.mrf.mxu2  ;;  %v5471_v15 = vld [vmem:[%s8354_s1 + $0x814] sm:$0xf0]  ;;  %v4963_v45 = vor.u32 %v5583_v35, %v4962_v34 }
 0x115   :  { %2902 = vmatpush.bf16.msra.mxu1 %v4387_v47  ;;  %v7511_v39 = vadd.f32 %v2683_v36, %v2671_v24  ;;  %v4642_v43 = vld [vmem:[%s8354_s1 + $0x908] sm:$0xf]  ;;  %v5503_v44 = vld [vmem:[%s8354_s1 + $0x914] sm:$0xf0]  ;;  %v2672_v46 = vpop.f32.mrf.mxu3  ;;  %v4515_v25 = vor.u32 %v5471_v15, %v4514_v38  ;;  %v7579_v24 = vld [vmem:[#allocation1] sm:$0xff]  ;;  %v3575_v38 = vor.u32 %v5233_v30, %v3572_v31 }
 0x116   :  { %2911 = vmatpush.bf16.msra.mxu2 %v4579_v49  ;;  %v4818_v47 = vld [vmem:[%s8354_s1 + $0xa68] sm:$0xf]  ;;  %v5547_v49 = vld [vmem:[%s8354_s1 + $0xa74] sm:$0xf0]  ;;  %v4643_v57 = vor.u32 %v5503_v44, %v4642_v43  ;;  %v5273_v15 = vld [vmem:[%s8354_s1 + $0x1ec] sm:$0xf] }
 0x117   :  { %2924 = vmatpush.bf16.msra.mxu3 %v4707_v50  ;;  %2890 = vmatmul.bf16.vlgmr.msra.gmra.mxu0 %v6102_v60  ;;  %v4946_v50 = vld [vmem:[%s8354_s1 + $0xb68] sm:$0xf]  ;;  %v5611_v53 = vld [vmem:[%s8354_s1 + $0xc74] sm:$0xf0]  ;;  %v4819_v48 = vor.u32 %v5547_v49, %v4818_v47  ;;  %v3732_v43 = vld [vmem:[%s8354_s1 + $0x1f8] sm:$0xf0] }
 0x118   :  { %2934 = vmatpush.bf16.msrb.mxu0 %v4883_v51  ;;  %2903 = vmatmul.bf16.vlgmr.msra.gmra.mxu1 %v6109_v1  ;;  %v5579_v51 = vld [vmem:[%s8354_s1 + $0xb74] sm:$0xf0]  ;;  %v5074_v52 = vld [vmem:[%s8354_s1 + $0xc68] sm:$0xf]  ;;  %v5305_v44 = vld [vmem:[%s8354_s1 + $0x2ec] sm:$0xf] }
 0x119   :  { %2947 = vmatpush.bf16.msrb.mxu1 %v5011_v56  ;;  %v3604_v56 = vld [vmem:[%s8354_s1 + $0xf8] sm:$0xf0]  ;;  %v4947_v58 = vor.u32 %v5579_v51, %v4946_v50  ;;  %v5075_v59 = vor.u32 %v5611_v53, %v5074_v52  ;;  %v4802_v61 = vld [vmem:[%s8354_s1 + $0xa48] sm:$0xf]  ;;  %v5607_v7 = vld [vmem:[%s8354_s1 + $0xc54] sm:$0xf0] }
 0x11a   :  { %2912 = vmatpush.bf16.msra.mxu2 %v4563_v62  ;;  %v5543_v62 = vld [vmem:[%s8354_s1 + $0xa54] sm:$0xf0]  ;;  %v4930_v63 = vld [vmem:[%s8354_s1 + $0xb48] sm:$0xf]  ;;  %v5337_v47 = vld [vmem:[%s8354_s1 + $0x3ec] sm:$0xf] }
 0x11b   :  { %2925 = vmatpush.bf16.msra.mxu3 %v4691_v3  ;;  %v3607_v3 = vor.u32 %v5241_v55, %v3604_v56  ;;  %v5058_v6 = vld [vmem:[%s8354_s1 + $0xc48] sm:$0xf]  ;;  %v5539_v19 = vld [vmem:[%s8354_s1 + $0xa34] sm:$0xf0]  ;;  %v3988_v49 = vld [vmem:[%s8354_s1 + $0x3f8] sm:$0xf0]  ;;  %v3735_v55 = vor.u32 %v5273_v15, %v3732_v43 }
 0x11c   :  { %2935 = vmatpush.bf16.msrb.mxu0 %v4867_v4  ;;  %v5575_v4 = vld [vmem:[%s8354_s1 + $0xb54] sm:$0xf0]  ;;  %v2685_v8 = vpop.f32.mrf.mxu0  ;;  %v5059_v14 = vor.u32 %v5607_v7, %v5058_v6  ;;  %v4786_v18 = vld [vmem:[%s8354_s1 + $0xa28] sm:$0xf]  ;;  %v5225_v56 = vld [vmem:[%s8354_s1 + $0x6c] sm:$0xf] }
 0x11d   :  { %2948 = vmatpush.bf16.msrb.mxu1 %v4995_v11  ;;  %v4803_v11 = vor.u32 %v5543_v62, %v4802_v61  ;;  %v4931_v12 = vor.u32 %v5575_v4, %v4930_v63  ;;  %v4914_v23 = vld [vmem:[%s8354_s1 + $0xb28] sm:$0xf]  ;;  %v5535_v13 = vld [vmem:[%s8354_s1 + $0xa14] sm:$0xf0]  ;;  %v5301_v61 = vld [vmem:[%s8354_s1 + $0x2cc] sm:$0xf] }
 0x11e   :  { %2913 = vmatpush.bf16.msra.mxu2 %v4547_v27  ;;  %v5571_v27 = vld [vmem:[%s8354_s1 + $0xb34] sm:$0xf0]  ;;  %v7591_v29 = vld [vmem:[#allocation1 + $0x9] sm:$0xff]  ;;  %v3844_v62 = vld [vmem:[%s8354_s1 + $0x2d8] sm:$0xf0] }
 0x11f   :  { %2926 = vmatpush.bf16.msra.mxu3 %v4675_v28  ;;  %v5042_v28 = vld [vmem:[%s8354_s1 + $0xc28] sm:$0xf]  ;;  %v4915_v33 = vor.u32 %v5571_v27, %v4914_v23  ;;  %v5567_v36 = vld [vmem:[%s8354_s1 + $0xb14] sm:$0xf0]  ;;  %v5333_v63 = vld [vmem:[%s8354_s1 + $0x3cc] sm:$0xf] }
 0x120   :  { %2936 = vmatpush.bf16.msrb.mxu0 %v4851_v5  ;;  %v5603_v5 = vld [vmem:[%s8354_s1 + $0xc34] sm:$0xf0]  ;;  %v4770_v16 = vld [vmem:[%s8354_s1 + $0xa08] sm:$0xf]  ;;  %v5221_v8 = vld [vmem:[%s8354_s1 + $0x4c] sm:$0xf] }
 0x121   :  { %2949 = vmatpush.bf16.msrb.mxu1 %v4979_v32  ;;  %v4787_v32 = vor.u32 %v5539_v19, %v4786_v18  ;;  %v5043_v34 = vor.u32 %v5603_v5, %v5042_v28  ;;  %v4898_v35 = vld [vmem:[%s8354_s1 + $0xb08] sm:$0xf]  ;;  %v5599_v40 = vld [vmem:[%s8354_s1 + $0xc14] sm:$0xf0]  ;;  %v4771_v46 = vor.u32 %v5535_v13, %v4770_v16  ;;  %v5265_v18 = vld [vmem:[%s8354_s1 + $0x1ac] sm:$0xf]  ;;  %v3527_v16 = vor.u32 %v5221_v8, %v3524_v9 }
 0x122   :  { %2914 = vmatpush.bf16.msra.mxu2 %v4531_v37  ;;  %v5026_v37 = vld [vmem:[%s8354_s1 + $0xc08] sm:$0xf]  ;;  %v4899_v51 = vor.u32 %v5567_v36, %v4898_v35  ;;  %v3700_v19 = vld [vmem:[%s8354_s1 + $0x1b8] sm:$0xf0]  ;;  %v5297_v23 = vld [vmem:[%s8354_s1 + $0x2ac] sm:$0xf] }
 0x123   :  { %2927 = vmatpush.bf16.msra.mxu3 %v4659_v41  ;;  %v5229_v41 = vld [vmem:[%s8354_s1 + $0x8c] sm:$0xf]  ;;  %v5027_v52 = vor.u32 %v5599_v40, %v5026_v37  ;;  %v7685_v27 = vld [vmem:[#allocation1 + $0x1b] sm:$0xff]  ;;  %v3703_v13 = vor.u32 %v5265_v18, %v3700_v19 }
 0x124   :  { %2937 = vmatpush.bf16.msrb.mxu0 %v4835_v42  ;;  %v3556_v42 = vld [vmem:[%s8354_s1 + $0x98] sm:$0xf0]  ;;  %v5329_v5 = vld [vmem:[%s8354_s1 + $0x3ac] sm:$0xf] }
 0x125   :  { %2950 = vmatpush.bf16.msrb.mxu1 %v4963_v45  ;;  %v3860_v45 = vld [vmem:[%s8354_s1 + $0x2f8] sm:$0xf0]  ;;  %v2696_v50 = vpop.f32.mrf.mxu1  ;;  %v5261_v37 = vld [vmem:[%s8354_s1 + $0x18c] sm:$0xf] }
 0x126   :  { %2915 = vmatpush.bf16.msra.mxu2 %v4515_v25  ;;  %v2697_v53 = vadd.f32 %v2696_v50, %v7511_v39  ;;  %v3559_v25 = vor.u32 %v5229_v41, %v3556_v42  ;;  %v3716_v39 = vld [vmem:[%s8354_s1 + $0x1d8] sm:$0xf0]  ;;  %v5293_v40 = vld [vmem:[%s8354_s1 + $0x28c] sm:$0xf]  ;;  %v7712_v41 = vld [vmem:[#allocation1 + $0x24] sm:$0xff] }
 0x127   :  { %2928 = vmatpush.bf16.msra.mxu3 %v4643_v57  ;;  %v3540_v57 = vld [vmem:[%s8354_s1 + $0x78] sm:$0xf0]  ;;  %v5325_v43 = vld [vmem:[%s8354_s1 + $0x38c] sm:$0xf] }
 0x128   :  { %2938 = vmatpush.bf16.msrb.mxu0 %v4819_v48  ;;  %v3863_v48 = vor.u32 %v5305_v44, %v3860_v45  ;;  %v3543_v6 = vor.u32 %v5225_v56, %v3540_v57  ;;  %v3828_v28 = vld [vmem:[%s8354_s1 + $0x2b8] sm:$0xf0]  ;;  %v5213_v50 = vld [vmem:[%s8354_s1 + $0xc] sm:$0xf] }
 0x129   :  { %2951 = vmatpush.bf16.msrb.mxu1 %v4947_v58  ;;  %2916 = vmatmul.bf16.vlgmr.msra.gmra.mxu2 %v7579_v24  ;;  %v3991_v58 = vor.u32 %v5337_v47, %v3988_v49  ;;  %v3956_v30 = vld [vmem:[%s8354_s1 + $0x3b8] sm:$0xf0]  ;;  %v3831_v35 = vor.u32 %v5297_v23, %v3828_v28  ;;  %v5289_v57 = vld [vmem:[%s8354_s1 + $0x26c] sm:$0xf] }
 0x12a   :  { %2964 = vmatpush.bf16.msrb.mxu2 %v5075_v59  ;;  %2929 = vmatmul.bf16.vlgmr.msra.gmra.mxu3 %v7591_v29  ;;  %v5269_v59 = vld [vmem:[%s8354_s1 + $0x1cc] sm:$0xf]  ;;  %v3959_v36 = vor.u32 %v5329_v5, %v3956_v30  ;;  %v3812_v15 = vld [vmem:[%s8354_s1 + $0x298] sm:$0xf0] }
 0x12b   :  { %2973 = vmatpush.bf16.msrb.mxu3 %v3607_v3  ;;  %v3972_v3 = vld [vmem:[%s8354_s1 + $0x3d8] sm:$0xf0]  ;;  %v3719_v7 = vor.u32 %v5269_v59, %v3716_v39  ;;  %v5369_v39 = vld [vmem:[%s8354_s1 + $0x4ec] sm:$0xf] }
 0x12c   :  { %2939 = vmatpush.bf16.msrb.mxu0 %v4803_v11  ;;  %v2709_v4 = vpop.f32.mrf.mxu2  ;;  %v3940_v44 = vld [vmem:[%s8354_s1 + $0x398] sm:$0xf0]  ;;  %v5285_v8 = vld [vmem:[%s8354_s1 + $0x24c] sm:$0xf] }
 0x12d   :  { %2952 = vmatpush.bf16.msrb.mxu1 %v4931_v12  ;;  %v2710_v10 = vadd.f32 %v2709_v4, %v2697_v53  ;;  %v2722_v11 = vpop.f32.mrf.mxu3  ;;  %v3847_v12 = vor.u32 %v5301_v61, %v3844_v62  ;;  %v3815_v53 = vor.u32 %v5293_v40, %v3812_v15  ;;  %v3668_v56 = vld [vmem:[%s8354_s1 + $0x178] sm:$0xf0]  ;;  %v5365_v18 = vld [vmem:[%s8354_s1 + $0x4cc] sm:$0xf] }
 0x12e   :  { %2965 = vmatpush.bf16.msrb.mxu2 %v5059_v14  ;;  %v3975_v14 = vor.u32 %v5333_v63, %v3972_v3  ;;  %v3924_v59 = vld [vmem:[%s8354_s1 + $0x378] sm:$0xf0]  ;;  %v5249_v30 = vld [vmem:[%s8354_s1 + $0x12c] sm:$0xf] }
 0x12f   :  { %2974 = vmatpush.bf16.msrb.mxu3 %v3591_v17  ;;  %v7682_v17 = vld [vmem:[#allocation1 + $0x12] sm:$0xff]  ;;  %v2723_v31 = vadd.f32 %v2722_v11, %v2710_v10  ;;  %v4116_v61 = vld [vmem:[%s8354_s1 + $0x4f8] sm:$0xf0]  ;;  %v5317_v11 = vld [vmem:[%s8354_s1 + $0x34c] sm:$0xf] }
 0x130   :  { %2940 = vmatpush.bf16.msrb.mxu0 %v4787_v32  ;;  %v2698_v32 = vpop.f32.mrf.mxu1  ;;  %v4119_v9 = vor.u32 %v5369_v39, %v4116_v61  ;;  %v3780_v10 = vld [vmem:[%s8354_s1 + $0x258] sm:$0xf0] }
 0x131   :  { %2953 = vmatpush.bf16.msrb.mxu1 %v4915_v33  ;;  %v5217_v33 = vld [vmem:[%s8354_s1 + $0x2c] sm:$0xf]  ;;  %v4100_v19 = vld [vmem:[%s8354_s1 + $0x4d8] sm:$0xf0]  ;;  %v3783_v28 = vor.u32 %v5285_v8, %v3780_v10 }
 0x132   :  { %2966 = vmatpush.bf16.msrb.mxu2 %v5043_v34  ;;  %v3508_v34 = vld [vmem:[%s8354_s1 + $0x38] sm:$0xf0]  ;;  %v5281_v32 = vld [vmem:[%s8354_s1 + $0x22c] sm:$0xf] }
 0x133   :  { %2975 = vmatpush.bf16.msrb.mxu3 %v3575_v38  ;;  %v3684_v38 = vld [vmem:[%s8354_s1 + $0x198] sm:$0xf0]  ;;  %v3511_v47 = vor.u32 %v5217_v33, %v3508_v34  ;;  %v5313_v33 = vld [vmem:[%s8354_s1 + $0x32c] sm:$0xf] }
 0x134   :  { %2941 = vmatpush.bf16.msrb.mxu0 %v4771_v46  ;;  %v2735_v42 = vpop.f32.mrf.mxu0  ;;  %v2711_v45 = vpop.f32.mrf.mxu2  ;;  %v3687_v49 = vor.u32 %v5261_v37, %v3684_v38  ;;  %v3892_v34 = vld [vmem:[%s8354_s1 + $0x338] sm:$0xf0]  ;;  %v5245_v38 = vld [vmem:[%s8354_s1 + $0x10c] sm:$0xf] }
 0x135   :  { %2954 = vmatpush.bf16.msrb.mxu1 %v4899_v51  ;;  %v7725_v46 = vadd.f32 %v2735_v42, %v2723_v31  ;;  %v3492_v51 = vld [vmem:[%s8354_s1 + $0x18] sm:$0xf0]  ;;  %v3895_v15 = vor.u32 %v5313_v33, %v3892_v34  ;;  %v5429_v8 = vld [vmem:[%s8354_s1 + $0x6cc] sm:$0xf] }
 0x136   :  { %2967 = vmatpush.bf16.msrb.mxu2 %v5027_v52  ;;  %v2724_v52 = vpop.f32.mrf.mxu3  ;;  %v3495_v62 = vor.u32 %v5213_v50, %v3492_v51  ;;  %v3636_v31 = vld [vmem:[%s8354_s1 + $0x138] sm:$0xf0]  ;;  %v5461_v10 = vld [vmem:[%s8354_s1 + $0x7cc] sm:$0xf] }
 0x137   :  { %2976 = vmatpush.bf16.msrb.mxu3 %v3559_v25  ;;  %2942 = vmatmul.bf16.vlgmr.msrb.gmra.mxu0 %v7682_v17  ;;  %v3943_v25 = vor.u32 %v5325_v43, %v3940_v44  ;;  %v3639_v37 = vor.u32 %v5249_v30, %v3636_v31  ;;  %v3620_v40 = vld [vmem:[%s8354_s1 + $0x118] sm:$0xf0]  ;;  %v5277_v43 = vld [vmem:[%s8354_s1 + $0x20c] sm:$0xf] }
 0x138   :  { %2986 = vmatpush.bf16.msra.mxu0 %v3735_v55  ;;  %2955 = vmatmul.bf16.vlgmr.msrb.gmra.mxu1 %v7685_v27  ;;  %v5257_v55 = vld [vmem:[%s8354_s1 + $0x16c] sm:$0xf]  ;;  %v4068_v50 = vld [vmem:[%s8354_s1 + $0x498] sm:$0xf0] }
 0x139   :  { %2999 = vmatpush.bf16.msra.mxu1 %v3863_v48  ;;  %5082 = vmatmul.msk.bf16.vlgmr.msrb.gmra.mxu2 %vm2463_vm0, %v7712_v41  ;;  %v3796_v48 = vld [vmem:[%s8354_s1 + $0x278] sm:$0xf0]  ;;  %v3671_v63 = vor.u32 %v5257_v55, %v3668_v56  ;;  %v5309_v44 = vld [vmem:[%s8354_s1 + $0x30c] sm:$0xf]  ;;  %v3623_v56 = vor.u32 %v5245_v38, %v3620_v40 }
 0x13a   :  { %3012 = vmatpush.bf16.msra.mxu2 %v3991_v58  ;;  %v5321_v58 = vld [vmem:[%s8354_s1 + $0x36c] sm:$0xf]  ;;  %v3799_v3 = vor.u32 %v5289_v57, %v3796_v48  ;;  %v4372_v57 = vld [vmem:[%s8354_s1 + $0x6f8] sm:$0xf0] }
 0x13b   :  { %2977 = vmatpush.bf16.msrb.mxu3 %v3543_v6  ;;  %v3927_v4 = vor.u32 %v5321_v58, %v3924_v59  ;;  %v5253_v6 = vld [vmem:[%s8354_s1 + $0x14c] sm:$0xf]  ;;  %v4500_v58 = vld [vmem:[%s8354_s1 + $0x7f8] sm:$0xf0] }
 0x13c   :  { %2987 = vmatpush.bf16.msra.mxu0 %v3719_v7  ;;  %v3652_v7 = vld [vmem:[%s8354_s1 + $0x158] sm:$0xf0]  ;;  %v5401_v52 = vld [vmem:[%s8354_s1 + $0x5ec] sm:$0xf] }
 0x13d   :  { %3000 = vmatpush.bf16.msra.mxu1 %v3847_v12  ;;  %v3908_v12 = vld [vmem:[%s8354_s1 + $0x358] sm:$0xf0]  ;;  %v3655_v23 = vor.u32 %v5253_v6, %v3652_v7  ;;  %v5465_v48 = vld [vmem:[%s8354_s1 + $0x7ec] sm:$0xf] }
 0x13e   :  { %3013 = vmatpush.bf16.msra.mxu2 %v3975_v14  ;;  %v2737_v14 = vpop.f32.mrf.mxu0  ;;  %v3911_v5 = vor.u32 %v5317_v11, %v3908_v12  ;;  %v5397_v6 = vld [vmem:[%s8354_s1 + $0x5cc] sm:$0xf]  ;;  %v4228_v7 = vld [vmem:[%s8354_s1 + $0x5d8] sm:$0xf0] }
 0x13f   :  { %2978 = vmatpush.bf16.msrb.mxu3 %v3527_v16  ;;  %v4103_v16 = vor.u32 %v5365_v18, %v4100_v19  ;;  %v4484_v11 = vld [vmem:[%s8354_s1 + $0x7d8] sm:$0xf0]  ;;  %v4231_v18 = vor.u32 %v5397_v6, %v4228_v7  ;;  %v5425_v33 = vld [vmem:[%s8354_s1 + $0x6ac] sm:$0xf] }
 0x140   :  { %2988 = vmatpush.bf16.msra.mxu0 %v3703_v13  ;;  %v3764_v13 = vld [vmem:[%s8354_s1 + $0x238] sm:$0xf0]  ;;  %v4487_v31 = vor.u32 %v5461_v10, %v4484_v11  ;;  %v5381_v11 = vld [vmem:[%s8354_s1 + $0x54c] sm:$0xf] }
 0x141   :  { %3001 = vmatpush.bf16.msra.mxu1 %v3831_v35  ;;  %v5361_v35 = vld [vmem:[%s8354_s1 + $0x4ac] sm:$0xf]  ;;  %v3767_v42 = vor.u32 %v5281_v32, %v3764_v13  ;;  %v4212_v13 = vld [vmem:[%s8354_s1 + $0x5b8] sm:$0xf0] }
 0x142   :  { %3014 = vmatpush.bf16.msra.mxu2 %v3959_v36  ;;  %v4084_v36 = vld [vmem:[%s8354_s1 + $0x4b8] sm:$0xf0] }
 0x143   :  { %2979 = vmatpush.bf16.msrb.mxu3 %v3511_v47  ;;  %v4087_v45 = vor.u32 %v5361_v35, %v4084_v36  ;;  %v3876_v47 = vld [vmem:[%s8354_s1 + $0x318] sm:$0xf0]  ;;  %v5457_v35 = vld [vmem:[%s8354_s1 + $0x7ac] sm:$0xf] }
 0x144   :  { %2989 = vmatpush.bf16.msra.mxu0 %v3687_v49  ;;  %v5357_v49 = vld [vmem:[%s8354_s1 + $0x48c] sm:$0xf]  ;;  %v3879_v39 = vor.u32 %v5309_v44, %v3876_v47  ;;  %v4340_v34 = vld [vmem:[%s8354_s1 + $0x6b8] sm:$0xf0] }
 0x145   :  { %3002 = vmatpush.bf16.msra.mxu1 %v3815_v53  ;;  %v2748_v51 = vpop.f32.mrf.mxu1  ;;  %v4244_v53 = vld [vmem:[%s8354_s1 + $0x5f8] sm:$0xf0]  ;;  %v4071_v61 = vor.u32 %v5357_v49, %v4068_v50  ;;  %v5453_v47 = vld [vmem:[%s8354_s1 + $0x78c] sm:$0xf] }
 0x146   :  { %3015 = vmatpush.bf16.msra.mxu2 %v3943_v25  ;;  %v5433_v25 = vld [vmem:[%s8354_s1 + $0x6ec] sm:$0xf]  ;;  %v2749_v55 = vadd.f32 %v2748_v51, %v7725_v46  ;;  %v4247_v46 = vor.u32 %v5401_v52, %v4244_v53  ;;  %v4468_v36 = vld [vmem:[%s8354_s1 + $0x7b8] sm:$0xf0] }
 0x147   :  { %2980 = vmatpush.bf16.msrb.mxu3 %v3495_v62  ;;  %v5353_v62 = vld [vmem:[%s8354_s1 + $0x46c] sm:$0xf]  ;;  %v4452_v49 = vld [vmem:[%s8354_s1 + $0x798] sm:$0xf0] }
 0x148   :  { %2990 = vmatpush.bf16.msra.mxu0 %v3671_v63  ;;  %v4052_v63 = vld [vmem:[%s8354_s1 + $0x478] sm:$0xf0]  ;;  %v5341_v53 = vld [vmem:[%s8354_s1 + $0x40c] sm:$0xf] }
 0x149   :  { %3003 = vmatpush.bf16.msra.mxu1 %v3799_v3  ;;  %v4375_v3 = vor.u32 %v5433_v25, %v4372_v57  ;;  %v4055_v12 = vor.u32 %v5353_v62, %v4052_v63  ;;  %v4004_v25 = vld [vmem:[%s8354_s1 + $0x418] sm:$0xf0] }
 0x14a   :  { %3016 = vmatpush.bf16.msra.mxu2 %v3927_v4  ;;  %2981 = vmatmul.bf16.vlgmr.msrb.gmra.mxu3 %v6014_v21  ;;  %v3748_v21 = vld [vmem:[%s8354_s1 + $0x218] sm:$0xf0]  ;;  %v4503_v4 = vor.u32 %v5465_v48, %v4500_v58  ;;  %v4455_v48 = vor.u32 %v5453_v47, %v4452_v49  ;;  %v5385_v58 = vld [vmem:[%s8354_s1 + $0x56c] sm:$0xf]  ;;  %v4007_v7 = vor.u32 %v5341_v53, %v4004_v25 }
 0x14b   :  { %3025 = vmatpush.bf16.msra.mxu3 %v4119_v9  ;;  %v3751_v59 = vor.u32 %v5277_v43, %v3748_v21  ;;  %v4356_v9 = vld [vmem:[%s8354_s1 + $0x6d8] sm:$0xf0]  ;;  %v4471_v43 = vor.u32 %v5457_v35, %v4468_v36  ;;  %v5421_v21 = vld [vmem:[%s8354_s1 + $0x68c] sm:$0xf] }
 0x14c   :  { %2991 = vmatpush.bf16.msra.mxu0 %v3655_v23  ;;  %v2761_v14 = vpop.f32.mrf.mxu2  ;;  %v5349_v23 = vld [vmem:[%s8354_s1 + $0x44c] sm:$0xf]  ;;  %v4359_v30 = vor.u32 %v5429_v8, %v4356_v9  ;;  %v4436_v62 = vld [vmem:[%s8354_s1 + $0x778] sm:$0xf0] }
 0x14d   :  { %3004 = vmatpush.bf16.msra.mxu1 %v3783_v28  ;;  %v2774_v19 = vpop.f32.mrf.mxu3  ;;  %v4036_v28 = vld [vmem:[%s8354_s1 + $0x458] sm:$0xf0]  ;;  %v2750_v32 = vpop.f32.mrf.mxu1  ;;  %v5409_v35 = vld [vmem:[%s8354_s1 + $0x62c] sm:$0xf] }
 0x14e   :  { %3017 = vmatpush.bf16.msra.mxu2 %v3911_v5  ;;  %v2762_v5 = vadd.f32 %v2761_v14, %v2749_v55  ;;  %v4039_v38 = vor.u32 %v5349_v23, %v4036_v28  ;;  %v5413_v14 = vld [vmem:[%s8354_s1 + $0x64c] sm:$0xf]  ;;  %v4420_v28 = vld [vmem:[%s8354_s1 + $0x758] sm:$0xf0] }
 0x14f   :  { %3026 = vmatpush.bf16.msra.mxu3 %v4103_v16  ;;  %v5393_v16 = vld [vmem:[%s8354_s1 + $0x5ac] sm:$0xf]  ;;  %v4756_v25 = vld [vmem:[%s8354_s1 + $0x9f8] sm:$0xf0] }
 0x150   :  { %2992 = vmatpush.bf16.msra.mxu0 %v3639_v37  ;;  %v2775_v37 = vadd.f32 %v2774_v19, %v2762_v5  ;;  %v4215_v40 = vor.u32 %v5393_v16, %v4212_v13  ;;  %v4292_v19 = vld [vmem:[%s8354_s1 + $0x658] sm:$0xf0]  ;;  %v5445_v23 = vld [vmem:[%s8354_s1 + $0x74c] sm:$0xf] }
 0x151   :  { %3005 = vmatpush.bf16.msra.mxu1 %v3767_v42  ;;  %v5345_v42 = vld [vmem:[%s8354_s1 + $0x42c] sm:$0xf]  ;;  %v4295_v16 = vor.u32 %v5413_v14, %v4292_v19  ;;  %v4423_v13 = vor.u32 %v5445_v23, %v4420_v28  ;;  %v4548_v28 = vld [vmem:[%s8354_s1 + $0x858] sm:$0xf0] }
 0x152   :  { %3018 = vmatpush.bf16.msra.mxu2 %v3895_v15  ;;  %v4020_v15 = vld [vmem:[%s8354_s1 + $0x438] sm:$0xf0]  ;;  %v5437_v47 = vld [vmem:[%s8354_s1 + $0x70c] sm:$0xf] }
 0x153   :  { %3027 = vmatpush.bf16.msra.mxu3 %v4087_v45  ;;  %v4324_v45 = vld [vmem:[%s8354_s1 + $0x698] sm:$0xf0]  ;;  %v4023_v51 = vor.u32 %v5345_v42, %v4020_v15  ;;  %v5489_v42 = vld [vmem:[%s8354_s1 + $0x8ac] sm:$0xf] }
 0x154   :  { %2993 = vmatpush.bf16.msra.mxu0 %v3623_v56  ;;  %v2787_v44 = vpop.f32.mrf.mxu0  ;;  %v2763_v56 = vpop.f32.mrf.mxu2  ;;  %v4327_v57 = vor.u32 %v5421_v21, %v4324_v45  ;;  %v4596_v15 = vld [vmem:[%s8354_s1 + $0x8b8] sm:$0xf0]  ;;  %v5529_v53 = vld [vmem:[%s8354_s1 + $0x9ec] sm:$0xf] }
 0x155   :  { %3006 = vmatpush.bf16.msra.mxu1 %v3751_v59  ;;  %v2788_v50 = vadd.f32 %v2787_v44, %v2775_v37  ;;  %v2776_v55 = vpop.f32.mrf.mxu3  ;;  %v4180_v59 = vld [vmem:[%s8354_s1 + $0x578] sm:$0xf0]  ;;  %v2800_v63 = vpop.f32.mrf.mxu1  ;;  %v5405_v44 = vld [vmem:[%s8354_s1 + $0x60c] sm:$0xf]  ;;  %v4599_v49 = vor.u32 %v5489_v42, %v4596_v15 }
 0x156   :  { %3019 = vmatpush.bf16.msra.mxu2 %v3879_v39  ;;  %v5417_v39 = vld [vmem:[%s8354_s1 + $0x66c] sm:$0xf]  ;;  %v4183_v8 = vor.u32 %v5385_v58, %v4180_v59  ;;  %v4276_v37 = vld [vmem:[%s8354_s1 + $0x638] sm:$0xf0] }
 0x157   :  { %3028 = vmatpush.bf16.msra.mxu3 %v4071_v61  ;;  %2994 = vmatmul.bf16.vlgmr.msra.gmra.mxu0 %v6025_v26  ;;  %v4343_v26 = vor.u32 %v5425_v33, %v4340_v34  ;;  %v4308_v61 = vld [vmem:[%s8354_s1 + $0x678] sm:$0xf0]  ;;  %v7954_v6 = vadd.f32 %v2800_v63, %v2788_v50  ;;  %v5377_v33 = vld [vmem:[%s8354_s1 + $0x52c] sm:$0xf] }
 0x158   :  { %3038 = vmatpush.bf16.msrb.mxu0 %v4247_v46  ;;  %3007 = vmatmul.bf16.vlgmr.msra.gmra.mxu1 %v6012_v20  ;;  %v5389_v20 = vld [vmem:[%s8354_s1 + $0x58c] sm:$0xf]  ;;  %v4311_v9 = vor.u32 %v5417_v39, %v4308_v61  ;;  %v4148_v34 = vld [vmem:[%s8354_s1 + $0x538] sm:$0xf0] }
 0x159   :  { %3051 = vmatpush.bf16.msrb.mxu1 %v4375_v3  ;;  %3020 = vmatmul.bf16.vlgmr.msra.gmra.mxu2 %v6016_v22  ;;  %v4196_v22 = vld [vmem:[%s8354_s1 + $0x598] sm:$0xf0]  ;;  %v5449_v46 = vld [vmem:[%s8354_s1 + $0x76c] sm:$0xf] }
 0x15a   :  { %3064 = vmatpush.bf16.msrb.mxu2 %v4503_v4  ;;  %v4199_v52 = vor.u32 %v5389_v20, %v4196_v22  ;;  %v5497_v3 = vld [vmem:[%s8354_s1 + $0x8ec] sm:$0xf]  ;;  %v4628_v4 = vld [vmem:[%s8354_s1 + $0x8f8] sm:$0xf0]  ;;  %v4439_v10 = vor.u32 %v5449_v46, %v4436_v62  ;;  %v4759_v46 = vor.u32 %v5529_v53, %v4756_v25 }
 0x15b   :  { %3029 = vmatpush.bf16.msra.mxu3 %v4055_v12  ;;  %v4164_v12 = vld [vmem:[%s8354_s1 + $0x558] sm:$0xf0]  ;;  %v5373_v20 = vld [vmem:[%s8354_s1 + $0x50c] sm:$0xf] }
 0x15c   :  { %3039 = vmatpush.bf16.msrb.mxu0 %v4231_v18  ;;  %v4631_v18 = vor.u32 %v5497_v3, %v4628_v4  ;;  %v2789_v5 = vpop.f32.mrf.mxu0  ;;  %v4167_v32 = vor.u32 %v5381_v11, %v4164_v12  ;;  %v4132_v22 = vld [vmem:[%s8354_s1 + $0x518] sm:$0xf0]  ;;  %v5561_v55 = vld [vmem:[%s8354_s1 + $0xaec] sm:$0xf] }
 0x15d   :  { %3052 = vmatpush.bf16.msrb.mxu1 %v4359_v30  ;;  %v5493_v30 = vld [vmem:[%s8354_s1 + $0x8cc] sm:$0xf]  ;;  %v4260_v45 = vld [vmem:[%s8354_s1 + $0x618] sm:$0xf0]  ;;  %v4135_v56 = vor.u32 %v5373_v20, %v4132_v22 }
 0x15e   :  { %3065 = vmatpush.bf16.msrb.mxu2 %v4487_v31  ;;  %v4612_v31 = vld [vmem:[%s8354_s1 + $0x8d8] sm:$0xf0]  ;;  %v4263_v59 = vor.u32 %v5405_v44, %v4260_v45  ;;  %v5481_v62 = vld [vmem:[%s8354_s1 + $0x86c] sm:$0xf] }
 0x15f   :  { %3030 = vmatpush.bf16.msra.mxu3 %v4039_v38  ;;  %v4615_v36 = vor.u32 %v5493_v30, %v4612_v31  ;;  %v5441_v38 = vld [vmem:[%s8354_s1 + $0x72c] sm:$0xf]  ;;  %v4388_v50 = vld [vmem:[%s8354_s1 + $0x718] sm:$0xf0] }
 0x160   :  { %3040 = vmatpush.bf16.msrb.mxu0 %v4215_v40  ;;  %v4404_v40 = vld [vmem:[%s8354_s1 + $0x738] sm:$0xf0]  ;;  %v4391_v39 = vor.u32 %v5437_v47, %v4388_v50  ;;  %v5589_v11 = vld [vmem:[%s8354_s1 + $0xbcc] sm:$0xf] }
 0x161   :  { %3053 = vmatpush.bf16.msrb.mxu1 %v4343_v26  ;;  %v2802_v26 = vpop.f32.mrf.mxu1  ;;  %v4407_v21 = vor.u32 %v5441_v38, %v4404_v40  ;;  %v5012_v58 = vld [vmem:[%s8354_s1 + $0xbf8] sm:$0xf0]  ;;  %v5477_v23 = vld [vmem:[%s8354_s1 + $0x84c] sm:$0xf] }
 0x162   :  { %3066 = vmatpush.bf16.msrb.mxu2 %v4471_v43  ;;  %v4151_v43 = vor.u32 %v5377_v33, %v4148_v34  ;;  %v4564_v63 = vld [vmem:[%s8354_s1 + $0x878] sm:$0xf0]  ;;  %v5585_v34 = vld [vmem:[%s8354_s1 + $0xbac] sm:$0xf] }
 0x163   :  { %3031 = vmatpush.bf16.msra.mxu3 %v4023_v51  ;;  %v5485_v51 = vld [vmem:[%s8354_s1 + $0x88c] sm:$0xf]  ;;  %v4996_v12 = vld [vmem:[%s8354_s1 + $0xbd8] sm:$0xf0] }
 0x164   :  { %3041 = vmatpush.bf16.msrb.mxu0 %v4199_v52  ;;  %v4580_v52 = vld [vmem:[%s8354_s1 + $0x898] sm:$0xf0]  ;;  %v4999_v31 = vor.u32 %v5589_v11, %v4996_v12  ;;  %v5549_v15 = vld [vmem:[%s8354_s1 + $0xa8c] sm:$0xf] }
 0x165   :  { %3054 = vmatpush.bf16.msrb.mxu1 %v4327_v57  ;;  %v4884_v57 = vld [vmem:[%s8354_s1 + $0xaf8] sm:$0xf0]  ;;  %v4583_v61 = vor.u32 %v5485_v51, %v4580_v52  ;;  %v5469_v47 = vld [vmem:[%s8354_s1 + $0x80c] sm:$0xf] }
 0x166   :  { %3067 = vmatpush.bf16.msrb.mxu2 %v4455_v48  ;;  %v5593_v48 = vld [vmem:[%s8354_s1 + $0xbec] sm:$0xf]  ;;  %v4887_v3 = vor.u32 %v5561_v55, %v4884_v57  ;;  %v4852_v33 = vld [vmem:[%s8354_s1 + $0xab8] sm:$0xf0] }
 0x167   :  { %3032 = vmatpush.bf16.msra.mxu3 %v4007_v7  ;;  %v5015_v4 = vor.u32 %v5593_v48, %v5012_v58  ;;  %v5525_v7 = vld [vmem:[%s8354_s1 + $0x9cc] sm:$0xf]  ;;  %v4708_v42 = vld [vmem:[%s8354_s1 + $0x998] sm:$0xf0] }
 0x168   :  { %3042 = vmatpush.bf16.msrb.mxu0 %v4183_v8  ;;  %v4740_v8 = vld [vmem:[%s8354_s1 + $0x9d8] sm:$0xf0]  ;;  %v5513_v53 = vld [vmem:[%s8354_s1 + $0x96c] sm:$0xf] }
 0x169   :  { %3055 = vmatpush.bf16.msrb.mxu1 %v4311_v9  ;;  %v5557_v9 = vld [vmem:[%s8354_s1 + $0xacc] sm:$0xf]  ;;  %v4743_v19 = vor.u32 %v5525_v7, %v4740_v8  ;;  %v4836_v26 = vld [vmem:[%s8354_s1 + $0xa98] sm:$0xf0] }
 0x16a   :  { %3068 = vmatpush.bf16.msrb.mxu2 %v4439_v10  ;;  %3033 = vmatmul.bf16.vlgmr.msra.gmra.mxu3 %v6107_v0  ;;  %v4279_v0 = vor.u32 %v5409_v35, %v4276_v37  ;;  %v4868_v10 = vld [vmem:[%s8354_s1 + $0xad8] sm:$0xf0]  ;;  %v4839_v51 = vor.u32 %v5549_v15, %v4836_v26  ;;  %v5545_v55 = vld [vmem:[%s8354_s1 + $0xa6c] sm:$0xf] }
 0x16b   :  { %3077 = vmatpush.bf16.msrb.mxu3 %v4631_v18  ;;  %v4567_v18 = vor.u32 %v5481_v62, %v4564_v63  ;;  %v4871_v30 = vor.u32 %v5557_v9, %v4868_v10  ;;  %v4980_v35 = vld [vmem:[%s8354_s1 + $0xbb8] sm:$0xf0]  ;;  %v5577_v57 = vld [vmem:[%s8354_s1 + $0xb6c] sm:$0xf] }
 0x16c   :  { %3043 = vmatpush.bf16.msrb.mxu0 %v4167_v32  ;;  %v8071_v14 = vpop.f32.mrf.mxu2  ;;  %v5521_v32 = vld [vmem:[%s8354_s1 + $0x9ac] sm:$0xf]  ;;  %v4532_v37 = vld [vmem:[%s8354_s1 + $0x838] sm:$0xf0]  ;;  %v4983_v40 = vor.u32 %v5585_v34, %v4980_v35 }
 0x16d   :  { %3056 = vmatpush.bf16.msrb.mxu1 %v4295_v16  ;;  %v8079_v5 = vpop.f32.mrf.mxu3  ;;  %v4724_v16 = vld [vmem:[%s8354_s1 + $0x9b8] sm:$0xf0]  ;;  %v5609_v58 = vld [vmem:[%s8354_s1 + $0xc6c] sm:$0xf] }
 0x16e   :  { %3069 = vmatpush.bf16.msrb.mxu2 %v4423_v13  ;;  %v5553_v13 = vld [vmem:[%s8354_s1 + $0xaac] sm:$0xf]  ;;  %v4964_v20 = vld [vmem:[%s8354_s1 + $0xb98] sm:$0xf0] }
 0x16f   :  { %3078 = vmatpush.bf16.msrb.mxu3 %v4615_v36  ;;  %v4551_v36 = vor.u32 %v5477_v23, %v4548_v28  ;;  %v4855_v38 = vor.u32 %v5553_v13, %v4852_v33  ;;  %v4692_v25 = vld [vmem:[%s8354_s1 + $0x978] sm:$0xf0]  ;;  %v5509_v63 = vld [vmem:[%s8354_s1 + $0x94c] sm:$0xf] }
 0x170   :  { %3044 = vmatpush.bf16.msrb.mxu0 %v4151_v43  ;;  %v5581_v43 = vld [vmem:[%s8354_s1 + $0xb8c] sm:$0xf]  ;;  %v4948_v48 = vld [vmem:[%s8354_s1 + $0xb78] sm:$0xf0] }
 0x171   :  { %3057 = vmatpush.bf16.msrb.mxu1 %v4279_v0  ;;  %v4967_v52 = vor.u32 %v5581_v43, %v4964_v20  ;;  %v4951_v62 = vor.u32 %v5577_v57, %v4948_v48  ;;  %v4804_v8 = vld [vmem:[%s8354_s1 + $0xa58] sm:$0xf0]  ;;  %v5573_v9 = vld [vmem:[%s8354_s1 + $0xb4c] sm:$0xf]  ;;  %v8252_v57 = vld [vmem:[%s8355_s2] sm:$0xf] }
 0x172   :  { %3070 = vmatpush.bf16.msrb.mxu2 %v4407_v21  ;;  %v4932_v10 = vld [vmem:[%s8354_s1 + $0xb58] sm:$0xf0]  ;;  %v5605_v12 = vld [vmem:[%s8354_s1 + $0xc4c] sm:$0xf]  ;;  %v428_v48 = vperm.slane %v8252_v57, 2 }
 0x173   :  { %3079 = vmatpush.bf16.msrb.mxu3 %v4599_v49  ;;  %v4516_v49 = vld [vmem:[%s8354_s1 + $0x818] sm:$0xf0]  ;;  %v5569_v34 = vld [vmem:[%s8354_s1 + $0xb2c] sm:$0xf] }
 0x174   :  { %3045 = vmatpush.bf16.msrb.mxu0 %v4135_v56  ;;  %v8126_v22 = vpop.f32.mrf.mxu0  ;;  %v2815_v21 = vpop.f32.mrf.mxu2  ;;  %v4820_v56 = vld [vmem:[%s8354_s1 + $0xa78] sm:$0xf0]  ;;  %v5565_v26 = vld [vmem:[%s8354_s1 + $0xb0c] sm:$0xf] }
 0x175   :  { %3058 = vmatpush.bf16.msrb.mxu1 %v4263_v59  ;;  %v8128_v0 = vpop.f32.mrf.mxu1  ;;  %v2828_v50 = vpop.f32.mrf.mxu3  ;;  %v5076_v59 = vld [vmem:[%s8354_s1 + $0xc78] sm:$0xf0]  ;;  %v5597_v21 = vld [vmem:[%s8354_s1 + $0xc0c] sm:$0xf] }
 0x176   :  { %3071 = vmatpush.bf16.msrb.mxu2 %v4391_v39  ;;  %v4519_v39 = vor.u32 %v5469_v47, %v4516_v49  ;;  %v5079_v7 = vor.u32 %v5609_v58, %v5076_v59  ;;  %v4788_v33 = vld [vmem:[%s8354_s1 + $0xa38] sm:$0xf0]  ;;  %v5634_v58 = vld [vmem:[%s8356_s3 + $0xb0] sm:$0xff]  ;;  %v5625_v59 = vld [vmem:[%s8356_s3 + $0x68] sm:$0xff] }
 0x177   :  { %3080 = vmatpush.bf16.msrb.mxu3 %v4583_v61  ;;  %3046 = vmatmul.bf16.vlgmr.msrb.gmra.mxu0 %v6111_v2  ;;  %v4727_v2 = vor.u32 %v5521_v32, %v4724_v16  ;;  %v4695_v61 = vor.u32 %v5513_v53, %v4692_v25  ;;  %v4660_v32 = vld [vmem:[%s8354_s1 + $0x938] sm:$0xf0]  ;;  %v5537_v16 = vld [vmem:[%s8354_s1 + $0xa2c] sm:$0xf]  ;;  %v5618_v25 = vld [vmem:[%s8356_s3 + $0x30] sm:$0xff] }
 0x178   :  { %3090 = vmatpush.bf16.msra.mxu0 %v4759_v46  ;;  %3059 = vmatmul.bf16.vlgmr.msrb.gmra.mxu1 %v6102_v60  ;;  %v5517_v60 = vld [vmem:[%s8354_s1 + $0x98c] sm:$0xf]  ;;  %v4823_v46 = vor.u32 %v5545_v55, %v4820_v56  ;;  %v4916_v35 = vld [vmem:[%s8354_s1 + $0xb38] sm:$0xf0]  ;;  %v5626_v55 = vld [vmem:[%s8356_s3 + $0x70] sm:$0xff] }
 0x179   :  { %3103 = vmatpush.bf16.msra.mxu1 %v4887_v3  ;;  %3072 = vmatmul.bf16.vlgmr.msrb.gmra.mxu2 %v6109_v1  ;;  %v5473_v1 = vld [vmem:[%s8354_s1 + $0x82c] sm:$0xf]  ;;  %v4711_v45 = vor.u32 %v5517_v60, %v4708_v42  ;;  %v4676_v3 = vld [vmem:[%s8354_s1 + $0x958] sm:$0xf0] }
 0x17a   :  { %3116 = vmatpush.bf16.msra.mxu2 %v5015_v4  ;;  %v4535_v44 = vor.u32 %v5473_v1, %v4532_v37  ;;  %v5541_v4 = vld [vmem:[%s8354_s1 + $0xa4c] sm:$0xf]  ;;  %v4679_v23 = vor.u32 %v5509_v63, %v4676_v3  ;;  %v4791_v37 = vor.u32 %v5537_v16, %v4788_v33  ;;  %v4772_v15 = vld [vmem:[%s8354_s1 + $0xa18] sm:$0xf0]  ;;  %v5632_v3 = vld [vmem:[%s8356_s3 + $0xa0] sm:$0xff]  ;;  %v3143_v16 = vmax.f32 %v7954_v6, 0.0 }
 0x17b   :  { %3081 = vmatpush.bf16.msrb.mxu3 %v4567_v18  ;;  %v5060_v18 = vld [vmem:[%s8354_s1 + $0xc58] sm:$0xf0]  ;;  %v4807_v28 = vor.u32 %v5541_v4, %v4804_v8  ;;  %v5533_v60 = vld [vmem:[%s8354_s1 + $0xa0c] sm:$0xf]  ;;  %v5628_v33 = vld [vmem:[%s8356_s3 + $0x80] sm:$0xff] }
 0x17c   :  { %3091 = vmatpush.bf16.msra.mxu0 %v4743_v19  ;;  %v2841_v11 = vpop.f32.mrf.mxu0  ;;  %v5063_v13 = vor.u32 %v5605_v12, %v5060_v18  ;;  %v4900_v43 = vld [vmem:[%s8354_s1 + $0xb18] sm:$0xf0]  ;;  %v5622_v12 = vld [vmem:[%s8356_s3 + $0x50] sm:$0xff] }
 0x17d   :  { %3104 = vmatpush.bf16.msra.mxu1 %v4871_v30  ;;  %v2854_v19 = vpop.f32.mrf.mxu1  ;;  %v4935_v30 = vor.u32 %v5573_v9, %v4932_v10  ;;  %v4903_v47 = vor.u32 %v5565_v26, %v4900_v43  ;;  %v5619_v49 = vld [vmem:[%s8356_s3 + $0x38] sm:$0xff]  ;;  %v5614_v11 = vld [vmem:[%s8356_s3 + $0x10] sm:$0xff] }
 0x17e   :  { %3117 = vmatpush.bf16.msra.mxu2 %v4999_v31  ;;  %v5505_v31 = vld [vmem:[%s8354_s1 + $0x92c] sm:$0xf]  ;;  %v5627_v50 = vld [vmem:[%s8356_s3 + $0x78] sm:$0xff] }
 0x17f   :  { %3082 = vmatpush.bf16.msrb.mxu3 %v4551_v36  ;;  %v5601_v36 = vld [vmem:[%s8354_s1 + $0xc2c] sm:$0xf]  ;;  %v4663_v1 = vor.u32 %v5505_v31, %v4660_v32  ;;  %v5635_v53 = vld [vmem:[%s8356_s3 + $0xb8] sm:$0xff]  ;;  %v5620_v31 = vld [vmem:[%s8356_s3 + $0x40] sm:$0xff]  ;;  %v3142_v32 = vmax.f32 %v7339_v54, 0.0 }
 0x180   :  { %3092 = vmatpush.bf16.msra.mxu0 %v4727_v2  ;;  %v5044_v2 = vld [vmem:[%s8354_s1 + $0xc38] sm:$0xf0]  ;;  %v5613_v19 = vld [vmem:[%s8356_s3 + $0x8] sm:$0xff] }
 0x181   :  { %3105 = vmatpush.bf16.msra.mxu1 %v4855_v38  ;;  %v4919_v38 = vor.u32 %v5569_v34, %v4916_v35  ;;  %v5047_v42 = vor.u32 %v5601_v36, %v5044_v2  ;;  %v5615_v4 = vld [vmem:[%s8356_s3 + $0x18] sm:$0xff]  ;;  %v3146_v34 = vpack.c.bf16 %v3142_v32, %v3142_v32  ;;  %v3147_v35 = vpack.c.bf16 %v3143_v16, %v3143_v16 }
 0x182   :  { %3118 = vmatpush.bf16.msra.mxu2 %v4983_v40  ;;  %v5501_v40 = vld [vmem:[%s8354_s1 + $0x90c] sm:$0xf] }
 0x183   :  { %3083 = vmatpush.bf16.msrb.mxu3 %v4535_v44  ;;  %v5028_v44 = vld [vmem:[%s8354_s1 + $0xc18] sm:$0xf0] }
 0x184   :  { %3093 = vmatpush.bf16.msra.mxu0 %v4711_v45  ;;  %v4775_v45 = vor.u32 %v5533_v60, %v4772_v15 }
 0x185   :  { %3106 = vmatpush.bf16.msra.mxu1 %v4839_v51  ;;  %v5031_v51 = vor.u32 %v5597_v21, %v5028_v44 }
 0x186   :  { %3119 = vmatpush.bf16.msra.mxu2 %v4967_v52 }
 0x187   :  { %3084 = vmatpush.bf16.msrb.mxu3 %v4519_v39 }
 0x188   :  { %3094 = vmatpush.bf16.msra.mxu0 %v4695_v61 }
 0x189   :  { %3107 = vmatpush.bf16.msra.mxu1 %v4823_v46  ;;  %v5633_v46 = vld [vmem:[%s8356_s3 + $0xa8] sm:$0xff] }
 0x18a   :  { %3120 = vmatpush.bf16.msra.mxu2 %v4951_v62  ;;  %3085 = vmatmul.bf16.vlgmr.msrb.gmra.mxu3 %v7579_v24  ;;  %v4644_v24 = vld [vmem:[%s8354_s1 + $0x918] sm:$0xf0]  ;;  %v5616_v62 = vld [vmem:[%s8356_s3 + $0x20] sm:$0xff] }
 0x18b   :  { %3133 = vmatpush.bf16.msra.mxu3 %v5079_v7  ;;  %v4647_v20 = vor.u32 %v5501_v40, %v4644_v24  ;;  %v5623_v7 = vld [vmem:[%s8356_s3 + $0x58] sm:$0xff] }
 0x18c   :  { %3095 = vmatpush.bf16.msra.mxu0 %v4679_v23  ;;  %v2865_v52 = vpop.f32.mrf.mxu2  ;;  %v5621_v23 = vld [vmem:[%s8356_s3 + $0x48] sm:$0xff] }
 0x18d   :  { %3108 = vmatpush.bf16.msra.mxu1 %v4807_v28  ;;  %v2878_v56 = vpop.f32.mrf.mxu3 }
 0x18e   :  { %3121 = vmatpush.bf16.msra.mxu2 %v4935_v30  ;;  %v5612_v30 = vld [vmem:[%s8356_s3] sm:$0xff] }
 0x18f   :  { %3134 = vmatpush.bf16.msra.mxu3 %v5063_v13 }
 0x190   :  { %3096 = vmatpush.bf16.msra.mxu0 %v4663_v1 }
 0x191   :  { %3109 = vmatpush.bf16.msra.mxu1 %v4791_v37 }
 0x192   :  { %3122 = vmatpush.bf16.msra.mxu2 %v4919_v38 }
 0x193   :  { %3135 = vmatpush.bf16.msra.mxu3 %v5047_v42 }
 0x194   :  { %3097 = vmatpush.bf16.msra.mxu0 %v4647_v20  ;;  %v2867_v61 = vpop.f32.mrf.mxu2 }
 0x195   :  { %3110 = vmatpush.bf16.msra.mxu1 %v4775_v45  ;;  %v2904_v39 = vpop.f32.mrf.mxu1  ;;  %v2880_v63 = vpop.f32.mrf.mxu3 }
 0x196   :  { %3123 = vmatpush.bf16.msra.mxu2 %v4903_v47 }
 0x197   :  { %3136 = vmatpush.bf16.msra.mxu3 %v5031_v51  ;;  %3098 = vmatmul.bf16.vlgmr.msra.gmra.mxu0 %v7591_v29  ;;  %v5617_v29 = vld [vmem:[%s8356_s3 + $0x28] sm:$0xff] }
 0x198   :  { %3410 = vmatpush.bf16.msrb.mxu0 %v5619_v49  ;;  %3111 = vmatmul.bf16.vlgmr.msra.gmra.mxu1 %v7682_v17  ;;  %v2814_v17 = vadd.f32 %v8071_v14, %v428_v48 }
 0x199   :  { %3423 = vmatpush.bf16.msrb.mxu1 %v5627_v50  ;;  %3124 = vmatmul.bf16.vlgmr.msra.gmra.mxu2 %v7685_v27  ;;  %v2891_v27 = vpop.f32.mrf.mxu0 }
 0x19a   :  { %3436 = vmatpush.bf16.msrb.mxu2 %v5635_v53  ;;  %5083 = vmatmul.msk.bf16.vlgmr.msra.gmra.mxu3 %vm2463_vm0, %v7712_v41  ;;  %v5624_v41 = vld [vmem:[%s8356_s3 + $0x60] sm:$0xff]  ;;  %v2827_v14 = vadd.f32 %v8079_v5, %v2814_v17  ;;  %v5631_v5 = vld [vmem:[%s8356_s3 + $0x98] sm:$0xff] }
 0x19b   :  { %v5643_v53 = vld [vmem:[%s8356_s3 + $0xf8] sm:$0xff] }
 0x19c   :  { %3411 = vmatpush.bf16.msrb.mxu0 %v5618_v25  ;;  %v2840_v8 = vadd.f32 %v8126_v22, %v2827_v14  ;;  %v5630_v22 = vld [vmem:[%s8356_s3 + $0x90] sm:$0xff]  ;;  %3449 = vmatpush.bf16.msrb.mxu3 %v5643_v53 }
 0x19d   :  { %3424 = vmatpush.bf16.msrb.mxu1 %v5626_v55  ;;  %v2906_v10 = vpop.f32.mrf.mxu1  ;;  %v5642_v55 = vld [vmem:[%s8356_s3 + $0xf0] sm:$0xff] }
 0x19e   :  { %3437 = vmatpush.bf16.msrb.mxu2 %v5634_v58  ;;  %v2853_v18 = vadd.f32 %v8128_v0, %v2840_v8  ;;  %v5629_v0 = vld [vmem:[%s8356_s3 + $0x88] sm:$0xff] }
 0x1a0   :  { %3412 = vmatpush.bf16.msrb.mxu0 %v5617_v29  ;;  %v2866_v28 = vadd.f32 %v2865_v52, %v2853_v18  ;;  %3450 = vmatpush.bf16.msrb.mxu3 %v5642_v55  ;;  %v5641_v29 = vld [vmem:[%s8356_s3 + $0xe8] sm:$0xff] }
 0x1a1   :  { %3425 = vmatpush.bf16.msrb.mxu1 %v5625_v59  ;;  %v2893_v9 = vpop.f32.mrf.mxu0  ;;  %v5640_v59 = vld [vmem:[%s8356_s3 + $0xe0] sm:$0xff] }
 0x1a2   :  { %3438 = vmatpush.bf16.msrb.mxu2 %v5633_v46  ;;  %v2879_v13 = vadd.f32 %v2878_v56, %v2866_v28  ;;  %v5638_v46 = vld [vmem:[%s8356_s3 + $0xd0] sm:$0xff]  ;;  %v5636_v9 = vld [vmem:[%s8356_s3 + $0xc0] sm:$0xff] }
 0x1a4   :  { %3413 = vmatpush.bf16.msrb.mxu0 %v5616_v62  ;;  %v2892_v2 = vadd.f32 %v2891_v27, %v2879_v13  ;;  %3451 = vmatpush.bf16.msrb.mxu3 %v5641_v29  ;;  %v429_v27 = vperm.slane %v8252_v57, 3 }
 0x1a5   :  { %3426 = vmatpush.bf16.msrb.mxu1 %v5624_v41 }
 0x1a6   :  { %3439 = vmatpush.bf16.msrb.mxu2 %v5632_v3  ;;  %v2905_v37 = vadd.f32 %v2904_v39, %v2892_v2  ;;  %v5639_v39 = vld [vmem:[%s8356_s3 + $0xd8] sm:$0xff]  ;;  %v5637_v3 = vld [vmem:[%s8356_s3 + $0xc8] sm:$0xff] }
 0x1a8   :  { %3414 = vmatpush.bf16.msrb.mxu0 %v5615_v4  ;;  %3452 = vmatpush.bf16.msrb.mxu3 %v5640_v59 }
 0x1a9   :  { %3427 = vmatpush.bf16.msrb.mxu1 %v5623_v7 }
 0x1aa   :  { %3440 = vmatpush.bf16.msrb.mxu2 %v5631_v5 }
 0x1ac   :  { %3415 = vmatpush.bf16.msrb.mxu0 %v5614_v11  ;;  %v2917_v36 = vpop.f32.mrf.mxu2  ;;  %3453 = vmatpush.bf16.msrb.mxu3 %v5639_v39 }
 0x1ad   :  { %3428 = vmatpush.bf16.msrb.mxu1 %v5622_v12  ;;  %v2930_v1 = vpop.f32.mrf.mxu3  ;;  %v2918_v54 = vadd.f32 %v2917_v36, %v2905_v37 }
 0x1ae   :  { %3441 = vmatpush.bf16.msrb.mxu2 %v5630_v22 }
 0x1af   :  { %v2931_v60 = vadd.f32 %v2930_v1, %v2918_v54 }
 0x1b0   :  { %3416 = vmatpush.bf16.msrb.mxu0 %v5613_v19  ;;  %3454 = vmatpush.bf16.msrb.mxu3 %v5638_v46 }
 0x1b1   :  { %3429 = vmatpush.bf16.msrb.mxu1 %v5621_v23 }
 0x1b2   :  { %3442 = vmatpush.bf16.msrb.mxu2 %v5629_v0 }
 0x1b4   :  { %3417 = vmatpush.bf16.msrb.mxu0 %v5612_v30  ;;  %v2943_v38 = vpop.f32.mrf.mxu0  ;;  %v2919_v6 = vpop.f32.mrf.mxu2  ;;  %3455 = vmatpush.bf16.msrb.mxu3 %v5637_v3 }
 0x1b5   :  { %3430 = vmatpush.bf16.msrb.mxu1 %v5620_v31  ;;  %v2956_v40 = vpop.f32.mrf.mxu1  ;;  %v2932_v24 = vpop.f32.mrf.mxu3  ;;  %v2944_v42 = vadd.f32 %v2943_v38, %v2931_v60  ;;  %v5645_v38 = vld [vmem:[%s8357_s4] ss:$0 sm:$0xff] }
 0x1b6   :  { %3443 = vmatpush.bf16.msrb.mxu2 %v5628_v33 }
 0x1b7   :  { %3418 = vmatmul.bf16.vlgmr.msrb.gmra.mxu0 %v3146_v34  ;;  %v2957_v26 = vadd.f32 %v2956_v40, %v2944_v42 }
 0x1b8   :  { %3431 = vmatmul.bf16.vlgmr.msrb.gmra.mxu1 %v3147_v35  ;;  %3456 = vmatpush.bf16.msrb.mxu3 %v5636_v9 }
 0x1bc   :  { %v2945_v15 = vpop.f32.mrf.mxu0  ;;  %v2969_v20 = vpop.f32.mrf.mxu2 }
 0x1bd   :  { %v2958_v43 = vpop.f32.mrf.mxu1  ;;  %v2970_v21 = vadd.f32 %v2969_v20, %v2957_v26 }
 0x1bf   :  { %v3144_v44 = vmax.f32 %v2970_v21, 0.0 }
 0x1c1   :  { %v3148_v45 = vpack.c.bf16 %v3144_v44, %v3144_v44 }
 0x1c3   :  { %3444 = vmatmul.bf16.vlgmr.msrb.gmra.mxu2 %v3148_v45 }
 0x1c4   :  { %v2971_v47 = vpop.f32.mrf.mxu2 }
 0x1cd   :  { %v2982_v49 = vpop.f32.mrf.mxu3 }
 0x1ce   :  { %v2983_v62 = vadd.f32 %v2982_v49, %v429_v27 }
 0x1d4   :  { %v2995_v50 = vpop.f32.mrf.mxu0 }
 0x1d5   :  { %v3008_v51 = vpop.f32.mrf.mxu1  ;;  %v2984_v52 = vpop.f32.mrf.mxu3  ;;  %v2996_v14 = vadd.f32 %v2995_v50, %v2983_v62 }
 0x1d7   :  { %v3009_v7 = vadd.f32 %v3008_v51, %v2996_v14 }
 0x1dc   :  { %v3021_v25 = vpop.f32.mrf.mxu2  ;;  %v2997_v56 = vpop.f32.mrf.mxu0 }
 0x1dd   :  { %v3010_v48 = vpop.f32.mrf.mxu1  ;;  %v3022_v10 = vadd.f32 %v3021_v25, %v3009_v7 }
 0x1e4   :  { %v3023_v58 = vpop.f32.mrf.mxu2 }
 0x1ed   :  { %v3034_v17 = vpop.f32.mrf.mxu3 }
 0x1ee   :  { %v3035_v11 = vadd.f32 %v3034_v17, %v3022_v10 }
 0x1f4   :  { %v3047_v61 = vpop.f32.mrf.mxu0 }
 0x1f5   :  { %v3060_v41 = vpop.f32.mrf.mxu1  ;;  %v3036_v63 = vpop.f32.mrf.mxu3  ;;  %v3048_v12 = vadd.f32 %v3047_v61, %v3035_v11 }
 0x1f7   :  { %v3061_v22 = vadd.f32 %v3060_v41, %v3048_v12 }
 0x1fc   :  { %v3073_v57 = vpop.f32.mrf.mxu2  ;;  %v3049_v4 = vpop.f32.mrf.mxu0 }
 0x1fd   :  { %v3062_v8 = vpop.f32.mrf.mxu1  ;;  %v3074_v19 = vadd.f32 %v3073_v57, %v3061_v22 }
 0x204   :  { %v3075_v5 = vpop.f32.mrf.mxu2 }
 0x20d   :  { %v3086_v18 = vpop.f32.mrf.mxu3 }
 0x20e   :  { %v3087_v23 = vadd.f32 %v3086_v18, %v3074_v19 }
 0x214   :  { %v3099_v28 = vpop.f32.mrf.mxu0 }
 0x215   :  { %v3112_v0 = vpop.f32.mrf.mxu1  ;;  %v3100_v30 = vadd.f32 %v3099_v28, %v3087_v23  ;;  %v3088_v31 = vpop.f32.mrf.mxu3 }
 0x217   :  { %v3113_v32 = vadd.f32 %v3112_v0, %v3100_v30 }
 0x21c   :  { %v3125_v16 = vpop.f32.mrf.mxu2  ;;  %v3101_v33 = vpop.f32.mrf.mxu0 }
 0x21d   :  { %v3126_v13 = vadd.f32 %v3125_v16, %v3113_v32  ;;  %v3114_v34 = vpop.f32.mrf.mxu1  ;;  %v3138_v35 = vpop.f32.mrf.mxu3 }
 0x21f   :  { %v3139_v36 = vadd.f32 %v3138_v35, %v3126_v13 }
 0x221   :  { %v3145_v2 = vmax.f32 %v3139_v36, 0.0 }
 0x223   :  { %v3149_v1 = vpack.c.bf16 %v3145_v2, %v3145_v2 }
 0x224   :  { %v3127_v37 = vpop.f32.mrf.mxu2 }
 0x225   :  { %3457 = vmatmul.bf16.vlgmr.msrb.gmra.mxu3 %v3149_v1  ;;  %v3140_v54 = vpop.f32.mrf.mxu3 }
 0x234   :  { %v3419_v6 = vpop.f32.mrf.mxu0 }
 0x235   :  { %v3432_v40 = vpop.f32.mrf.mxu1  ;;  %v3420_v24 = vadd.f32 %v5645_v38, %v3419_v6 }
 0x237   :  { %v3433_v60 = vadd.f32 %v3432_v40, %v3420_v24 }
 0x23c   :  { %v3421_v42 = vpop.f32.mrf.mxu0 }
 0x23d   :  { %v3434_v15 = vpop.f32.mrf.mxu1 }
 0x246   :  { %v3445_v26 = vpop.f32.mrf.mxu2 }
 0x247   :  { %v3446_v43 = vadd.f32 %v3445_v26, %v3433_v60 }
 0x24e   :  { %v3447_v20 = vpop.f32.mrf.mxu2 }
 0x2a8   :  { %v3458_v21 = vpop.f32.mrf.mxu3 }
 0x2a9   :  { %v3459_v44 = vadd.f32 %v3458_v21, %v3446_v43 }
 0x2ab   :  { %3463 = vst.msk [vmem:[#allocation2] sm:$0x3] %vm3462_vm1, %v3459_v44 }
 0x2ac   :  { %3474 = dma.vmem_to_hbm [thread:$0]  %s3470_s7, 32, %s3472_s10, [#allocation3]  }
 0x2b0   :  { %v3460_v45 = vpop.f32.mrf.mxu3 }
 0x2b1   :  { %5676 = dma.done.wait [#allocation3], 32  }
 0x2b2   :  { %5677 = vsyncadd [#allocation3], 4294967264 }
 0x2b3   :  { %3479 = vsyncpa [#allocation3], 1 }

</bundles_post_ra>
